<compile_context>
chip_gen: v7x
topology: tpu7x:2x2x1
jax: 0.10.0
libtpu: 0.0.40
codegen_flags: <defaults>
</compile_context>

<pallas_src>
import numpy as np
import jax
import jax.numpy as jnp
from jax import lax
from jax.experimental import pallas as pl
from jax.experimental.pallas import tpu as pltpu

NUM_QUBITS = 10
NUM_LAYERS = 3
DIM = 2 ** NUM_QUBITS          # 1024
TK = 512                       # K-tile of the unitary contraction (grid = DIM // TK)

INPUT_SIZE = 16
HIDDEN_SIZE = 32
OUTPUT_SIZE = 4

# ---------- constant tables (host glue, float64) ----------
_s = np.arange(DIM)
# BITMASK[i, s] = bit of wire i in basis index s (wire 0 = MSB, PennyLane order)
BITMASK = np.stack(
    [((_s >> (NUM_QUBITS - 1 - i)) & 1) for i in range(NUM_QUBITS)]
).astype(np.float64)                                    # (10, 1024)
SIGN_T = (1.0 - 2.0 * BITMASK.T)                        # (1024, 10), exact +/-1


# ---------- quantum-circuit unitary construction (numpy glue, runs once) ----------
def _apply_1q(state, gate, wire):
    st = np.moveaxis(state, wire, 0)
    shp = st.shape
    st = gate @ st.reshape(2, -1)
    return np.moveaxis(st.reshape(shp), 0, wire)


def _apply_cnot(state, control, target):
    st = np.moveaxis(state, (control, target), (0, 1))
    shp = st.shape
    cnot = np.array([[1, 0, 0, 0],
                     [0, 1, 0, 0],
                     [0, 0, 0, 1],
                     [0, 0, 1, 0]], dtype=np.complex128)
    st = cnot @ st.reshape(4, -1)
    return np.moveaxis(st.reshape(shp), (0, 1), (control, target))


def build_fixed_unitary(qweights):
    """Unitary of the weight-dependent part of `quantum_circuit` (everything
    after the data-dependent input-encoding RY layer)."""
    qw = np.asarray(qweights, dtype=np.float64)
    U = np.eye(DIM, dtype=np.complex128).reshape((2,) * NUM_QUBITS + (DIM,))
    for layer in range(NUM_LAYERS):
        for i in range(NUM_QUBITS):
            th = qw[layer, i, 0]
            ph = qw[layer, i, 1]
            ry = np.array([[np.cos(th / 2), -np.sin(th / 2)],
                           [np.sin(th / 2),  np.cos(th / 2)]], dtype=np.complex128)
            rz = np.array([[np.exp(-0.5j * ph), 0.0],
                           [0.0, np.exp(0.5j * ph)]], dtype=np.complex128)
            U = _apply_1q(U, ry, i)
            U = _apply_1q(U, rz, i)
        for i in range(NUM_QUBITS - 1):
            U = _apply_cnot(U, i, i + 1)
        U = _apply_cnot(U, NUM_QUBITS - 1, 0)
    return U.reshape(DIM, DIM)   # column j = circuit applied to basis state |j>


def quantize_unitary(U):
    """Returns (ucat_int8, per-basis-state scale).
    ucat column j   (j <  DIM) holds Re(U[j, :]) / scale[j]  (rounded to int8)
    ucat column j+D (j >= DIM) holds Im(U[j, :]) / scale[j]."""
    ucat = np.concatenate([U.real.T, U.imag.T], axis=1)              # (DIM, 2*DIM)
    row_absmax = np.maximum(np.abs(U.real), np.abs(U.imag)).max(axis=1)
    scale = np.maximum(row_absmax, 1e-8) / 127.0                     # (DIM,)
    col_scale = np.concatenate([scale, scale])                       # (2*DIM,)
    ucat_q = np.clip(np.rint(ucat / col_scale[None, :]), -127, 127).astype(np.int8)
    return ucat_q, scale


# ---------- Pallas kernel ----------
def _hybrid_kernel(x_ref, w1t_ref, b1_ref, ucat_ref, sw2_ref, b2_ref, w3t_ref, b3_ref,
                   y_ref, psi_acc, h_sc, c_sc, s_sc):
    k = pl.program_id(0)

    # k-invariant prologue: fc1 + relu, and cos/sin of the 10 encoding angles.
    # Computed once, stashed in VMEM scratch (also zero-inits the accumulator).
    @pl.when(k == 0)
    def _prologue():
        h = jnp.dot(x_ref[...], w1t_ref[...],
                    preferred_element_type=jnp.float32) + b1_ref[...]
        h = jnp.maximum(h, 0.0)                                      # (B, H)
        h_sc[...] = h
        half = 0.5 * h[:, :NUM_QUBITS]                               # (B, 10)
        c_sc[...] = jnp.cos(half)
        s_sc[...] = jnp.sin(half)
        psi_acc[...] = jnp.zeros_like(psi_acc)

    c = c_sc[...]                                                    # (B, 10)
    s = s_sc[...]

    # Input-encoding RY layer on |0..0>: psi0[s] = prod_i (cos or sin) per bit.
    # The bit table for this K-tile is generated from an iota (no HBM stream).
    col = lax.broadcasted_iota(jnp.int32, (1, TK), 1) + k * TK       # (1, TK)
    bit = ((col >> (NUM_QUBITS - 1)) & 1).astype(jnp.float32)
    psi0 = c[:, 0:1] + (s[:, 0:1] - c[:, 0:1]) * bit                 # (B, TK)
    for i in range(1, NUM_QUBITS):
        bit = ((col >> (NUM_QUBITS - 1 - i)) & 1).astype(jnp.float32)
        psi0 = psi0 * (c[:, i:i + 1] + (s[:, i:i + 1] - c[:, i:i + 1]) * bit)

    # Dequantize the int8 K-tile to bf16 (exact: |values| <= 127) and run one
    # MXU matmul, accumulated in f32.  Result is psi scaled by 1/scale[j]; the
    # scale^2 is folded into sw2, so no rescale is needed in-kernel.
    u_tile = ucat_ref[...].astype(jnp.bfloat16)                      # (TK, 2*DIM)
    psi_acc[...] += jnp.dot(psi0.astype(jnp.bfloat16), u_tile,
                            preferred_element_type=jnp.float32)      # (B, 2*DIM)

    # Epilogue on the last K-tile: |psi|^2, fused (scale^2 * PauliZ * fc2)
    # matmul, relu, residual add, fc3.
    @pl.when(k == pl.num_programs(0) - 1)
    def _epilogue():
        psi = psi_acc[...]
        psi_re = psi[:, :DIM]
        psi_im = psi[:, DIM:]
        probs_q = psi_re * psi_re + psi_im * psi_im                  # probs / scale^2
        q = jnp.dot(probs_q, sw2_ref[...],
                    preferred_element_type=jnp.float32) + b2_ref[...]
        q = jnp.maximum(q, 0.0)                                      # (B, H)
        h = h_sc[...]
        y_ref[...] = jnp.dot(h + q, w3t_ref[...],
                             preferred_element_type=jnp.float32) + b3_ref[...]


def hybrid_forward(x, W1, b1, b2, W3, b3, ucat_q, sw2_folded):
    """x: (B, INPUT_SIZE); each row is one forward of the (unbatched) module."""
    B = x.shape[0]
    # Pad the batch to a sublane-aligned multiple of 8 so the U stream is
    # amortized over full vregs / MXU M-rows; padded rows are sliced off below.
    B_pad = max(8, ((B + 7) // 8) * 8)
    x_pad = jnp.pad(x, ((0, B_pad - B), (0, 0))) if B_pad != B else x

    const = lambda k: (0, 0)   # blocks that stay VMEM-resident across the K grid
    grid_spec = pltpu.PrefetchScalarGridSpec(
        num_scalar_prefetch=0,
        grid=(DIM // TK,),
        in_specs=[
            pl.BlockSpec((B_pad, INPUT_SIZE), const),
            pl.BlockSpec((INPUT_SIZE, HIDDEN_SIZE), const),
            pl.BlockSpec((1, HIDDEN_SIZE), const),
            pl.BlockSpec((TK, 2 * DIM), lambda k: (k, 0)),        # int8 U K-tile
            pl.BlockSpec((DIM, HIDDEN_SIZE), const),              # scale^2*SIGN folded fc2
            pl.BlockSpec((1, HIDDEN_SIZE), const),
            pl.BlockSpec((HIDDEN_SIZE, OUTPUT_SIZE), const),
            pl.BlockSpec((1, OUTPUT_SIZE), const),
        ],
        out_specs=pl.BlockSpec((B_pad, OUTPUT_SIZE), const),
        scratch_shapes=[
            pltpu.VMEM((B_pad, 2 * DIM), jnp.float32),            # psi accumulator
            pltpu.VMEM((B_pad, HIDDEN_SIZE), jnp.float32),        # h (fc1 output)
            pltpu.VMEM((B_pad, NUM_QUBITS), jnp.float32),         # cos(angle/2)
            pltpu.VMEM((B_pad, NUM_QUBITS), jnp.float32),         # sin(angle/2)
        ],
    )
    y_pad = pl.pallas_call(
        _hybrid_kernel,
        out_shape=jax.ShapeDtypeStruct((B_pad, OUTPUT_SIZE), jnp.float32),
        grid_spec=grid_spec,
        compiler_params=pltpu.CompilerParams(
            dimension_semantics=("arbitrary",),
            vmem_limit_bytes=16 * 1024 * 1024),
    )(x_pad, W1.T, b1.reshape(1, -1), ucat_q, sw2_folded,
      b2.reshape(1, -1), W3.T, b3.reshape(1, -1))
    return y_pad[:B]


# ---------- float64 numpy reference (for correctness check) ----------
def reference_forward(x, W1, b1, W2, b2, W3, b3, U):
    x = np.asarray(x, np.float64)
    h = np.maximum(np.asarray(W1, np.float64) @ x + np.asarray(b1, np.float64), 0.0)
    ang = h[:NUM_QUBITS]
    psi0 = np.array([1.0], dtype=np.complex128)
    for a in ang:
        psi0 = np.kron(psi0, np.array([np.cos(a / 2), np.sin(a / 2)],
                                      dtype=np.complex128))
    psi = U @ psi0
    probs = np.abs(psi) ** 2
    z = np.array([np.sum(probs * (1.0 - 2.0 * (((_s >> (NUM_QUBITS - 1 - i)) & 1))))
                  for i in range(NUM_QUBITS)])
    q = np.maximum(np.asarray(W2, np.float64) @ z + np.asarray(b2, np.float64), 0.0)
    return np.asarray(W3, np.float64) @ (h + q) + np.asarray(b3, np.float64)


if __name__ == "__main__":
    key = jax.random.PRNGKey(0)
    ks = jax.random.split(key, 8)

    def linear_init(kw, kb, fan_in, fan_out):
        bound = 1.0 / float(np.sqrt(fan_in))
        W = jax.random.uniform(kw, (fan_out, fan_in), jnp.float32, -bound, bound)
        b = jax.random.uniform(kb, (fan_out,), jnp.float32, -bound, bound)
        return W, b

    W1, b1 = linear_init(ks[0], ks[1], INPUT_SIZE, HIDDEN_SIZE)
    W2, b2 = linear_init(ks[2], ks[3], NUM_QUBITS, HIDDEN_SIZE)
    W3, b3 = linear_init(ks[4], ks[5], HIDDEN_SIZE, OUTPUT_SIZE)
    qweights = jax.random.uniform(ks[6], (NUM_LAYERS, NUM_QUBITS, 2),
                                  jnp.float32, 0.0, 2.0 * float(np.pi))
    BATCH = 4   # each row is an independent forward of the unbatched module
    X = jax.random.normal(ks[7], (BATCH, INPUT_SIZE), jnp.float32)

    # Parameter setup (host glue, runs once):
    #  * fold the circuit weights into a fixed unitary
    #  * int8-quantize [Re(U^T)|Im(U^T)] with a per-basis-state scale
    #  * fold the PauliZ sign matrix and scale^2 into fc2 in float64, cast f32
    U = build_fixed_unitary(np.asarray(qweights))
    ucat_q_np, scale = quantize_unitary(U)
    ucat_q = jnp.asarray(ucat_q_np)                                  # (DIM, 2*DIM) int8
    sw2_np = SIGN_T @ np.asarray(W2, np.float64).T                   # (DIM, HIDDEN)
    sw2_folded = jnp.asarray(sw2_np * (scale ** 2)[:, None], dtype=jnp.float32)

    y = hybrid_forward(X, W1, b1, b2, W3, b3, ucat_q, sw2_folded)
    y = jax.block_until_ready(y)

    y_np = np.asarray(y)
    for r in range(BATCH):
        y_ref = reference_forward(np.asarray(X[r]), np.asarray(W1), np.asarray(b1),
                                  np.asarray(W2), np.asarray(b2),
                                  np.asarray(W3), np.asarray(b3), U)
        # int8 (scaled) unitary + bf16 psi0 bound the end-to-end error at O(1e-3)
        np.testing.assert_allclose(y_np[r], y_ref, rtol=1e-2, atol=1e-2)
    print("KERNEL_OK")
</pallas_src>

<mosaic_0001>
module attributes {stable_mosaic.version = 11 : i64} {
  func.func @_hybrid_kernel(%arg0: i32, %arg1: memref<8x16xf32, #tpu.memory_space<vmem>>, %arg2: memref<16x32xf32, #tpu.memory_space<vmem>>, %arg3: memref<1x32xf32, #tpu.memory_space<vmem>>, %arg4: memref<512x2048xi8, #tpu.memory_space<vmem>>, %arg5: memref<1024x32xf32, #tpu.memory_space<vmem>>, %arg6: memref<1x32xf32, #tpu.memory_space<vmem>>, %arg7: memref<32x4xf32, #tpu.memory_space<vmem>>, %arg8: memref<1x4xf32, #tpu.memory_space<vmem>>, %arg9: memref<8x4xf32, #tpu.memory_space<vmem>>, %arg10: memref<8x2048xf32, #tpu.memory_space<vmem>>, %arg11: memref<8x32xf32, #tpu.memory_space<vmem>>, %arg12: memref<8x10xf32, #tpu.memory_space<vmem>>, %arg13: memref<8x10xf32, #tpu.memory_space<vmem>>) attributes {dimension_semantics = [#tpu.dimension_semantics<arbitrary>], iteration_bounds = array<i64: 2>, scalar_prefetch = 0 : i64, scratch_operands = 4 : i64, tpu.core_type = #tpu.core_type<tc>, window_params = [{pipeline_mode = #tpu.pipeline_mode<synchronous>, transform_indices = @transform_0, window_bounds = array<i64: 8, 16>}, {pipeline_mode = #tpu.pipeline_mode<synchronous>, transform_indices = @transform_1, window_bounds = array<i64: 16, 32>}, {pipeline_mode = #tpu.pipeline_mode<synchronous>, transform_indices = @transform_2, window_bounds = array<i64: 1, 32>}, {transform_indices = @transform_3, window_bounds = array<i64: 512, 2048>}, {pipeline_mode = #tpu.pipeline_mode<synchronous>, transform_indices = @transform_4, window_bounds = array<i64: 1024, 32>}, {pipeline_mode = #tpu.pipeline_mode<synchronous>, transform_indices = @transform_5, window_bounds = array<i64: 1, 32>}, {pipeline_mode = #tpu.pipeline_mode<synchronous>, transform_indices = @transform_6, window_bounds = array<i64: 32, 4>}, {pipeline_mode = #tpu.pipeline_mode<synchronous>, transform_indices = @transform_7, window_bounds = array<i64: 1, 4>}, {pipeline_mode = #tpu.pipeline_mode<synchronous>, transform_indices = @transform_8, window_bounds = array<i64: 8, 4>}]} {
    %c0_i32 = arith.constant 0 : i32
    %0 = arith.cmpi eq, %arg0, %c0_i32 : i32
    %1 = arith.extui %0 : i1 to i32
    %c0_i32_0 = arith.constant 0 : i32
    %2 = arith.cmpi ne, %1, %c0_i32_0 : i32
    scf.if %2 {
      %c0_23 = arith.constant 0 : index
      %c0_24 = arith.constant 0 : index
      %168 = vector.load %arg1[%c0_23, %c0_24] : memref<8x16xf32, #tpu.memory_space<vmem>>, vector<8x16xf32>
      %c0_25 = arith.constant 0 : index
      %c0_26 = arith.constant 0 : index
      %169 = vector.load %arg2[%c0_25, %c0_26] : memref<16x32xf32, #tpu.memory_space<vmem>>, vector<16x32xf32>
      %cst_27 = arith.constant dense<0.000000e+00> : vector<8x32xf32>
      %170 = tpu.matmul %168, %169, %cst_27 {dimension_numbers = #tpu.dot_dimension_numbers<[1], [0], [0], [1], [0, 0, 1, 1], [], []>} : vector<8x16xf32>, vector<16x32xf32>, vector<8x32xf32> -> vector<8x32xf32>
      %c0_28 = arith.constant 0 : index
      %c0_29 = arith.constant 0 : index
      %171 = vector.load %arg3[%c0_28, %c0_29] : memref<1x32xf32, #tpu.memory_space<vmem>>, vector<1x32xf32>
      %172 = vector.broadcast %171 : vector<1x32xf32> to vector<8x32xf32>
      %173 = arith.addf %170, %172 : vector<8x32xf32>
      %cst_30 = arith.constant 0.000000e+00 : f32
      %174 = vector.broadcast %cst_30 : f32 to vector<8x32xf32>
      %175 = arith.maximumf %173, %174 : vector<8x32xf32>
      %c0_31 = arith.constant 0 : index
      %c0_32 = arith.constant 0 : index
      %176 = vector.load %arg11[%c0_31, %c0_32] : memref<8x32xf32, #tpu.memory_space<vmem>>, vector<8x32xf32>
      tpu.vector_store %arg11[%c0_31, %c0_32], %175 {strides = array<i32>} : memref<8x32xf32, #tpu.memory_space<vmem>>, vector<8x32xf32>,
      %177 = vector.extract_strided_slice %175 {offsets = [0, 0], sizes = [8, 10], strides = [1, 1]} : vector<8x32xf32> to vector<8x10xf32>
      %cst_33 = arith.constant 5.000000e-01 : f32
      %178 = vector.broadcast %cst_33 : f32 to vector<8x10xf32>
      %179 = arith.mulf %178, %177 : vector<8x10xf32>
      %180 = math.cos %179 : vector<8x10xf32>
      %c0_34 = arith.constant 0 : index
      %c0_35 = arith.constant 0 : index
      %181 = vector.load %arg12[%c0_34, %c0_35] : memref<8x10xf32, #tpu.memory_space<vmem>>, vector<8x10xf32>
      tpu.vector_store %arg12[%c0_34, %c0_35], %180 {strides = array<i32>} : memref<8x10xf32, #tpu.memory_space<vmem>>, vector<8x10xf32>,
      %182 = math.sin %179 : vector<8x10xf32>
      %c0_36 = arith.constant 0 : index
      %c0_37 = arith.constant 0 : index
      %183 = vector.load %arg13[%c0_36, %c0_37] : memref<8x10xf32, #tpu.memory_space<vmem>>, vector<8x10xf32>
      tpu.vector_store %arg13[%c0_36, %c0_37], %182 {strides = array<i32>} : memref<8x10xf32, #tpu.memory_space<vmem>>, vector<8x10xf32>,
      %cst_38 = arith.constant 0.000000e+00 : f32
      %184 = vector.broadcast %cst_38 : f32 to vector<8x2048xf32>
      %c0_39 = arith.constant 0 : index
      %c0_40 = arith.constant 0 : index
      %185 = vector.load %arg10[%c0_39, %c0_40] : memref<8x2048xf32, #tpu.memory_space<vmem>>, vector<8x2048xf32>
      tpu.vector_store %arg10[%c0_39, %c0_40], %184 {strides = array<i32>} : memref<8x2048xf32, #tpu.memory_space<vmem>>, vector<8x2048xf32>,
    } else {
    }
    %c0 = arith.constant 0 : index
    %c0_1 = arith.constant 0 : index
    %3 = vector.load %arg12[%c0, %c0_1] : memref<8x10xf32, #tpu.memory_space<vmem>>, vector<8x10xf32>
    %c0_2 = arith.constant 0 : index
    %c0_3 = arith.constant 0 : index
    %4 = vector.load %arg13[%c0_2, %c0_3] : memref<8x10xf32, #tpu.memory_space<vmem>>, vector<8x10xf32>
    %5 = tpu.iota {dimensions = array<i32: 1>} : vector<1x512xi32>
    %c512_i32 = arith.constant 512 : i32
    %6 = arith.muli %arg0, %c512_i32 : i32
    %7 = vector.broadcast %6 : i32 to vector<1x512xi32>
    %8 = arith.addi %5, %7 : vector<1x512xi32>
    %c9_i32 = arith.constant 9 : i32
    %9 = vector.broadcast %c9_i32 : i32 to vector<1x512xi32>
    %10 = arith.shrsi %8, %9 : vector<1x512xi32>
    %c1_i32 = arith.constant 1 : i32
    %11 = vector.broadcast %c1_i32 : i32 to vector<1x512xi32>
    %12 = arith.andi %10, %11 : vector<1x512xi32>
    %13 = arith.sitofp %12 : vector<1x512xi32> to vector<1x512xf32>
    %14 = vector.extract_strided_slice %3 {offsets = [0, 0], sizes = [8, 1], strides = [1, 1]} : vector<8x10xf32> to vector<8x1xf32>
    %15 = vector.extract_strided_slice %4 {offsets = [0, 0], sizes = [8, 1], strides = [1, 1]} : vector<8x10xf32> to vector<8x1xf32>
    %16 = vector.extract_strided_slice %3 {offsets = [0, 0], sizes = [8, 1], strides = [1, 1]} : vector<8x10xf32> to vector<8x1xf32>
    %17 = arith.subf %15, %16 : vector<8x1xf32>
    %18 = vector.broadcast %17 : vector<8x1xf32> to vector<8x512xf32>
    %19 = vector.broadcast %13 : vector<1x512xf32> to vector<8x512xf32>
    %20 = arith.mulf %18, %19 : vector<8x512xf32>
    %21 = vector.broadcast %14 : vector<8x1xf32> to vector<8x512xf32>
    %22 = arith.addf %21, %20 : vector<8x512xf32>
    %c8_i32 = arith.constant 8 : i32
    %23 = vector.broadcast %c8_i32 : i32 to vector<1x512xi32>
    %24 = arith.shrsi %8, %23 : vector<1x512xi32>
    %c1_i32_4 = arith.constant 1 : i32
    %25 = vector.broadcast %c1_i32_4 : i32 to vector<1x512xi32>
    %26 = arith.andi %24, %25 : vector<1x512xi32>
    %27 = arith.sitofp %26 : vector<1x512xi32> to vector<1x512xf32>
    %28 = vector.extract_strided_slice %3 {offsets = [0, 1], sizes = [8, 1], strides = [1, 1]} : vector<8x10xf32> to vector<8x1xf32>
    %29 = vector.extract_strided_slice %4 {offsets = [0, 1], sizes = [8, 1], strides = [1, 1]} : vector<8x10xf32> to vector<8x1xf32>
    %30 = vector.extract_strided_slice %3 {offsets = [0, 1], sizes = [8, 1], strides = [1, 1]} : vector<8x10xf32> to vector<8x1xf32>
    %31 = arith.subf %29, %30 : vector<8x1xf32>
    %32 = vector.broadcast %31 : vector<8x1xf32> to vector<8x512xf32>
    %33 = vector.broadcast %27 : vector<1x512xf32> to vector<8x512xf32>
    %34 = arith.mulf %32, %33 : vector<8x512xf32>
    %35 = vector.broadcast %28 : vector<8x1xf32> to vector<8x512xf32>
    %36 = arith.addf %35, %34 : vector<8x512xf32>
    %37 = arith.mulf %22, %36 : vector<8x512xf32>
    %c7_i32 = arith.constant 7 : i32
    %38 = vector.broadcast %c7_i32 : i32 to vector<1x512xi32>
    %39 = arith.shrsi %8, %38 : vector<1x512xi32>
    %c1_i32_5 = arith.constant 1 : i32
    %40 = vector.broadcast %c1_i32_5 : i32 to vector<1x512xi32>
    %41 = arith.andi %39, %40 : vector<1x512xi32>
    %42 = arith.sitofp %41 : vector<1x512xi32> to vector<1x512xf32>
    %43 = vector.extract_strided_slice %3 {offsets = [0, 2], sizes = [8, 1], strides = [1, 1]} : vector<8x10xf32> to vector<8x1xf32>
    %44 = vector.extract_strided_slice %4 {offsets = [0, 2], sizes = [8, 1], strides = [1, 1]} : vector<8x10xf32> to vector<8x1xf32>
    %45 = vector.extract_strided_slice %3 {offsets = [0, 2], sizes = [8, 1], strides = [1, 1]} : vector<8x10xf32> to vector<8x1xf32>
    %46 = arith.subf %44, %45 : vector<8x1xf32>
    %47 = vector.broadcast %46 : vector<8x1xf32> to vector<8x512xf32>
    %48 = vector.broadcast %42 : vector<1x512xf32> to vector<8x512xf32>
    %49 = arith.mulf %47, %48 : vector<8x512xf32>
    %50 = vector.broadcast %43 : vector<8x1xf32> to vector<8x512xf32>
    %51 = arith.addf %50, %49 : vector<8x512xf32>
    %52 = arith.mulf %37, %51 : vector<8x512xf32>
    %c6_i32 = arith.constant 6 : i32
    %53 = vector.broadcast %c6_i32 : i32 to vector<1x512xi32>
    %54 = arith.shrsi %8, %53 : vector<1x512xi32>
    %c1_i32_6 = arith.constant 1 : i32
    %55 = vector.broadcast %c1_i32_6 : i32 to vector<1x512xi32>
    %56 = arith.andi %54, %55 : vector<1x512xi32>
    %57 = arith.sitofp %56 : vector<1x512xi32> to vector<1x512xf32>
    %58 = vector.extract_strided_slice %3 {offsets = [0, 3], sizes = [8, 1], strides = [1, 1]} : vector<8x10xf32> to vector<8x1xf32>
    %59 = vector.extract_strided_slice %4 {offsets = [0, 3], sizes = [8, 1], strides = [1, 1]} : vector<8x10xf32> to vector<8x1xf32>
    %60 = vector.extract_strided_slice %3 {offsets = [0, 3], sizes = [8, 1], strides = [1, 1]} : vector<8x10xf32> to vector<8x1xf32>
    %61 = arith.subf %59, %60 : vector<8x1xf32>
    %62 = vector.broadcast %61 : vector<8x1xf32> to vector<8x512xf32>
    %63 = vector.broadcast %57 : vector<1x512xf32> to vector<8x512xf32>
    %64 = arith.mulf %62, %63 : vector<8x512xf32>
    %65 = vector.broadcast %58 : vector<8x1xf32> to vector<8x512xf32>
    %66 = arith.addf %65, %64 : vector<8x512xf32>
    %67 = arith.mulf %52, %66 : vector<8x512xf32>
    %c5_i32 = arith.constant 5 : i32
    %68 = vector.broadcast %c5_i32 : i32 to vector<1x512xi32>
    %69 = arith.shrsi %8, %68 : vector<1x512xi32>
    %c1_i32_7 = arith.constant 1 : i32
    %70 = vector.broadcast %c1_i32_7 : i32 to vector<1x512xi32>
    %71 = arith.andi %69, %70 : vector<1x512xi32>
    %72 = arith.sitofp %71 : vector<1x512xi32> to vector<1x512xf32>
    %73 = vector.extract_strided_slice %3 {offsets = [0, 4], sizes = [8, 1], strides = [1, 1]} : vector<8x10xf32> to vector<8x1xf32>
    %74 = vector.extract_strided_slice %4 {offsets = [0, 4], sizes = [8, 1], strides = [1, 1]} : vector<8x10xf32> to vector<8x1xf32>
    %75 = vector.extract_strided_slice %3 {offsets = [0, 4], sizes = [8, 1], strides = [1, 1]} : vector<8x10xf32> to vector<8x1xf32>
    %76 = arith.subf %74, %75 : vector<8x1xf32>
    %77 = vector.broadcast %76 : vector<8x1xf32> to vector<8x512xf32>
    %78 = vector.broadcast %72 : vector<1x512xf32> to vector<8x512xf32>
    %79 = arith.mulf %77, %78 : vector<8x512xf32>
    %80 = vector.broadcast %73 : vector<8x1xf32> to vector<8x512xf32>
    %81 = arith.addf %80, %79 : vector<8x512xf32>
    %82 = arith.mulf %67, %81 : vector<8x512xf32>
    %c4_i32 = arith.constant 4 : i32
    %83 = vector.broadcast %c4_i32 : i32 to vector<1x512xi32>
    %84 = arith.shrsi %8, %83 : vector<1x512xi32>
    %c1_i32_8 = arith.constant 1 : i32
    %85 = vector.broadcast %c1_i32_8 : i32 to vector<1x512xi32>
    %86 = arith.andi %84, %85 : vector<1x512xi32>
    %87 = arith.sitofp %86 : vector<1x512xi32> to vector<1x512xf32>
    %88 = vector.extract_strided_slice %3 {offsets = [0, 5], sizes = [8, 1], strides = [1, 1]} : vector<8x10xf32> to vector<8x1xf32>
    %89 = vector.extract_strided_slice %4 {offsets = [0, 5], sizes = [8, 1], strides = [1, 1]} : vector<8x10xf32> to vector<8x1xf32>
    %90 = vector.extract_strided_slice %3 {offsets = [0, 5], sizes = [8, 1], strides = [1, 1]} : vector<8x10xf32> to vector<8x1xf32>
    %91 = arith.subf %89, %90 : vector<8x1xf32>
    %92 = vector.broadcast %91 : vector<8x1xf32> to vector<8x512xf32>
    %93 = vector.broadcast %87 : vector<1x512xf32> to vector<8x512xf32>
    %94 = arith.mulf %92, %93 : vector<8x512xf32>
    %95 = vector.broadcast %88 : vector<8x1xf32> to vector<8x512xf32>
    %96 = arith.addf %95, %94 : vector<8x512xf32>
    %97 = arith.mulf %82, %96 : vector<8x512xf32>
    %c3_i32 = arith.constant 3 : i32
    %98 = vector.broadcast %c3_i32 : i32 to vector<1x512xi32>
    %99 = arith.shrsi %8, %98 : vector<1x512xi32>
    %c1_i32_9 = arith.constant 1 : i32
    %100 = vector.broadcast %c1_i32_9 : i32 to vector<1x512xi32>
    %101 = arith.andi %99, %100 : vector<1x512xi32>
    %102 = arith.sitofp %101 : vector<1x512xi32> to vector<1x512xf32>
    %103 = vector.extract_strided_slice %3 {offsets = [0, 6], sizes = [8, 1], strides = [1, 1]} : vector<8x10xf32> to vector<8x1xf32>
    %104 = vector.extract_strided_slice %4 {offsets = [0, 6], sizes = [8, 1], strides = [1, 1]} : vector<8x10xf32> to vector<8x1xf32>
    %105 = vector.extract_strided_slice %3 {offsets = [0, 6], sizes = [8, 1], strides = [1, 1]} : vector<8x10xf32> to vector<8x1xf32>
    %106 = arith.subf %104, %105 : vector<8x1xf32>
    %107 = vector.broadcast %106 : vector<8x1xf32> to vector<8x512xf32>
    %108 = vector.broadcast %102 : vector<1x512xf32> to vector<8x512xf32>
    %109 = arith.mulf %107, %108 : vector<8x512xf32>
    %110 = vector.broadcast %103 : vector<8x1xf32> to vector<8x512xf32>
    %111 = arith.addf %110, %109 : vector<8x512xf32>
    %112 = arith.mulf %97, %111 : vector<8x512xf32>
    %c2_i32 = arith.constant 2 : i32
    %113 = vector.broadcast %c2_i32 : i32 to vector<1x512xi32>
    %114 = arith.shrsi %8, %113 : vector<1x512xi32>
    %c1_i32_10 = arith.constant 1 : i32
    %115 = vector.broadcast %c1_i32_10 : i32 to vector<1x512xi32>
    %116 = arith.andi %114, %115 : vector<1x512xi32>
    %117 = arith.sitofp %116 : vector<1x512xi32> to vector<1x512xf32>
    %118 = vector.extract_strided_slice %3 {offsets = [0, 7], sizes = [8, 1], strides = [1, 1]} : vector<8x10xf32> to vector<8x1xf32>
    %119 = vector.extract_strided_slice %4 {offsets = [0, 7], sizes = [8, 1], strides = [1, 1]} : vector<8x10xf32> to vector<8x1xf32>
    %120 = vector.extract_strided_slice %3 {offsets = [0, 7], sizes = [8, 1], strides = [1, 1]} : vector<8x10xf32> to vector<8x1xf32>
    %121 = arith.subf %119, %120 : vector<8x1xf32>
    %122 = vector.broadcast %121 : vector<8x1xf32> to vector<8x512xf32>
    %123 = vector.broadcast %117 : vector<1x512xf32> to vector<8x512xf32>
    %124 = arith.mulf %122, %123 : vector<8x512xf32>
    %125 = vector.broadcast %118 : vector<8x1xf32> to vector<8x512xf32>
    %126 = arith.addf %125, %124 : vector<8x512xf32>
    %127 = arith.mulf %112, %126 : vector<8x512xf32>
    %c1_i32_11 = arith.constant 1 : i32
    %128 = vector.broadcast %c1_i32_11 : i32 to vector<1x512xi32>
    %129 = arith.shrsi %8, %128 : vector<1x512xi32>
    %c1_i32_12 = arith.constant 1 : i32
    %130 = vector.broadcast %c1_i32_12 : i32 to vector<1x512xi32>
    %131 = arith.andi %129, %130 : vector<1x512xi32>
    %132 = arith.sitofp %131 : vector<1x512xi32> to vector<1x512xf32>
    %133 = vector.extract_strided_slice %3 {offsets = [0, 8], sizes = [8, 1], strides = [1, 1]} : vector<8x10xf32> to vector<8x1xf32>
    %134 = vector.extract_strided_slice %4 {offsets = [0, 8], sizes = [8, 1], strides = [1, 1]} : vector<8x10xf32> to vector<8x1xf32>
    %135 = vector.extract_strided_slice %3 {offsets = [0, 8], sizes = [8, 1], strides = [1, 1]} : vector<8x10xf32> to vector<8x1xf32>
    %136 = arith.subf %134, %135 : vector<8x1xf32>
    %137 = vector.broadcast %136 : vector<8x1xf32> to vector<8x512xf32>
    %138 = vector.broadcast %132 : vector<1x512xf32> to vector<8x512xf32>
    %139 = arith.mulf %137, %138 : vector<8x512xf32>
    %140 = vector.broadcast %133 : vector<8x1xf32> to vector<8x512xf32>
    %141 = arith.addf %140, %139 : vector<8x512xf32>
    %142 = arith.mulf %127, %141 : vector<8x512xf32>
    %c0_i32_13 = arith.constant 0 : i32
    %143 = vector.broadcast %c0_i32_13 : i32 to vector<1x512xi32>
    %144 = arith.shrsi %8, %143 : vector<1x512xi32>
    %c1_i32_14 = arith.constant 1 : i32
    %145 = vector.broadcast %c1_i32_14 : i32 to vector<1x512xi32>
    %146 = arith.andi %144, %145 : vector<1x512xi32>
    %147 = arith.sitofp %146 : vector<1x512xi32> to vector<1x512xf32>
    %148 = vector.extract_strided_slice %3 {offsets = [0, 9], sizes = [8, 1], strides = [1, 1]} : vector<8x10xf32> to vector<8x1xf32>
    %149 = vector.extract_strided_slice %4 {offsets = [0, 9], sizes = [8, 1], strides = [1, 1]} : vector<8x10xf32> to vector<8x1xf32>
    %150 = vector.extract_strided_slice %3 {offsets = [0, 9], sizes = [8, 1], strides = [1, 1]} : vector<8x10xf32> to vector<8x1xf32>
    %151 = arith.subf %149, %150 : vector<8x1xf32>
    %152 = vector.broadcast %151 : vector<8x1xf32> to vector<8x512xf32>
    %153 = vector.broadcast %147 : vector<1x512xf32> to vector<8x512xf32>
    %154 = arith.mulf %152, %153 : vector<8x512xf32>
    %155 = vector.broadcast %148 : vector<8x1xf32> to vector<8x512xf32>
    %156 = arith.addf %155, %154 : vector<8x512xf32>
    %157 = arith.mulf %142, %156 : vector<8x512xf32>
    %c0_15 = arith.constant 0 : index
    %c0_16 = arith.constant 0 : index
    %158 = vector.load %arg4[%c0_15, %c0_16] : memref<512x2048xi8, #tpu.memory_space<vmem>>, vector<512x2048xi8>
    %159 = arith.sitofp %158 : vector<512x2048xi8> to vector<512x2048xbf16>
    %c0_17 = arith.constant 0 : index
    %c0_18 = arith.constant 0 : index
    %160 = vector.load %arg10[%c0_17, %c0_18] : memref<8x2048xf32, #tpu.memory_space<vmem>>, vector<8x2048xf32>
    %161 = arith.truncf %157 : vector<8x512xf32> to vector<8x512xbf16>
    %cst = arith.constant dense<0.000000e+00> : vector<8x2048xf32>
    %162 = tpu.matmul %161, %159, %cst {dimension_numbers = #tpu.dot_dimension_numbers<[1], [0], [0], [1], [0, 0, 1, 1], [], []>} : vector<8x512xbf16>, vector<512x2048xbf16>, vector<8x2048xf32> -> vector<8x2048xf32>
    %163 = arith.addf %160, %162 : vector<8x2048xf32>
    %c0_19 = arith.constant 0 : index
    %c0_20 = arith.constant 0 : index
    %164 = vector.load %arg10[%c0_19, %c0_20] : memref<8x2048xf32, #tpu.memory_space<vmem>>, vector<8x2048xf32>
    tpu.vector_store %arg10[%c0_19, %c0_20], %163 {strides = array<i32>} : memref<8x2048xf32, #tpu.memory_space<vmem>>, vector<8x2048xf32>,
    %c1_i32_21 = arith.constant 1 : i32
    %165 = arith.cmpi eq, %arg0, %c1_i32_21 : i32
    %166 = arith.extui %165 : i1 to i32
    %c0_i32_22 = arith.constant 0 : i32
    %167 = arith.cmpi ne, %166, %c0_i32_22 : i32
    scf.if %167 {
      %c0_23 = arith.constant 0 : index
      %c0_24 = arith.constant 0 : index
      %168 = vector.load %arg10[%c0_23, %c0_24] : memref<8x2048xf32, #tpu.memory_space<vmem>>, vector<8x2048xf32>
      %169 = vector.extract_strided_slice %168 {offsets = [0, 0], sizes = [8, 1024], strides = [1, 1]} : vector<8x2048xf32> to vector<8x1024xf32>
      %170 = vector.extract_strided_slice %168 {offsets = [0, 1024], sizes = [8, 1024], strides = [1, 1]} : vector<8x2048xf32> to vector<8x1024xf32>
      %171 = arith.mulf %169, %169 : vector<8x1024xf32>
      %172 = arith.mulf %170, %170 : vector<8x1024xf32>
      %173 = arith.addf %171, %172 : vector<8x1024xf32>
      %c0_25 = arith.constant 0 : index
      %c0_26 = arith.constant 0 : index
      %174 = vector.load %arg5[%c0_25, %c0_26] : memref<1024x32xf32, #tpu.memory_space<vmem>>, vector<1024x32xf32>
      %cst_27 = arith.constant dense<0.000000e+00> : vector<8x32xf32>
      %175 = tpu.matmul %173, %174, %cst_27 {dimension_numbers = #tpu.dot_dimension_numbers<[1], [0], [0], [1], [0, 0, 1, 1], [], []>} : vector<8x1024xf32>, vector<1024x32xf32>, vector<8x32xf32> -> vector<8x32xf32>
      %c0_28 = arith.constant 0 : index
      %c0_29 = arith.constant 0 : index
      %176 = vector.load %arg6[%c0_28, %c0_29] : memref<1x32xf32, #tpu.memory_space<vmem>>, vector<1x32xf32>
      %177 = vector.broadcast %176 : vector<1x32xf32> to vector<8x32xf32>
      %178 = arith.addf %175, %177 : vector<8x32xf32>
      %cst_30 = arith.constant 0.000000e+00 : f32
      %179 = vector.broadcast %cst_30 : f32 to vector<8x32xf32>
      %180 = arith.maximumf %178, %179 : vector<8x32xf32>
      %c0_31 = arith.constant 0 : index
      %c0_32 = arith.constant 0 : index
      %181 = vector.load %arg11[%c0_31, %c0_32] : memref<8x32xf32, #tpu.memory_space<vmem>>, vector<8x32xf32>
      %182 = arith.addf %181, %180 : vector<8x32xf32>
      %c0_33 = arith.constant 0 : index
      %c0_34 = arith.constant 0 : index
      %183 = vector.load %arg7[%c0_33, %c0_34] : memref<32x4xf32, #tpu.memory_space<vmem>>, vector<32x4xf32>
      %cst_35 = arith.constant dense<0.000000e+00> : vector<8x4xf32>
      %184 = tpu.matmul %182, %183, %cst_35 {dimension_numbers = #tpu.dot_dimension_numbers<[1], [0], [0], [1], [0, 0, 1, 1], [], []>} : vector<8x32xf32>, vector<32x4xf32>, vector<8x4xf32> -> vector<8x4xf32>
      %c0_36 = arith.constant 0 : index
      %c0_37 = arith.constant 0 : index
      %185 = vector.load %arg8[%c0_36, %c0_37] : memref<1x4xf32, #tpu.memory_space<vmem>>, vector<1x4xf32>
      %186 = vector.broadcast %185 : vector<1x4xf32> to vector<8x4xf32>
      %187 = arith.addf %184, %186 : vector<8x4xf32>
      %c0_38 = arith.constant 0 : index
      %c0_39 = arith.constant 0 : index
      %188 = vector.load %arg9[%c0_38, %c0_39] : memref<8x4xf32, #tpu.memory_space<vmem>>, vector<8x4xf32>
      tpu.vector_store %arg9[%c0_38, %c0_39], %187 {strides = array<i32>} : memref<8x4xf32, #tpu.memory_space<vmem>>, vector<8x4xf32>,
    } else {
    }
    return
  }
  func.func @transform_0(%arg0: i32) -> (i32, i32) {
    %c0_i32 = arith.constant 0 : i32
    %c0_i32_0 = arith.constant 0 : i32
    %c0_i32_1 = arith.constant 0 : i32
    return %c0_i32, %c0_i32_0 : i32, i32
  }
  func.func @transform_1(%arg0: i32) -> (i32, i32) {
    %c0_i32 = arith.constant 0 : i32
    %c0_i32_0 = arith.constant 0 : i32
    %c0_i32_1 = arith.constant 0 : i32
    return %c0_i32, %c0_i32_0 : i32, i32
  }
  func.func @transform_2(%arg0: i32) -> (i32, i32) {
    %c0_i32 = arith.constant 0 : i32
    %c0_i32_0 = arith.constant 0 : i32
    %c0_i32_1 = arith.constant 0 : i32
    return %c0_i32, %c0_i32_0 : i32, i32
  }
  func.func @transform_3(%arg0: i32) -> (i32, i32) {
    %c0_i32 = arith.constant 0 : i32
    %c0_i32_0 = arith.constant 0 : i32
    return %arg0, %c0_i32 : i32, i32
  }
  func.func @transform_4(%arg0: i32) -> (i32, i32) {
    %c0_i32 = arith.constant 0 : i32
    %c0_i32_0 = arith.constant 0 : i32
    %c0_i32_1 = arith.constant 0 : i32
    return %c0_i32, %c0_i32_0 : i32, i32
  }
  func.func @transform_5(%arg0: i32) -> (i32, i32) {
    %c0_i32 = arith.constant 0 : i32
    %c0_i32_0 = arith.constant 0 : i32
    %c0_i32_1 = arith.constant 0 : i32
    return %c0_i32, %c0_i32_0 : i32, i32
  }
  func.func @transform_6(%arg0: i32) -> (i32, i32) {
    %c0_i32 = arith.constant 0 : i32
    %c0_i32_0 = arith.constant 0 : i32
    %c0_i32_1 = arith.constant 0 : i32
    return %c0_i32, %c0_i32_0 : i32, i32
  }
  func.func @transform_7(%arg0: i32) -> (i32, i32) {
    %c0_i32 = arith.constant 0 : i32
    %c0_i32_0 = arith.constant 0 : i32
    %c0_i32_1 = arith.constant 0 : i32
    return %c0_i32, %c0_i32_0 : i32, i32
  }
  func.func @transform_8(%arg0: i32) -> (i32, i32) {
    %c0_i32 = arith.constant 0 : i32
    %c0_i32_0 = arith.constant 0 : i32
    %c0_i32_1 = arith.constant 0 : i32
    return %c0_i32, %c0_i32_0 : i32, i32
  }
}

</mosaic_0001>

<bundles_post_ra>
// kernel: tpu_custom_call.1
= control target key start
LH: loop header
LB: loop body
LE: loop exit
PB: predicated region body
PF: predicated region fallthrough
CT: control target
= control target key end

     0   :  { %13 = vsyncpa [#allocation7], 0  ;;  %s5193_s0 = inlined_call_operand.hbm [shape: f32[8,16], index: 0, kind: input, shape index: {}]   ;;  %s5194_s1 = inlined_call_operand.hbm [shape: f32[16,32], index: 1, kind: input, shape index: {}]   ;;  %s5195_s2 = inlined_call_operand.hbm [shape: f32[1,32], index: 2, kind: input, shape index: {}]   ;;  %s5196_s3 = inlined_call_operand.hbm [shape: s8[1024,2048], index: 3, kind: input, shape index: {}]   ;;  %s5197_s4 = inlined_call_operand.vmem [shape: f32[1024,32], index: 4, kind: input, shape index: {}]   ;;  %s5198_s5 = inlined_call_operand.hbm [shape: f32[1,32], index: 5, kind: input, shape index: {}]   ;;  %s5199_s6 = inlined_call_operand.vmem [shape: f32[32,4], index: 6, kind: input, shape index: {}]   ;;  %s5200_s7 = inlined_call_operand.hbm [shape: f32[1,4], index: 7, kind: input, shape index: {}]   ;;  %s5201_s8 = inlined_call_operand.vmem [shape: f32[8,4], index: 8, kind: output, shape index: {}]  }
   0x1   :  { %14 = vsyncpa [#allocation9], 0 }
   0x2   :  { %15 = vsyncpa [#allocation12], 0 }
   0x3   :  { %17 = vsyncpa [#allocation12 + $0x1], 0 }
   0x4   :  { %18 = vsyncpa [#allocation15], 0  ;;  %s3919_s27 = smov 0   ;;  %s3921_s28 = smov 0  }
   0x5   :  { %s3923_s29 = smov 0   ;;  %s3925_s30 = smov 0  }
   0x6 LB: > { %s3938_s9 = sadd.s32 4294967295, %s3841_s30   ;;  %p107_p0 = scmp.ne.s32.totalorder %s3833_s28, %s3829_s27  ;;  %s3841_s30 = sphi %s3925_s30, %s5256_s30   ;;  %s3837_s29 = sphi %s3923_s29, %s5255_s29   ;;  %s3833_s28 = sphi %s3921_s28, %s5254_s28   ;;  %s3829_s27 = sphi %s3919_s27, %s5253_s27  }
   0x7   : > { %p5202_p1 = scmp.eq.s32.totalorder %s3938_s9, 0  ;;  %p3139_p2 = scmp.ge.s32.totalorder %s3841_s30, 1 }
   0x8   : > { %p223_p3 = scmp.lt.s32.totalorder %s3841_s30, 3  ;;  %s3843_s12 = smov [#allocation8]  }
   0x9   : > { %p3947_p5 = por %p5202_p1, %p107_p0  ;;  %s246_s13 = sshll.u32 %s3843_s12, 4  ;;  %s3955_s13 = int_to_ptr.vmem [resolvable:$true] %s246_s13 }
   0xa   : > { %p3951_p6 = pnand %p3139_p2, %p223_p3  ;;  %s3844_s15 = smov [#allocation13]  }
   0xb   : > { %s5205_s10 = scalar_select %p3947_p5, 1, 0 }
   0xc   : > { %s5206_s11 = scalar_select %p3951_p6, 1, 0 }
   0xd   : > { %p3506_p7 = pneg %p3951_p6  ;;  %s274_s16 = sshll.u32 %s3844_s15, 4  ;;  %s3965_s16 = int_to_ptr.vmem [resolvable:$true] %s274_s16 }
   0xe   : > { %s3845_s17 = smov [#allocation6]   ;;  %s3621_s21 = scalar_lea.hbm %s5194_s1, 256 }
   0xf   : > { %p3961_p8 = pnand %p3506_p7, %p5202_p1  ;;  %s3967_s18 = sshll.u32 %s3845_s17, 4  ;;  %s237_s18 = int_to_ptr.vmem [resolvable:$true] %s3967_s18 }
  0x10   : > { %p3622_p9 = scmp.ne.s32.totalorder %s5194_s1, %s3621_s21  ;;  %p3628_p13 = scmp.lt.u32.totalorder %s3621_s21, %s5194_s1 }
  0x11   : > { %p3977_p10 = pneg %p3961_p8 }
  0x13   : > { %p3624_p11 = pnand %p3977_p10, %p3622_p9 }
  0x15   : > { %p3625_p12 = pneg %p3624_p11 }
  0x17   : > { %p3630_p0 = pnand %p3628_p13, %p3625_p12 }
  0x19   : > { %3633 = shalt.err (!%p3630_p0)
}
  0x1a   : > { %s3634_s27 = scalar_lea.vmem %s3955_s13, 256  ;;  %p3642_p4 = scmp.lt.s32.totalorder %s3955_s13, %s3955_s13 }
  0x1b   : > { %p3635_p2 = scmp.ne.s32.totalorder %s3955_s13, %s3634_s27  ;;  %p3643_p1 = scmp.lt.s32.totalorder %s3634_s27, %s3634_s27 }
  0x1d   : > { %p3637_p3 = pnand %p3635_p2, %p3977_p10  ;;  %p3644_p9 = por %p3643_p1, %p3642_p4 }
  0x1f   : > { %p3638_p7 = pneg %p3637_p3 }
  0x21   : > { %p3645_p11 = pnand %p3644_p9, %p3638_p7 }
  0x23   : > { %3648 = shalt.err (!%p3645_p11)
}
  0x24   : > { %s3846_s12 = smov 128   ;;  %s3847_s15 = smov 8  }
  0x25   : > { %3512 = dma.hbm_to_vmem [thread:$0]  (!%p3961_p8), %s5194_s1, 256, %s3955_s13, [#allocation9], %s3846_s12, %s3846_s12, %s3847_s15  }
  0x26   : > { %s3649_s22 = scalar_lea.hbm %s5198_s5, 16 }
  0x27   : > { %p3650_p1 = scmp.ne.s32.totalorder %s5198_s5, %s3649_s22  ;;  %p3656_p13 = scmp.lt.u32.totalorder %s3649_s22, %s5198_s5 }
  0x29   : > { %p3652_p4 = pnand %p3650_p1, %p3977_p10 }
  0x2b   : > { %p3653_p12 = pneg %p3652_p4 }
  0x2d   : > { %p3658_p0 = pnand %p3656_p13, %p3653_p12 }
  0x2f   : > { %3661 = shalt.err (!%p3658_p0)
}
  0x30   : > { %s3662_s13 = scalar_lea.vmem %s3965_s16, 16  ;;  %s3669_s15 = scalar_lea.vmem %s3965_s16, 32 }
  0x31   : > { %p3663_p2 = scmp.ne.s32.totalorder %s3965_s16, %s3662_s13  ;;  %p3670_p9 = scmp.lt.s32.totalorder %s3965_s16, %s3965_s16 }
  0x32   : > { %p3671_p11 = scmp.lt.s32.totalorder %s3669_s15, %s3662_s13 }
  0x33   : > { %p3665_p3 = pnand %p3663_p2, %p3977_p10 }
  0x34   : > { %p3672_p1 = por %p3671_p11, %p3670_p9 }
  0x35   : > { %p3666_p7 = pneg %p3665_p3 }
  0x37   : > { %p3673_p4 = pnand %p3672_p1, %p3666_p7 }
  0x39   : > { %3676 = shalt.err (!%p3673_p4)
}
  0x3a   : > { %3518 = dma.hbm_to_vmem [thread:$0]  (!%p3961_p8), %s5198_s5, 16, %s3965_s16, [#allocation12]  }
  0x3b   : > { %s3677_s22 = scalar_lea.hbm %s5193_s0, 128 }
  0x3c   : > { %p3678_p12 = scmp.ne.s32.totalorder %s5193_s0, %s3677_s22  ;;  %p3684_p2 = scmp.lt.u32.totalorder %s3677_s22, %s5193_s0 }
  0x3e   : > { %p3680_p13 = pnand %p3678_p12, %p3977_p10 }
  0x40   : > { %p3681_p0 = pneg %p3680_p13 }
  0x42   : > { %p3686_p3 = pnand %p3684_p2, %p3681_p0 }
  0x44   : > { %3689 = shalt.err (!%p3686_p3)
}
  0x45   : > { %s3690_s13 = scalar_lea.vmem %s237_s18, 128  ;;  %p3698_p1 = scmp.lt.s32.totalorder %s237_s18, %s237_s18 }
  0x46   : > { %p3691_p7 = scmp.ne.s32.totalorder %s237_s18, %s3690_s13  ;;  %p3699_p4 = scmp.lt.s32.totalorder %s3690_s13, %s3690_s13 }
  0x48   : > { %p3693_p9 = pnand %p3691_p7, %p3977_p10  ;;  %p3700_p5 = por %p3699_p4, %p3698_p1 }
  0x4a   : > { %p3694_p11 = pneg %p3693_p9 }
  0x4c   : > { %p3701_p6 = pnand %p3700_p5, %p3694_p11 }
  0x4e   : > { %3704 = shalt.err (!%p3701_p6)
}
  0x4f   : > { %3509 = dma.hbm_to_vmem [thread:$0]  (!%p3961_p8), %s5193_s0, 128, %s237_s18, [#allocation7]  }
  0x50   : > { %s3848_s17 = smov [#allocation10]   ;;  %s3849_s20 = smov [#allocation14]  }
  0x51   : > { %s260_s19 = sshll.u32 %s3848_s17, 4  ;;  %s288_s21 = sshll.u32 %s3849_s20, 4  ;;  %s261_s19 = int_to_ptr.vmem [resolvable:$true] %s260_s19  ;;  %s289_s21 = int_to_ptr.vmem [resolvable:$true] %s288_s21 }
  0x52   : > { %s3705_s25 = scalar_lea.hbm %s5195_s2, 16 }
  0x53   : > { %p3706_p5 = scmp.ne.s32.totalorder %s5195_s2, %s3705_s25  ;;  %p3712_p13 = scmp.lt.u32.totalorder %s3705_s25, %s5195_s2 }
  0x55   : > { %p3708_p6 = pnand %p3706_p5, %p3977_p10 }
  0x57   : > { %p3709_p12 = pneg %p3708_p6 }
  0x59   : > { %p3714_p0 = pnand %p3712_p13, %p3709_p12 }
  0x5b   : > { %3717 = shalt.err (!%p3714_p0)
}
  0x5c   : > { %s3718_s18 = scalar_lea.vmem %s261_s19, 16  ;;  %s3725_s15 = scalar_lea.vmem %s261_s19, 32 }
  0x5d   : > { %p3719_p2 = scmp.ne.s32.totalorder %s261_s19, %s3718_s18  ;;  %p3726_p9 = scmp.lt.s32.totalorder %s261_s19, %s261_s19 }
  0x5e   : > { %p3727_p11 = scmp.lt.s32.totalorder %s3725_s15, %s3718_s18 }
  0x5f   : > { %p3721_p3 = pnand %p3719_p2, %p3977_p10 }
  0x60   : > { %p3728_p1 = por %p3727_p11, %p3726_p9 }
  0x61   : > { %p3722_p7 = pneg %p3721_p3 }
  0x63   : > { %p3729_p4 = pnand %p3728_p1, %p3722_p7 }
  0x65   : > { %3732 = shalt.err (!%p3729_p4)
}
  0x66   : > { %3515 = dma.hbm_to_vmem [thread:$0]  (!%p3961_p8), %s5195_s2, 16, %s261_s19, [#allocation9]  }
  0x67   : > { %s3733_s25 = scalar_lea.hbm %s5200_s7, 16 }
  0x68   : > { %p3734_p5 = scmp.ne.s32.totalorder %s5200_s7, %s3733_s25  ;;  %p3740_p13 = scmp.lt.u32.totalorder %s3733_s25, %s5200_s7 }
  0x6a   : > { %p3736_p6 = pnand %p3734_p5, %p3977_p10 }
  0x6c   : > { %p3737_p12 = pneg %p3736_p6 }
  0x6e   : > { %p3742_p0 = pnand %p3740_p13, %p3737_p12 }
  0x70   : > { %3745 = shalt.err (!%p3742_p0)
}
  0x71   : > { %s3746_s18 = scalar_lea.vmem %s289_s21, 16  ;;  %s3753_s19 = scalar_lea.vmem %s289_s21, 32 }
  0x72   : > { %p3747_p2 = scmp.ne.s32.totalorder %s289_s21, %s3746_s18  ;;  %p3754_p9 = scmp.lt.s32.totalorder %s289_s21, %s289_s21 }
  0x73   : > { %p3755_p11 = scmp.lt.s32.totalorder %s3753_s19, %s3746_s18 }
  0x74   : > { %p3749_p3 = pnand %p3747_p2, %p3977_p10 }
  0x75   : > { %p3756_p1 = por %p3755_p11, %p3754_p9 }
  0x76   : > { %p3750_p7 = pneg %p3749_p3 }
  0x78   : > { %p3757_p4 = pnand %p3756_p1, %p3750_p7 }
  0x7a   : > { %3760 = shalt.err (!%p3757_p4)
}
  0x7b   : > { %3521 = dma.hbm_to_vmem [thread:$0]  (!%p3961_p8), %s5200_s7, 16, %s289_s21, [#allocation15]  }
  0x7c   : > { %s4080_s24 = sadd.s32 1, %s3841_s30   ;;  %s94_s14 = sadd.s32 1, %s3837_s29 }
  0x7d   : > { %s91_s20 = ssub.s32 %s3841_s30, %s4080_s24  ;;  %p101_p5 = scmp.ne.s32.totalorder %s3837_s29, %s3833_s28 }
  0x7e   : > { %p92_p10 = scmp.eq.s32.totalorder %s91_s20, 0  ;;  %p102_p6 = scmp.eq.s32.totalorder %s3841_s30, 0 }
  0x7f   : > { %p3531_p12 = scmp.lt.s32.totalorder %s3841_s30, 2  ;;  %s299_s23 = sand.u32 1, %s3841_s30  }
  0x80   : > { %s4090_s22 = scalar_select %p92_p10, %s3837_s29, %s94_s14  }
  0x81   : > { %p103_p13 = por %p102_p6, %p101_p5  ;;  %s301_s25 = sand.u32 1, %s3837_s29  }
  0x82   : > { %s3146_s26 = sshll.u32 %s301_s25, 11  ;;  %s3176_s27 = sshll.u32 %s3841_s30, 15 }
  0x83   : > { %s4098_s21 = scalar_lea.hbm %s5196_s3, %s3176_s27  ;;  %s303_s18 = scalar_lea.vmem [#allocation11], %s3146_s26 }
  0x84   : > { %s311_s19 = sshll.u32 %s303_s18, 4  ;;  %p4100_p8 = pnand %p3531_p12, %p103_p13  ;;  %s4104_s19 = int_to_ptr.vmem [resolvable:$true] %s311_s19 }
  0x85   : > { %s4106_s30 = scalar_lea.sflag [#allocation12], %s299_s23  ;;  %s3761_s17 = scalar_lea.hbm %s4098_s21, 32768 }
  0x86   : > { %p3762_p0 = scmp.ne.s32.totalorder %s4098_s21, %s3761_s17  ;;  %p3763_p2 = pneg %p4100_p8 }
  0x87   : > { %s3766_s25 = scalar_lea.hbm %s5196_s3, 65536  ;;  %p3767_p9 = scmp.lt.u32.totalorder %s4098_s21, %s5196_s3 }
  0x88   : > { %p3764_p3 = pnand %p3763_p2, %p3762_p0  ;;  %p3768_p11 = scmp.lt.u32.totalorder %s3766_s25, %s3761_s17 }
  0x89   : > { %p3770_p4 = scmp.lt.u32.totalorder %s3761_s17, %s4098_s21 }
  0x8a   : > { %p3765_p7 = pneg %p3764_p3  ;;  %p3769_p1 = por %p3768_p11, %p3767_p9 }
  0x8c   : > { %p3771_p10 = por %p3770_p4, %p3769_p1 }
  0x8e   : > { %p3772_p5 = pnand %p3771_p10, %p3765_p7 }
  0x90   : > { %3775 = shalt.err (!%p3772_p5)
}
  0x91   : > { %s3776_s23 = scalar_lea.vmem %s4104_s19, 32768  ;;  %s3850_s13 = smov [#allocation11]  }
  0x92   : > { %p3777_p6 = scmp.ne.s32.totalorder %s4104_s19, %s3776_s23  ;;  %s3781_s16 = sshll.u32 %s3850_s13, 4  ;;  %s3782_s16 = int_to_ptr.vmem [resolvable:$false] %s3781_s16 }
  0x93   : > { %s3783_s18 = scalar_lea.vmem %s3782_s16, 65536  ;;  %p3784_p0 = scmp.lt.s32.totalorder %s4104_s19, %s3782_s16 }
  0x94   : > { %p3779_p12 = pnand %p3777_p6, %p3763_p2  ;;  %p3785_p3 = scmp.lt.s32.totalorder %s3783_s18, %s3776_s23 }
  0x96   : > { %p3780_p13 = pneg %p3779_p12  ;;  %p3786_p9 = por %p3785_p3, %p3784_p0 }
  0x98   : > { %p3787_p11 = pnand %p3786_p9, %p3780_p13 }
  0x9a   : > { %3790 = shalt.err (!%p3787_p11)
}
  0x9b   : > { %s3851_s17 = smov 2048   ;;  %p5210_p2 = scmp.ne.s32.totalorder %s5206_s11, 0 }
  0x9c   : > { %3525 = dma.hbm_to_vmem [thread:$0]  (!%p4100_p8), %s4098_s21, 32768, %s4104_s19, %s4106_s30, %s3851_s17, %s3851_s17, %s3846_s12  }
  0x9d   : > { %323 = sbr.rel (%p5210_p2) target bundleno = 1836 (0x72c), region = 52  ;;  %p5211_p7 = scmp.eq.s32.totalorder (!%p5210_p2), %s3938_s9, 0 }
  0xa4   : > { %3808 = dma.done.wait (%p5211_p7), [#allocation7], 128   ;;  %p5212_p1 = pmov %p5211_p7 }
  0xa6   : > { %3810 = vsyncadd (%p5212_p1), [#allocation7], 4294967168  ;;  %p5213_p4 = pmov %p5212_p1 }
  0xa7   : > { %p5214_p10 = pmov %p5212_p1 }
  0xa8   : > { %3812 = dma.done.wait (%p5213_p4), [#allocation9], 272  }
  0xa9   : > { %3814 = vsyncadd (%p5214_p10), [#allocation9], 4294967024  ;;  %s337_s15 = sand.u32 1, %s3938_s9   ;;  %s339_s12 = sand.u32 1, %s3833_s28  }
  0xaa   : > { %s3154_s21 = sshll.u32 %s339_s12, 11  ;;  %s338_s11 = scalar_lea.sflag [#allocation12], %s337_s15 }
  0xab   : > { %s4147_s19 = scalar_lea.vmem [#allocation11], %s3154_s21  ;;  %p5215_p8 = scmp.ne.s32.totalorder %s5205_s10, 0 }
  0xad   : > { %3816 = dma.done.wait (%p5215_p8), %s338_s11, 32768  }
  0xae   : > { %3818 = vsyncadd (%p5215_p8), %s338_s11, 4294934528  ;;  %p5216_p5 = pmov %p5212_p1 }
  0xaf   : > { %p5217_p6 = pmov %p5212_p1 }
  0xb0   : > { %3820 = dma.done.wait (%p5216_p5), [#allocation12], 16  }
  0xb1   : > { %3822 = vsyncadd (%p5217_p6), [#allocation12], 4294967280  ;;  %p5218_p12 = pmov %p5212_p1 }
  0xb2   : > { %p5219_p13 = pmov %p5212_p1 }
  0xb3   : > { %3824 = dma.done.wait (%p5218_p12), [#allocation15], 16  }
  0xb4   : > { %3826 = vsyncadd (%p5219_p13), [#allocation15], 4294967280  ;;  %p5220_p0 = scmp.ne.s32.totalorder %s3938_s9, 0 }
  0xb5   : > { %v383_v0 = vld [vmem:[#allocation8] sm:$0xff] (!%p5220_p0)  ;;  %v384_v1 = vld [vmem:[#allocation8 + $0x8] sm:$0xff] (!%p5220_p0)  ;;  %v3852_v2 = vmov (!%p5220_p0), 0.0|0.0   ;;  %vm3853_vm0 = vmmov (!%p5220_p0), 0   ;;  %v3854_v4 = vmov (!%p5220_p0), 0.0   ;;  %v382_v5 = vld [vmem:[#allocation6] sm:$0xff] (!%p5220_p0) }
  0xb6   : > { %381 = sbr.rel (%p5220_p0) target bundleno = 485 (0x1e5), region = 80  ;;  %3343 = vmatprep.subr.bf16.mxu0 (!%p5220_p0), %v3852_v2  ;;  %v3344_v3 = vpack.c.bf16 (!%p5220_p0), %v384_v1, %v383_v0  ;;  %3329 = vmatprep.mubr.msk.f32.mxu0 (!%p5220_p0), %vm3853_vm0, %v3854_v4  ;;  %680 = vst [vmem:[#allocation2] sm:$0xff] (!%p5220_p0), %v3854_v4  ;;  %681 = vst [vmem:[#allocation2 + $0x8] sm:$0xff] (!%p5220_p0), %v3854_v4  ;;  %vm392_vm1 = vcmask (!%p5220_p0), 130048   ;;  %v3158_v6 = vld [vmem:[#allocation10] ss:$0 sm:$0xff] (!%p5220_p0) }
  0xb7   : > { %682 = vst [vmem:[#allocation2 + $0x10] sm:$0xff] (!%p5220_p0), %v3854_v4  ;;  %683 = vst [vmem:[#allocation2 + $0x18] sm:$0xff] (!%p5220_p0), %v3854_v4  ;;  %vm467_vm2 = vcmask (!%p5220_p0), 261120   ;;  %v3855_v22 = vmov (!%p5220_p0), 683565275   ;;  %vm573_vm13 = vcmask (!%p5220_p0), 80896  }
  0xb8   : > { %684 = vst [vmem:[#allocation2 + $0x20] sm:$0xff] (!%p5220_p0), %v3854_v4  ;;  %685 = vst [vmem:[#allocation2 + $0x28] sm:$0xff] (!%p5220_p0), %v3854_v4  ;;  %3345 = vmatpush3.bf16.msra.mxu0 (!%p5220_p0), %v3344_v3  ;;  %v3856_v24 = vmov (!%p5220_p0), 2475754826   ;;  %v3857_v27 = vmov (!%p5220_p0), 2131351028  }
  0xb9   : > { %686 = vst [vmem:[#allocation2 + $0x30] sm:$0xff] (!%p5220_p0), %v3854_v4  ;;  %687 = vst [vmem:[#allocation2 + $0x38] sm:$0xff] (!%p5220_p0), %v3854_v4  ;;  %v3858_v30 = vmov (!%p5220_p0), 2102212464   ;;  %v3859_v33 = vmov (!%p5220_p0), 920167782  }
  0xba   : > { %688 = vst [vmem:[#allocation2 + $0x40] sm:$0xff] (!%p5220_p0), %v3854_v4  ;;  %689 = vst [vmem:[#allocation2 + $0x48] sm:$0xff] (!%p5220_p0), %v3854_v4  ;;  %v3860_v36 = vmov (!%p5220_p0), 1326507024  }
  0xbb   : > { %690 = vst [vmem:[#allocation2 + $0x50] sm:$0xff] (!%p5220_p0), %v3854_v4  ;;  %691 = vst [vmem:[#allocation2 + $0x58] sm:$0xff] (!%p5220_p0), %v3854_v4  ;;  %3330 = vmatmul.mubr.msk.f32.vlgmr.msra.gmra.mrb[0].mxu0 (!%p5220_p0), %vm392_vm1, %v382_v5 }
  0xbc   : > { %692 = vst [vmem:[#allocation2 + $0x60] sm:$0xff] (!%p5220_p0), %v3854_v4  ;;  %693 = vst [vmem:[#allocation2 + $0x68] sm:$0xff] (!%p5220_p0), %v3854_v4 }
  0xbd   : > { %694 = vst [vmem:[#allocation2 + $0x70] sm:$0xff] %v3854_v4  ;;  %695 = vst [vmem:[#allocation2 + $0x78] sm:$0xff] %v3854_v4 }
 0x18e   : > { %v462_v7 = vpop.f32.mrb[0].mxu0 }
 0x18f   : > { %v463_v8 = vadd.f32 %v3158_v6, %v462_v7  ;;  %v3331_v9 = vpop.f32.mrb[1].mxu0 }
 0x191   : > { %v466_v10 = vmax.f32 %v463_v8, 0.0 }
 0x193   : > { %468 = vst.msk [vmem:[#allocation3] sm:$0xff] %vm467_vm2, %v466_v10  ;;  %v4163_v11 = vmul.f32 0.5, %v466_v10 }
 0x195   : > { %v473_v12 = vand.u32 2139095040, %v4163_v11  ;;  %v470_v16 = vand.u32 2147483647, %v4163_v11  ;;  %vm472_vm10 = vcmp.lt.s32.totalorder %v4163_v11, 0 }
 0x197   : > { %v474_v13 = vshrl.u32 %v473_v12, 23  ;;  %v477_v19 = vand.u32 8388607, %v470_v16  ;;  %vm471_vm11 = vcmp.le.f32.partialorder %v470_v16, 0.7853982 }
 0x199   : > { %v3160_v14 = vadd.s32 4294967169, %v474_v13  ;;  %v478_v38 = vor.u32 8388608, %v477_v19 }
 0x19b   : > { %v480_v15 = vadd.s32 1, %v3160_v14  ;;  %v518_v52 = vshll.u32 %v478_v38, 8 }
 0x19d   : > { %vm481_vm3 = vcmp.gt.s32.totalorder %v480_v15, 0 }
 0x19e   : > { %v482_v17 = vsel %vm481_vm3, %v480_v15, 0  ;;  %vm562_vm3 = vweird.f32 %v4163_v11 }
 0x19f   : > { %v484_v18 = vand.u32 31, %v482_v17  ;;  %v483_v21 = vshrl.u32 %v482_v17, 5 }
 0x1a1   : > { %v485_v20 = vsub.s32 32, %v484_v18  ;;  %v487_v23 = vshll.u32 %v3855_v22, %v484_v18  ;;  %v490_v25 = vshll.u32 %v3856_v24, %v484_v18  ;;  %v493_v29 = vshll.u32 %v3857_v27, %v484_v18 }
 0x1a2   : > { %v496_v32 = vshll.u32 %v3858_v30, %v484_v18  ;;  %v499_v35 = vshll.u32 %v3859_v33, %v484_v18  ;;  %vm502_vm4 = vcmp.lt.s32.totalorder %v483_v21, 1  ;;  %vm505_vm5 = vcmp.lt.s32.totalorder %v483_v21, 4 }
 0x1a3   : > { %v488_v26 = vshrl.u32 %v3856_v24, %v485_v20  ;;  %v491_v28 = vshrl.u32 %v3857_v27, %v485_v20  ;;  %v494_v31 = vshrl.u32 %v3858_v30, %v485_v20  ;;  %v497_v34 = vshrl.u32 %v3859_v33, %v485_v20 }
 0x1a4   : > { %v500_v37 = vshrl.u32 %v3860_v36, %v485_v20  ;;  %v486_v47 = vshrl.u32 %v3855_v22, %v485_v20  ;;  %vm504_vm6 = vcmp.lt.s32.totalorder %v483_v21, 3  ;;  %vm503_vm7 = vcmp.lt.s32.totalorder %v483_v21, 2 }
 0x1a5   : > { %v489_v39 = vor.u32 %v488_v26, %v487_v23  ;;  %v492_v40 = vor.u32 %v491_v28, %v490_v25  ;;  %v495_v41 = vor.u32 %v494_v31, %v493_v29  ;;  %v498_v42 = vor.u32 %v497_v34, %v496_v32 }
 0x1a6   : > { %v501_v43 = vor.u32 %v500_v37, %v499_v35 }
 0x1a7   : > { %v507_v44 = vsel %vm505_vm5, %v495_v41, 2102212464  ;;  %v510_v45 = vsel %vm502_vm4, %v489_v39, %v492_v40  ;;  %v514_v46 = vsel %vm502_vm4, %v492_v40, %v495_v41  ;;  %v511_v48 = vsel %vm505_vm5, %v498_v42, 920167782 }
 0x1a8   : > { %v515_v49 = vsel %vm505_vm5, %v501_v43, 1326507024  ;;  %v512_v50 = vsel %vm504_vm6, %v495_v41, %v511_v48  ;;  %v506_v53 = vsel %vm502_vm4, %v486_v47, %v489_v39  ;;  %v508_v54 = vsel %vm504_vm6, %v492_v40, %v507_v44 }
 0x1a9   : > { %v516_v51 = vsel %vm504_vm6, %v498_v42, %v515_v49  ;;  %v513_v55 = vsel %vm503_vm7, %v510_v45, %v512_v50  ;;  %v509_v61 = vsel %vm503_vm7, %v506_v53, %v508_v54 }
 0x1aa   : > { %v517_v56 = vsel %vm503_vm7, %v514_v46, %v516_v51  ;;  %v4172_v59 = vmul.u32.u64.low %v518_v52, %v513_v55  ;;  %v4173_v60 = vmul.u32.u64.high %v518_v52, %v513_v55, %v4172_v59  ;;  %v525_v63 = vmul.u32 %v518_v52, %v509_v61 }
 0x1ab   : > { %v4169_v57 = vmul.u32.u64.low %v518_v52, %v517_v56  ;;  %v4170_v58 = vmul.u32.u64.high %v518_v52, %v517_v56, %v4169_v57 }
 0x1ac   : > { %v528_v62 = vadd.s32 1, %v4173_v60 }
 0x1ad   : > { %vm527_vm8 = vc.u32 %v4170_v58, %v4172_v59  ;;  %v526_v12 = vadd.s32 %v4172_v59, %v4170_v58 }
 0x1ae   : > { %v529_v0 = vsel %vm527_vm8, %v528_v62, %v4173_v60 }
 0x1af   : > { %v530_v1 = vadd.s32 %v529_v0, %v525_v63 }
 0x1b1   : > { %v531_v2 = vadd.s32 536870912, %v530_v1 }
 0x1b3   : > { %v532_v3 = vshrl.u32 %v531_v2, 30 }
 0x1b5   : > { %v533_v4 = vshll.u32 %v532_v3, 30  ;;  %v556_v25 = vsub.s32 4, %v532_v3 }
 0x1b7   : > { %v534_v5 = vsub.s32 %v530_v1, %v533_v4  ;;  %v557_v28 = vsel %vm472_vm10, %v556_v25, %v532_v3 }
 0x1b8   : > { %v559_v30 = vsel %vm471_vm11, 0, %v557_v28 }
 0x1b9   : > { %v536_v6 = vsub.s32 0, %v534_v5  ;;  %v668_v31 = vadd.s32 3, %v559_v30  ;;  %v563_v32 = vand.u32 3, %v559_v30 }
 0x1bb   : > { %v3161_v7 = vmin.u32 %v536_v6, %v534_v5  ;;  %v669_v33 = vand.u32 3, %v668_v31  ;;  %vm568_vm12 = vcmp.eq.s32.totalorder %v563_v32, 2  ;;  %vm565_vm15 = vcmp.eq.s32.totalorder %v563_v32, 0 }
 0x1bc   : > { %vm564_vm1 = vcmp.lt.s32.totalorder %v563_v32, 2 }
 0x1bd   : > { %v538_v8 = vclz %v3161_v7  ;;  %vm674_vm14 = vcmp.eq.s32.totalorder %v669_v33, 2  ;;  %vm671_vm0 = vcmp.eq.s32.totalorder %v669_v33, 0  ;;  %vm670_vm2 = vcmp.lt.s32.totalorder %v669_v33, 2 }
 0x1bf   : > { %v3162_v9 = vadd.s32 4294967294, %v538_v8 }
 0x1c1   : > { %vm3163_vm9 = vcmp.lt.s32.totalorder %v3162_v9, 0 }
 0x1c2   : > { %v541_v10 = vsel %vm3163_vm9, 0, %v3162_v9 }
 0x1c3   : > { %v542_v13 = vsub.s32 32, %v541_v10  ;;  %v546_v14 = vsub.s32 4294967266, %v541_v10  ;;  %v543_v15 = vshll.u32 %v534_v5, %v541_v10 }
 0x1c5   : > { %v544_v17 = vshrl.u32 %v526_v12, %v542_v13  ;;  %v547_v18 = vadd.s32 127, %v546_v14 }
 0x1c7   : > { %v545_v19 = vor.u32 %v544_v17, %v543_v15  ;;  %v548_v20 = vshll.u32 %v547_v18, 23 }
 0x1c9   : > { %v549_v21 = vor.u32 4788187, %v548_v20  ;;  %v552_v23 = vcvt.s32.f32 %v545_v19 }
 0x1cb   : > { %v550_v22 = vand.u32 2147483647, %v549_v21 }
 0x1cd   : > { %v553_v24 = vmul.f32 %v552_v23, %v550_v22 }
 0x1cf   : > { %v554_v26 = vxor.u32 2147483648, %v553_v24 }
 0x1d1   : > { %v555_v27 = vsel %vm472_vm10, %v554_v26, %v553_v24 }
 0x1d2   : > { %v558_v29 = vsel %vm471_vm11, %v4163_v11, %v555_v27 }
 0x1d3   : > { %3599 = vcosq.f32 %v558_v29 }
 0x1d4   : > { %3601 = vsinq.f32 %v558_v29 }
 0x1dd   : > { %v3600_v34 = vpop.eup %3599 }
 0x1de   : > { %v3602_v35 = vpop.eup %3601  ;;  %v569_v36 = vxor.u32 2147483648, %v3600_v34 }
 0x1df   : > { %v566_v37 = vxor.u32 2147483648, %v3602_v35 }
 0x1e0   : > { %v570_v38 = vsel %vm568_vm12, %v569_v36, %v3602_v35  ;;  %v676_v16 = vsel %vm674_vm14, %v569_v36, %v3602_v35 }
 0x1e1   : > { %v567_v39 = vsel %vm565_vm15, %v3600_v34, %v566_v37  ;;  %v673_v40 = vsel %vm671_vm0, %v3600_v34, %v566_v37 }
 0x1e2   : > { %v571_v41 = vsel %vm564_vm1, %v567_v39, %v570_v38  ;;  %v677_v42 = vsel %vm670_vm2, %v673_v40, %v676_v16 }
 0x1e3   : > { %v572_v43 = vsel %vm562_vm3, nan, %v571_v41  ;;  %v678_v44 = vsel %vm562_vm3, nan, %v677_v42 }
 0x1e4   : > { %574 = vst.msk [vmem:[#allocation4] sm:$0xff] %vm573_vm13, %v572_v43  ;;  %679 = vst.msk [vmem:[#allocation5] sm:$0xff] %vm573_vm13, %v678_v44 }
 0x1e5 PF: > { %v3861_v47 = vmov 0   ;;  %v1025_v48 = vld [vmem:[%s4147_s19 + $0x8] sm:$0xff]  ;;  %v1024_v50 = vld [vmem:[%s4147_s19] sm:$0xff]  ;;  %v3862_v59 = vmov 1   ;;  %v3863_v5 = vmov 2   ;;  %v3864_v8 = vmov 3  }
 0x1e6   : > { %3605 = vset.pattern.permute.xlu1 %v3861_v47  ;;  %3603 = vset.pattern.permute.xlu0 %v3861_v47  ;;  %v1153_v49 = vld [vmem:[%s4147_s19 + $0x408] sm:$0xff]  ;;  %v1281_v51 = vunpack.c.l.s8.bf16 %v1025_v48  ;;  %v1152_v52 = vld [vmem:[%s4147_s19 + $0x400] sm:$0xff]  ;;  %v1280_v54 = vunpack.c.l.s8.bf16 %v1024_v50  ;;  %v1297_v55 = vunpack.c.h.s8.bf16 %v1025_v48  ;;  %v1296_v58 = vunpack.c.h.s8.bf16 %v1024_v50  ;;  %s3168_s10 = sshll.u32 %s3938_s9, 9  ;;  %p3169_p3 = scmp.ne.s32.totalorder %s3938_s9, 1 }
 0x1e7   : > { %v1537_v53 = vunpack.c.l.s8.bf16 %v1153_v49  ;;  %v1536_v56 = vunpack.c.l.s8.bf16 %v1152_v52  ;;  %v1553_v57 = vunpack.c.h.s8.bf16 %v1153_v49  ;;  %v1552_v60 = vunpack.c.h.s8.bf16 %v1152_v52  ;;  %v1041_v61 = vld [vmem:[%s4147_s19 + $0x88] sm:$0xff]  ;;  %v1040_v1 = vld [vmem:[%s4147_s19 + $0x80] sm:$0xff] }
 0x1e8   : > { %1812 = vmatprep.subr.bf16.mxu0 %v1281_v51  ;;  %v1169_v62 = vld [vmem:[%s4147_s19 + $0x488] sm:$0xff]  ;;  %v1313_v63 = vunpack.c.l.s8.bf16 %v1041_v61  ;;  %v1168_v2 = vld [vmem:[%s4147_s19 + $0x480] sm:$0xff]  ;;  %v1312_v3 = vunpack.c.l.s8.bf16 %v1040_v1  ;;  %v1329_v6 = vunpack.c.h.s8.bf16 %v1041_v61  ;;  %v3865_v9 = vmov 4  }
 0x1e9   : > { %1853 = vmatprep.subr.bf16.mxu1 %v1537_v53  ;;  %1813 = vmatpush1.bf16.msra.mxu0 %v1280_v54  ;;  %v1569_v0 = vunpack.c.l.s8.bf16 %v1169_v62  ;;  %v1568_v4 = vunpack.c.l.s8.bf16 %v1168_v2  ;;  %v1585_v7 = vunpack.c.h.s8.bf16 %v1169_v62  ;;  %v1328_v10 = vunpack.c.h.s8.bf16 %v1040_v1  ;;  %v1057_v13 = vld [vmem:[%s4147_s19 + $0x108] sm:$0xff]  ;;  %v1056_v15 = vld [vmem:[%s4147_s19 + $0x100] sm:$0xff] }
 0x1ea   : > { %1854 = vmatpush1.bf16.msra.mxu1 %v1536_v56  ;;  %1814 = vmatprep.subr.bf16.mxu0 %v1297_v55  ;;  %v1584_v12 = vunpack.c.h.s8.bf16 %v1168_v2  ;;  %v1185_v14 = vld [vmem:[%s4147_s19 + $0x508] sm:$0xff]  ;;  %v1184_v17 = vld [vmem:[%s4147_s19 + $0x500] sm:$0xff]  ;;  %v3866_v18 = vmov 5   ;;  %v1345_v19 = vunpack.c.l.s8.bf16 %v1057_v13  ;;  %v1344_v21 = vunpack.c.l.s8.bf16 %v1056_v15 }
 0x1eb   : > { %v4186_v45 = vld [vmem:[#allocation4] sm:$0xff]  ;;  %v697_v46 = vld [vmem:[#allocation5] sm:$0xff]  ;;  %1855 = vmatprep.subr.bf16.mxu1 %v1553_v57  ;;  %v1601_v20 = vunpack.c.l.s8.bf16 %v1185_v14  ;;  %v1600_v22 = vunpack.c.l.s8.bf16 %v1184_v17  ;;  %v1361_v23 = vunpack.c.h.s8.bf16 %v1057_v13  ;;  %v1617_v24 = vunpack.c.h.s8.bf16 %v1185_v14  ;;  %v1073_v25 = vld [vmem:[%s4147_s19 + $0x188] sm:$0xff] }
 0x1ec   : > { %v4189_v11 = vsub.f32 %v697_v46, %v4186_v45  ;;  %733 = vperm.xlu1 %3605, %v4186_v45   ;;  %v1360_v26 = vunpack.c.h.s8.bf16 %v1056_v15  ;;  %v1201_v27 = vld [vmem:[%s4147_s19 + $0x588] sm:$0xff]  ;;  %v1616_v28 = vunpack.c.h.s8.bf16 %v1184_v17  ;;  %v1072_v29 = vld [vmem:[%s4147_s19 + $0x180] sm:$0xff]  ;;  %v3867_v30 = vmov 7  }
 0x1ed   : > { %1815 = vmatpush1.bf16.msra.mxu0 %v1296_v58  ;;  %v1377_v31 = vunpack.c.l.s8.bf16 %v1073_v25  ;;  %v1200_v32 = vld [vmem:[%s4147_s19 + $0x580] sm:$0xff]  ;;  %v1633_v33 = vunpack.c.l.s8.bf16 %v1201_v27  ;;  %v1376_v34 = vunpack.c.l.s8.bf16 %v1072_v29  ;;  %v1393_v36 = vunpack.c.h.s8.bf16 %v1073_v25  ;;  %v1089_v38 = vld [vmem:[%s4147_s19 + $0x208] sm:$0xff] }
 0x1ee   : > { %724 = vperm.xlu0 %3603, %v4189_v11   ;;  %1856 = vmatpush1.bf16.msra.mxu1 %v1552_v60  ;;  %v1632_v35 = vunpack.c.l.s8.bf16 %v1200_v32  ;;  %v1649_v37 = vunpack.c.h.s8.bf16 %v1201_v27  ;;  %v3868_v16 = vmov 8   ;;  %v1217_v39 = vld [vmem:[%s4147_s19 + $0x608] sm:$0xff]  ;;  %v1392_v40 = vunpack.c.h.s8.bf16 %v1072_v29  ;;  %v1088_v43 = vld [vmem:[%s4147_s19 + $0x200] sm:$0xff]  ;;  %v4247_v27 = vld [vmem:[%s4147_s19 + $0x418] sm:$0xff] }
 0x1ef   : > { %1816 = vmatprep.subr.bf16.mxu0 %v1313_v63  ;;  %1857 = vmatprep.subr.bf16.mxu1 %v1569_v0  ;;  %v1648_v41 = vunpack.c.h.s8.bf16 %v1200_v32  ;;  %v1409_v42 = vunpack.c.l.s8.bf16 %v1089_v38  ;;  %v3869_v44 = vmov 6   ;;  %v1665_v46 = vunpack.c.l.s8.bf16 %v1217_v39  ;;  %v1216_v47 = vld [vmem:[%s4147_s19 + $0x600] sm:$0xff]  ;;  %v1105_v53 = vld [vmem:[%s4147_s19 + $0x288] sm:$0xff] }
 0x1f0   : > { %3606 = vset.pattern.permute.xlu1 %v3862_v59  ;;  %v1408_v48 = vunpack.c.l.s8.bf16 %v1088_v43  ;;  %v3870_v49 = vmov 9   ;;  %v1664_v50 = vunpack.c.l.s8.bf16 %v1216_v47  ;;  %v1425_v51 = vunpack.c.h.s8.bf16 %v1089_v38  ;;  %v1233_v54 = vld [vmem:[%s4147_s19 + $0x688] sm:$0xff]  ;;  %v1104_v58 = vld [vmem:[%s4147_s19 + $0x280] sm:$0xff] }
 0x1f1   : > { %761 = vperm.xlu1 %3606, %v4186_v45   ;;  %1817 = vmatpush1.bf16.msra.mxu0 %v1312_v3  ;;  %v1681_v52 = vunpack.c.h.s8.bf16 %v1217_v39  ;;  %v1424_v55 = vunpack.c.h.s8.bf16 %v1088_v43  ;;  %v1680_v56 = vunpack.c.h.s8.bf16 %v1216_v47  ;;  %v1441_v57 = vunpack.c.l.s8.bf16 %v1105_v53  ;;  %v1232_v60 = vld [vmem:[%s4147_s19 + $0x680] sm:$0xff]  ;;  %v1121_v1 = vld [vmem:[%s4147_s19 + $0x308] sm:$0xff] }
 0x1f2   : > { %3604 = vset.pattern.permute.xlu0 %v3862_v59  ;;  %1858 = vmatpush1.bf16.msra.mxu1 %v1568_v4  ;;  %v1697_v59 = vunpack.c.l.s8.bf16 %v1233_v54  ;;  %v1440_v61 = vunpack.c.l.s8.bf16 %v1104_v58  ;;  %v1696_v62 = vunpack.c.l.s8.bf16 %v1232_v60  ;;  %v1457_v63 = vunpack.c.h.s8.bf16 %v1105_v53  ;;  %v1249_v3 = vld [vmem:[%s4147_s19 + $0x708] sm:$0xff] }
 0x1f3   : > { %753 = vperm.xlu0 %3604, %v4189_v11   ;;  %1818 = vmatprep.subr.bf16.mxu0 %v1329_v6  ;;  %v1713_v0 = vunpack.c.h.s8.bf16 %v1233_v54  ;;  %v1456_v2 = vunpack.c.h.s8.bf16 %v1104_v58  ;;  %v1712_v4 = vunpack.c.h.s8.bf16 %v1232_v60  ;;  %v1473_v6 = vunpack.c.l.s8.bf16 %v1121_v1  ;;  %v1137_v14 = vld [vmem:[%s4147_s19 + $0x388] sm:$0xff] }
 0x1f4   : > { %1859 = vmatprep.subr.bf16.mxu1 %v1585_v7  ;;  %v1248_v7 = vld [vmem:[%s4147_s19 + $0x700] sm:$0xff]  ;;  %v1745_v13 = vunpack.c.h.s8.bf16 %v1249_v3  ;;  %v1265_v15 = vld [vmem:[%s4147_s19 + $0x788] sm:$0xff]  ;;  %vm3872_vm4 = vmmov (!%p3169_p3), 0   ;;  %vm2973_vm5 = vcmask (!%p3169_p3), 261120   ;;  %vm3047_vm6 = vcmask (!%p3169_p3), 31744  }
 0x1f5   : > { %3607 = vset.pattern.permute.xlu1 %v3863_v5  ;;  %1819 = vmatpush1.bf16.msra.mxu0 %v1328_v10  ;;  %v1728_v10 = vunpack.c.l.s8.bf16 %v1248_v7  ;;  %v1777_v25 = vunpack.c.h.s8.bf16 %v1265_v15 }
 0x1f6   : > { %785 = vperm.xlu1 %3607, %v4189_v11   ;;  %1860 = vmatpush1.bf16.msra.mxu1 %v1584_v12  ;;  %v1489_v12 = vunpack.c.h.s8.bf16 %v1121_v1 }
 0x1f7   : > { %3608 = vset.pattern.permute.xlu0 %v3863_v5  ;;  %1820 = vmatprep.subr.bf16.mxu0 %v1345_v19  ;;  %v1120_v5 = vld [vmem:[%s4147_s19 + $0x300] sm:$0xff]  ;;  %v1505_v19 = vunpack.c.l.s8.bf16 %v1137_v14 }
 0x1f8   : > { %793 = vperm.xlu0 %3608, %v4186_v45   ;;  %1861 = vmatprep.subr.bf16.mxu1 %v1601_v20  ;;  %v1488_v17 = vunpack.c.h.s8.bf16 %v1120_v5  ;;  %v1136_v20 = vld [vmem:[%s4147_s19 + $0x380] sm:$0xff] }
 0x1f9   : > { %1821 = vmatpush1.bf16.msra.mxu0 %v1344_v21  ;;  %v1761_v21 = vunpack.c.l.s8.bf16 %v1265_v15 }
 0x1fa   : > { %3609 = vset.pattern.permute.xlu1 %v3864_v8  ;;  %1862 = vmatpush1.bf16.msra.mxu1 %v1600_v22  ;;  %v1729_v8 = vunpack.c.l.s8.bf16 %v1249_v3  ;;  %v1504_v22 = vunpack.c.l.s8.bf16 %v1136_v20 }
 0x1fb   : > { %817 = vperm.xlu1 %3609, %v4189_v11   ;;  %1822 = vmatprep.subr.bf16.mxu0 %v1361_v23 }
 0x1fc   : > { %3610 = vset.pattern.permute.xlu0 %v3865_v9  ;;  %1863 = vmatprep.subr.bf16.mxu1 %v1617_v24  ;;  %v1521_v24 = vunpack.c.h.s8.bf16 %v1137_v14 }
 0x1fd   : > { %849 = vperm.xlu0 %3610, %v4189_v11   ;;  %1823 = vmatpush1.bf16.msra.mxu0 %v1360_v26  ;;  %v4244_v26 = vld [vmem:[%s4147_s19 + $0x18] sm:$0xff] }
 0x1fe   : > { %1864 = vmatpush1.bf16.msra.mxu1 %v1616_v28  ;;  %1824 = vmatprep.subr.bf16.mxu0 %v1377_v31  ;;  %v1520_v28 = vunpack.c.h.s8.bf16 %v1136_v20  ;;  %v1283_v29 = vunpack.c.l.s8.bf16 %v4244_v26  ;;  %v698_v31 = vlaneseq }
 0x1ff   : > { %825 = vperm.xlu1 %3609, %v4186_v45   ;;  %1865 = vmatprep.subr.bf16.mxu1 %v1633_v33  ;;  %v704_v33 = vstv %s3168_s10 }
 0x200   : > { %v699_v32 = vand.u32 127, %v698_v31 }
 0x201   : > { %3613 = vset.pattern.permute.xlu0 %v3866_v18  ;;  %1825 = vmatpush1.bf16.msra.mxu0 %v1376_v34 }
 0x202   : > { %889 = vperm.xlu0 %3613, %v4186_v45   ;;  %1866 = vmatpush1.bf16.msra.mxu1 %v1632_v35  ;;  %v700_v34 = vadd.s32 128, %v699_v32  ;;  %v701_v35 = vadd.s32 256, %v699_v32 }
 0x203   : > { %3611 = vset.pattern.permute.xlu1 %v3865_v9  ;;  %1826 = vmatprep.subr.bf16.mxu0 %v1393_v36  ;;  %v1472_v9 = vunpack.c.l.s8.bf16 %v1120_v5  ;;  %v702_v36 = vadd.s32 384, %v699_v32 }
 0x204   : > { %857 = vperm.xlu1 %3611, %v4186_v45   ;;  %1867 = vmatprep.subr.bf16.mxu1 %v1649_v37  ;;  %v4252_v37 = vadd.s32 %v704_v33, %v699_v32  ;;  %v4254_v38 = vadd.s32 %v704_v33, %v700_v34 }
 0x205   : > { %1827 = vmatpush1.bf16.msra.mxu0 %v1392_v40  ;;  %v4258_v39 = vadd.s32 %v704_v33, %v702_v36 }
 0x206   : > { %3615 = vset.pattern.permute.xlu0 %v3867_v30  ;;  %1868 = vmatpush1.bf16.msra.mxu1 %v1648_v41  ;;  %v709_v40 = vshra.s32 %v4252_v37, 9  ;;  %v710_v41 = vshra.s32 %v4254_v38, 9  ;;  %v772_v53 = vshra.s32 %v4252_v37, 7  ;;  %v773_v60 = vshra.s32 %v4254_v38, 7 }
 0x207   : > { %945 = vperm.xlu0 %3615, %v4189_v11   ;;  %1828 = vmatprep.subr.bf16.mxu0 %v1409_v42  ;;  %v740_v42 = vshra.s32 %v4252_v37, 8  ;;  %v836_v3 = vshra.s32 %v4252_v37, 5 }
 0x208   : > { %3612 = vset.pattern.permute.xlu1 %v3866_v18  ;;  %1869 = vmatprep.subr.bf16.mxu1 %v1665_v46  ;;  %v1744_v18 = vunpack.c.h.s8.bf16 %v1248_v7  ;;  %v712_v46 = vshra.s32 %v4258_v39, 9  ;;  %v4267_v47 = vand.u32 1, %v709_v40 }
 0x209   : > { %881 = vperm.xlu1 %3612, %v4189_v11   ;;  %1829 = vmatpush1.bf16.msra.mxu0 %v1408_v48  ;;  %v741_v48 = vshra.s32 %v4254_v38, 8 }
 0x20a   : > { %1870 = vmatpush1.bf16.msra.mxu1 %v1664_v50  ;;  %1830 = vmatprep.subr.bf16.mxu0 %v1425_v51  ;;  %v4271_v50 = vand.u32 1, %v710_v41  ;;  %v743_v51 = vshra.s32 %v4258_v39, 8 }
 0x20b   : > { %3618 = vset.pattern.permute.xlu0 %v3868_v16  ;;  %1871 = vmatprep.subr.bf16.mxu1 %v1681_v52  ;;  %v4274_v52 = vand.u32 1, %v740_v42  ;;  %v967_v42 = vshra.s32 %v4258_v39, 1 }
 0x20c   : > { %985 = vperm.xlu0 %3618, %v4186_v45   ;;  %v718_v7 = vcvt.s32.f32 %v4271_v50 }
 0x20d   : > { %3614 = vset.pattern.permute.xlu1 %v3869_v44  ;;  %1831 = vmatpush1.bf16.msra.mxu0 %v1424_v55  ;;  %v4279_v55 = vand.u32 1, %v712_v46  ;;  %v965_v46 = vshra.s32 %v4254_v38, 1 }
 0x20e   : > { %913 = vperm.xlu1 %3614, %v4189_v11   ;;  %1872 = vmatpush1.bf16.msra.mxu1 %v1680_v56  ;;  %v717_v56 = vcvt.s32.f32 %v4267_v47 }
 0x20f   : > { %1832 = vmatprep.subr.bf16.mxu0 %v1441_v57  ;;  %1873 = vmatprep.subr.bf16.mxu1 %v1697_v59  ;;  %v4282_v57 = vand.u32 1, %v741_v48  ;;  %v964_v48 = vshra.s32 %v4252_v37, 1 }
 0x210   : > { %3620 = vset.pattern.permute.xlu0 %v3870_v49 }
 0x211   : > { %1833 = vmatpush1.bf16.msra.mxu0 %v1440_v61 }
 0x212   : > { %921 = vperm.xlu1 %3614, %v4186_v45   ;;  %1874 = vmatpush1.bf16.msra.mxu1 %v1696_v62  ;;  %v775_v62 = vshra.s32 %v4258_v39, 7 }
 0x213   : > { %1834 = vmatprep.subr.bf16.mxu0 %v1457_v63  ;;  %1875 = vmatprep.subr.bf16.mxu1 %v1713_v0  ;;  %v804_v63 = vshra.s32 %v4252_v37, 6  ;;  %v805_v0 = vshra.s32 %v4254_v38, 6 }
 0x214   : > { %v4310_v15 = vand.u32 1, %v775_v62  ;;  %v901_v62 = vshra.s32 %v4254_v38, 3 }
 0x215   : > { %1835 = vmatpush1.bf16.msra.mxu0 %v1456_v2  ;;  %v807_v2 = vshra.s32 %v4258_v39, 6 }
 0x216   : > { %3616 = vset.pattern.permute.xlu1 %v3867_v30  ;;  %1876 = vmatpush1.bf16.msra.mxu1 %v1712_v4  ;;  %v1539_v30 = vunpack.c.l.s8.bf16 %v4247_v27  ;;  %v837_v4 = vshra.s32 %v4254_v38, 5  ;;  %v4376_v32 = vand.u32 1, %v901_v62  ;;  %v4396_v62 = vand.u32 1, %v967_v42 }
 0x217   : > { %953 = vperm.xlu1 %3616, %v4186_v45   ;;  %1836 = vmatprep.subr.bf16.mxu0 %v1473_v6  ;;  %v839_v6 = vshra.s32 %v4258_v39, 5 }
 0x218   : > { %1877 = vmatprep.subr.bf16.mxu1 %v1729_v8 }
 0x219   : > { %1837 = vmatpush1.bf16.msra.mxu0 %v1472_v9  ;;  %v4301_v9 = vand.u32 1, %v743_v51  ;;  %v869_v51 = vshra.s32 %v4254_v38, 4 }
 0x21a   : > { %1878 = vmatpush1.bf16.msra.mxu1 %v1728_v10  ;;  %1838 = vmatprep.subr.bf16.mxu0 %v1489_v12  ;;  %v4304_v12 = vand.u32 1, %v772_v53 }
 0x21b   : > { %3617 = vset.pattern.permute.xlu1 %v3868_v16  ;;  %1879 = vmatprep.subr.bf16.mxu1 %v1745_v13  ;;  %v4256_v16 = vadd.s32 %v704_v33, %v701_v35  ;;  %v4306_v13 = vand.u32 1, %v773_v60  ;;  %v871_v60 = vshra.s32 %v4258_v39, 4  ;;  %v4368_v36 = vand.u32 1, %v869_v51 }
 0x21c   : > { %977 = vperm.xlu1 %3617, %v4189_v11   ;;  %v5224_v47 = vcvt.s32.f32 %v4301_v9  ;;  %v996_v9 = vand.u32 1, %v4252_v37 }
 0x21d   : > { %1839 = vmatpush1.bf16.msra.mxu0 %v1488_v17  ;;  %v711_v44 = vshra.s32 %v4256_v16, 9  ;;  %v774_v61 = vshra.s32 %v4256_v16, 7  ;;  %v806_v1 = vshra.s32 %v4256_v16, 6  ;;  %v838_v5 = vshra.s32 %v4256_v16, 5 }
 0x21e   : > { %1880 = vmatpush1.bf16.msra.mxu1 %v1744_v18  ;;  %1840 = vmatprep.subr.bf16.mxu0 %v1505_v19  ;;  %v4314_v18 = vand.u32 1, %v804_v63  ;;  %v4316_v19 = vand.u32 1, %v805_v0  ;;  %v870_v53 = vshra.s32 %v4256_v16, 4  ;;  %v902_v63 = vshra.s32 %v4256_v16, 3 }
 0x21f   : > { %1881 = vmatprep.subr.bf16.mxu1 %v1761_v21  ;;  %v4277_v54 = vand.u32 1, %v711_v44  ;;  %v4308_v14 = vand.u32 1, %v774_v61  ;;  %v4318_v20 = vand.u32 1, %v806_v1  ;;  %v4320_v21 = vand.u32 1, %v807_v2 }
 0x220   : > { %3619 = vset.pattern.permute.xlu1 %v3870_v49  ;;  %v742_v49 = vshra.s32 %v4256_v16, 8  ;;  %v900_v61 = vshra.s32 %v4252_v37, 3  ;;  %v903_v0 = vshra.s32 %v4258_v39, 3  ;;  %v932_v1 = vshra.s32 %v4252_v37, 2 }
 0x221   : > { %1005 = vperm.xlu1 %3619, %v4189_v11   ;;  %v1264_v11 = vld [vmem:[%s4147_s19 + $0x780] sm:$0xff]  ;;  %1841 = vmatpush1.bf16.msra.mxu0 %v1504_v22  ;;  %v719_v8 = vcvt.s32.f32 %v4277_v54  ;;  %v4324_v22 = vand.u32 1, %v837_v4  ;;  %v933_v2 = vshra.s32 %v4254_v38, 2  ;;  %v935_v4 = vshra.s32 %v4258_v39, 2 }
 0x222   : > { %v1760_v23 = vunpack.c.l.s8.bf16 %v1264_v11  ;;  %1842 = vmatprep.subr.bf16.mxu0 %v1521_v24  ;;  %v4286_v59 = vand.u32 1, %v742_v49  ;;  %v4328_v24 = vand.u32 1, %v839_v6  ;;  %v868_v49 = vshra.s32 %v4252_v37, 4 }
 0x223   : > { %v966_v44 = vshra.s32 %v4256_v16, 1  ;;  %v4370_v35 = vand.u32 1, %v870_v53  ;;  %v4372_v34 = vand.u32 1, %v871_v60  ;;  %v4374_v33 = vand.u32 1, %v900_v61 }
 0x224   : > { %1882 = vmatpush1.bf16.msra.mxu1 %v1760_v23  ;;  %v4326_v23 = vand.u32 1, %v838_v5  ;;  %v4366_v40 = vand.u32 1, %v868_v49  ;;  %v4378_v31 = vand.u32 1, %v902_v63  ;;  %v4388_v51 = vand.u32 1, %v935_v4 }
 0x225   : > { %1013 = vperm.xlu1 %3619, %v4186_v45   ;;  %v1776_v45 = vunpack.c.h.s8.bf16 %v1264_v11  ;;  %1883 = vmatprep.subr.bf16.mxu1 %v1777_v25  ;;  %v4322_v11 = vand.u32 1, %v836_v3  ;;  %v720_v25 = vcvt.s32.f32 %v4279_v55  ;;  %v934_v3 = vshra.s32 %v4256_v16, 2 }
 0x226   : > { %1843 = vmatpush1.bf16.msra.mxu0 %v1520_v28  ;;  %v4390_v53 = vand.u32 1, %v964_v48  ;;  %v4392_v60 = vand.u32 1, %v965_v46  ;;  %v4394_v61 = vand.u32 1, %v966_v44  ;;  %v5223_v46 = vcvt.s32.f32 %v4286_v59 }
 0x227   : > { %1894 = vmatprep.subr.bf16.mxu0 %v1283_v29  ;;  %v4382_v29 = vand.u32 1, %v932_v1  ;;  %v4386_v49 = vand.u32 1, %v934_v3  ;;  %v5222_v3 = vcvt.s32.f32 %v4282_v57  ;;  %v5225_v54 = vcvt.s32.f32 %v4304_v12 }
 0x228   : > { %1884 = vmatpush1.bf16.msra.mxu1 %v1776_v45  ;;  %v4384_v45 = vand.u32 1, %v933_v2  ;;  %v5221_v2 = vcvt.s32.f32 %v4274_v52  ;;  %v5226_v55 = vcvt.s32.f32 %v4306_v13  ;;  %v5228_v59 = vcvt.s32.f32 %v4310_v15 }
 0x229   : > { %1935 = vmatprep.subr.bf16.mxu1 %v1539_v30  ;;  %v4380_v30 = vand.u32 1, %v903_v0  ;;  %v998_v12 = vand.u32 1, %v4256_v16 }
 0x26b   : > { %v4263_v43 = vpop.permute.xlu1 %733 }
 0x26d   : > { %v725_v5 = vpop.permute.xlu0 %724 }
 0x26e   : > { %v727_v44 = vmul.f32 %v725_v5, %v717_v56  ;;  %v728_v28 = vmul.f32 %v725_v5, %v718_v7  ;;  %v729_v10 = vmul.f32 %v725_v5, %v719_v8  ;;  %v730_v1 = vmul.f32 %v725_v5, %v720_v25 }
 0x26f   : > { %v5227_v25 = vcvt.s32.f32 %v4308_v14 }
 0x270   : > { %v4284_v58 = vpop.permute.xlu1 %761  ;;  %v736_v13 = vadd.f32 %v4263_v43, %v727_v44  ;;  %v738_v14 = vadd.f32 %v4263_v43, %v729_v10 }
 0x272   : > { %v754_v4 = vpop.permute.xlu0 %753 }
 0x273   : > { %v756_v0 = vmul.f32 %v754_v4, %v5221_v2  ;;  %v757_v48 = vmul.f32 %v754_v4, %v5222_v3  ;;  %v758_v42 = vmul.f32 %v754_v4, %v5223_v46  ;;  %v759_v56 = vmul.f32 %v754_v4, %v5224_v47 }
 0x274   : > { %v997_v2 = vand.u32 1, %v4254_v38  ;;  %v999_v3 = vand.u32 1, %v4258_v39  ;;  %v737_v4 = vadd.f32 %v4263_v43, %v728_v28  ;;  %v739_v46 = vadd.f32 %v4263_v43, %v730_v1 }
 0x275   : > { %v4312_v17 = vpop.permute.xlu1 %785  ;;  %v764_v15 = vadd.f32 %v4284_v58, %v756_v0  ;;  %v766_v37 = vadd.f32 %v4284_v58, %v758_v42  ;;  %v767_v38 = vadd.f32 %v4284_v58, %v759_v56  ;;  %v5229_v28 = vcvt.s32.f32 %v4314_v18 }
 0x276   : > { %v788_v8 = vmul.f32 %v4312_v17, %v5225_v54  ;;  %v789_v52 = vmul.f32 %v4312_v17, %v5226_v55  ;;  %v790_v57 = vmul.f32 %v4312_v17, %v5227_v25  ;;  %v791_v5 = vmul.f32 %v4312_v17, %v5228_v59 }
 0x277   : > { %v794_v50 = vpop.permute.xlu0 %793  ;;  %v765_v17 = vadd.f32 %v4284_v58, %v757_v48  ;;  %v5230_v43 = vcvt.s32.f32 %v4316_v19  ;;  %v5231_v1 = vcvt.s32.f32 %v4318_v20  ;;  %v5232_v58 = vcvt.s32.f32 %v4320_v21 }
 0x278   : > { %v796_v16 = vadd.f32 %v794_v50, %v788_v8  ;;  %v797_v54 = vadd.f32 %v794_v50, %v789_v52  ;;  %v798_v39 = vadd.f32 %v794_v50, %v790_v57  ;;  %v799_v55 = vadd.f32 %v794_v50, %v791_v5 }
 0x279   : > { %v5233_v56 = vcvt.s32.f32 %v4322_v11  ;;  %v5234_v8 = vcvt.s32.f32 %v4324_v22  ;;  %v5235_v52 = vcvt.s32.f32 %v4326_v23  ;;  %v5236_v19 = vcvt.s32.f32 %v4328_v24 }
 0x27a   : > { %v4342_v41 = vpop.permute.xlu1 %817  ;;  %v768_v59 = vmul.f32 %v764_v15, %v736_v13  ;;  %v769_v20 = vmul.f32 %v765_v17, %v737_v4  ;;  %v770_v5 = vmul.f32 %v766_v37, %v738_v14  ;;  %v5237_v15 = vcvt.s32.f32 %v4366_v40 }
 0x27b   : > { %v820_v10 = vmul.f32 %v4342_v41, %v5229_v28  ;;  %v821_v0 = vmul.f32 %v4342_v41, %v5230_v43  ;;  %v822_v48 = vmul.f32 %v4342_v41, %v5231_v1  ;;  %v823_v42 = vmul.f32 %v4342_v41, %v5232_v58 }
 0x27c   : > { %v850_v47 = vpop.permute.xlu0 %849  ;;  %v771_v28 = vmul.f32 %v767_v38, %v739_v46  ;;  %v800_v1 = vmul.f32 %v796_v16, %v768_v59  ;;  %v801_v58 = vmul.f32 %v797_v54, %v769_v20  ;;  %v802_v23 = vmul.f32 %v798_v39, %v770_v5 }
 0x27d   : > { %v852_v50 = vmul.f32 %v850_v47, %v5233_v56  ;;  %v853_v18 = vmul.f32 %v850_v47, %v5234_v8  ;;  %v854_v25 = vmul.f32 %v850_v47, %v5235_v52  ;;  %v855_v57 = vmul.f32 %v850_v47, %v5236_v19 }
 0x27e   : > { %v4360_v6 = vpop.permute.xlu1 %825  ;;  %v803_v56 = vmul.f32 %v799_v55, %v771_v28  ;;  %v5238_v37 = vcvt.s32.f32 %v4368_v36  ;;  %v5239_v38 = vcvt.s32.f32 %v4370_v35  ;;  %v5240_v16 = vcvt.s32.f32 %v4372_v34 }
 0x27f   : > { %v828_v21 = vadd.f32 %v4360_v6, %v820_v10  ;;  %v829_v41 = vadd.f32 %v4360_v6, %v821_v0  ;;  %v830_v11 = vadd.f32 %v4360_v6, %v822_v48  ;;  %v831_v43 = vadd.f32 %v4360_v6, %v823_v42 }
 0x280   : > { %v1000_v42 = vcvt.s32.f32 %v996_v9  ;;  %v1003_v8 = vcvt.s32.f32 %v999_v3  ;;  %v5241_v34 = vcvt.s32.f32 %v4374_v33  ;;  %v5242_v20 = vcvt.s32.f32 %v4376_v32 }
 0x281   : > { %v890_v46 = vpop.permute.xlu0 %889  ;;  %v832_v39 = vmul.f32 %v828_v21, %v800_v1  ;;  %v833_v55 = vmul.f32 %v829_v41, %v801_v58  ;;  %v834_v10 = vmul.f32 %v830_v11, %v802_v23  ;;  %v835_v0 = vmul.f32 %v831_v43, %v803_v56 }
 0x282   : > { %v5243_v9 = vcvt.s32.f32 %v4378_v31  ;;  %v5245_v28 = vcvt.s32.f32 %v4382_v29  ;;  %v5246_v41 = vcvt.s32.f32 %v4384_v45  ;;  %v5247_v43 = vcvt.s32.f32 %v4386_v49 }
 0x283   : > { %v4398_v63 = vpop.permute.xlu1 %857  ;;  %v5248_v33 = vcvt.s32.f32 %v4388_v51  ;;  %v5250_v29 = vcvt.s32.f32 %v4392_v60  ;;  %v5251_v45 = vcvt.s32.f32 %v4394_v61  ;;  %v5252_v49 = vcvt.s32.f32 %v4396_v62 }
 0x284   : > { %v860_v24 = vadd.f32 %v4398_v63, %v852_v50  ;;  %v861_v13 = vadd.f32 %v4398_v63, %v853_v18  ;;  %v862_v4 = vadd.f32 %v4398_v63, %v854_v25  ;;  %v863_v14 = vadd.f32 %v4398_v63, %v855_v57 }
 0x285   : > { %v1001_v63 = vcvt.s32.f32 %v997_v2  ;;  %v1002_v50 = vcvt.s32.f32 %v998_v12  ;;  %v5244_v12 = vcvt.s32.f32 %v4380_v30  ;;  %v5249_v30 = vcvt.s32.f32 %v4390_v53 }
 0x286   : > { %v864_v40 = vmul.f32 %v860_v24, %v832_v39  ;;  %v865_v18 = vmul.f32 %v861_v13, %v833_v55  ;;  %v866_v52 = vmul.f32 %v862_v4, %v834_v10  ;;  %v867_v36 = vmul.f32 %v863_v14, %v835_v0  ;;  %v946_v25 = vpop.permute.xlu0 %945 }
 0x287   : > { %v948_v21 = vmul.f32 %v946_v25, %v5245_v28  ;;  %v949_v11 = vmul.f32 %v946_v25, %v5246_v41  ;;  %v950_v1 = vmul.f32 %v946_v25, %v5247_v43  ;;  %v951_v58 = vmul.f32 %v946_v25, %v5248_v33 }
 0x288   : > { %v882_v7 = vpop.permute.xlu1 %881  ;;  %v1299_v33 = vunpack.c.h.s8.bf16 %v4244_v26 }
 0x289   : > { %v884_v17 = vmul.f32 %v882_v7, %v5237_v15  ;;  %v885_v6 = vmul.f32 %v882_v7, %v5238_v37  ;;  %v886_v47 = vmul.f32 %v882_v7, %v5239_v38  ;;  %v887_v54 = vmul.f32 %v882_v7, %v5240_v16 }
 0x28b   : > { %v892_v19 = vadd.f32 %v890_v46, %v884_v17  ;;  %v893_v35 = vadd.f32 %v890_v46, %v885_v6  ;;  %v894_v57 = vadd.f32 %v890_v46, %v886_v47  ;;  %v895_v59 = vadd.f32 %v890_v46, %v887_v54  ;;  %v986_v37 = vpop.permute.xlu0 %985 }
 0x28d   : > { %v914_v44 = vpop.permute.xlu1 %913  ;;  %v896_v46 = vmul.f32 %v892_v19, %v864_v40  ;;  %v897_v51 = vmul.f32 %v893_v35, %v865_v18  ;;  %v898_v15 = vmul.f32 %v894_v57, %v866_v52  ;;  %v899_v17 = vmul.f32 %v895_v59, %v867_v36 }
 0x28e   : > { %v916_v7 = vmul.f32 %v914_v44, %v5241_v34  ;;  %v917_v5 = vmul.f32 %v914_v44, %v5242_v20  ;;  %v918_v2 = vmul.f32 %v914_v44, %v5243_v9  ;;  %v919_v3 = vmul.f32 %v914_v44, %v5244_v12  ;;  %v1026_v12 = vld [vmem:[%s4147_s19 + $0x10] sm:$0xff] }
 0x291   : > { %v922_v22 = vpop.permute.xlu1 %921 }
 0x292   : > { %v924_v32 = vadd.f32 %v922_v22, %v916_v7  ;;  %v925_v23 = vadd.f32 %v922_v22, %v917_v5  ;;  %v926_v56 = vadd.f32 %v922_v22, %v918_v2  ;;  %v927_v31 = vadd.f32 %v922_v22, %v919_v3  ;;  %v1154_v3 = vld [vmem:[%s4147_s19 + $0x410] sm:$0xff] }
 0x294   : > { %v928_v53 = vmul.f32 %v924_v32, %v896_v46  ;;  %v929_v16 = vmul.f32 %v925_v23, %v897_v51  ;;  %v930_v54 = vmul.f32 %v926_v56, %v898_v15  ;;  %v931_v60 = vmul.f32 %v927_v31, %v899_v17  ;;  %v1043_v32 = vld [vmem:[%s4147_s19 + $0x98] sm:$0xff]  ;;  %v1058_v17 = vld [vmem:[%s4147_s19 + $0x110] sm:$0xff] }
 0x295   : > { %v1171_v23 = vld [vmem:[%s4147_s19 + $0x498] sm:$0xff]  ;;  %v1298_v56 = vunpack.c.h.s8.bf16 %v1026_v12  ;;  %v1554_v31 = vunpack.c.h.s8.bf16 %v1154_v3 }
 0x296   : > { %v954_v48 = vpop.permute.xlu1 %953  ;;  %v1571_v26 = vunpack.c.l.s8.bf16 %v1171_v23 }
 0x297   : > { %v956_v6 = vadd.f32 %v954_v48, %v948_v21  ;;  %v957_v22 = vadd.f32 %v954_v48, %v949_v11  ;;  %v958_v38 = vadd.f32 %v954_v48, %v950_v1  ;;  %v959_v47 = vadd.f32 %v954_v48, %v951_v58 }
 0x298   : > { %v1555_v58 = vunpack.c.h.s8.bf16 %v4247_v27  ;;  %v1170_v27 = vld [vmem:[%s4147_s19 + $0x490] sm:$0xff] }
 0x299   : > { %v960_v62 = vmul.f32 %v956_v6, %v928_v53  ;;  %v961_v25 = vmul.f32 %v957_v22, %v929_v16  ;;  %v962_v40 = vmul.f32 %v958_v38, %v930_v54  ;;  %v963_v18 = vmul.f32 %v959_v47, %v931_v60  ;;  %v1075_v53 = vld [vmem:[%s4147_s19 + $0x198] sm:$0xff] }
 0x29a   : > { %v1586_v46 = vunpack.c.h.s8.bf16 %v1170_v27  ;;  %v1346_v6 = vunpack.c.l.s8.bf16 %v1058_v17  ;;  %v1203_v16 = vld [vmem:[%s4147_s19 + $0x598] sm:$0xff]  ;;  %v1362_v54 = vunpack.c.h.s8.bf16 %v1058_v17  ;;  %v1138_v17 = vld [vmem:[%s4147_s19 + $0x390] sm:$0xff] }
 0x29b   : > { %v978_v24 = vpop.permute.xlu1 %977 }
 0x29c   : > { %v980_v44 = vmul.f32 %v978_v24, %v5249_v30  ;;  %v981_v13 = vmul.f32 %v978_v24, %v5250_v29  ;;  %v982_v4 = vmul.f32 %v978_v24, %v5251_v45  ;;  %v983_v14 = vmul.f32 %v978_v24, %v5252_v49  ;;  %v1042_v30 = vld [vmem:[%s4147_s19 + $0x90] sm:$0xff]  ;;  %v1187_v49 = vld [vmem:[%s4147_s19 + $0x518] sm:$0xff] }
 0x29d   : > { %v1315_v24 = vunpack.c.l.s8.bf16 %v1043_v32  ;;  %v1570_v29 = vunpack.c.l.s8.bf16 %v1170_v27  ;;  %v1587_v45 = vunpack.c.h.s8.bf16 %v1171_v23  ;;  %v1603_v15 = vunpack.c.l.s8.bf16 %v1187_v49  ;;  %v1251_v23 = vld [vmem:[%s4147_s19 + $0x718] sm:$0xff]  ;;  %v1250_v27 = vld [vmem:[%s4147_s19 + $0x710] sm:$0xff] }
 0x29e   : > { %v988_v39 = vadd.f32 %v986_v37, %v980_v44  ;;  %v989_v55 = vadd.f32 %v986_v37, %v981_v13  ;;  %v990_v61 = vadd.f32 %v986_v37, %v982_v4  ;;  %v991_v10 = vadd.f32 %v986_v37, %v983_v14  ;;  %v1059_v4 = vld [vmem:[%s4147_s19 + $0x118] sm:$0xff]  ;;  %v1186_v37 = vld [vmem:[%s4147_s19 + $0x510] sm:$0xff] }
 0x29f   : > { %v1314_v44 = vunpack.c.l.s8.bf16 %v1042_v30  ;;  %v1331_v13 = vunpack.c.h.s8.bf16 %v1043_v32  ;;  %v1330_v14 = vunpack.c.h.s8.bf16 %v1042_v30  ;;  %v1347_v51 = vunpack.c.l.s8.bf16 %v1059_v4  ;;  %v1123_v32 = vld [vmem:[%s4147_s19 + $0x318] sm:$0xff]  ;;  %v1122_v30 = vld [vmem:[%s4147_s19 + $0x310] sm:$0xff] }
 0x2a0   : > { %v1006_v0 = vpop.permute.xlu1 %1005  ;;  %v992_v48 = vmul.f32 %v988_v39, %v960_v62  ;;  %v993_v57 = vmul.f32 %v989_v55, %v961_v25  ;;  %v994_v59 = vmul.f32 %v990_v61, %v962_v40  ;;  %v995_v34 = vmul.f32 %v991_v10, %v963_v18  ;;  %v1074_v61 = vld [vmem:[%s4147_s19 + $0x190] sm:$0xff]  ;;  %v1091_v18 = vld [vmem:[%s4147_s19 + $0x218] sm:$0xff] }
 0x2a1   : > { %v1008_v52 = vmul.f32 %v1006_v0, %v1000_v42  ;;  %v1009_v36 = vmul.f32 %v1006_v0, %v1001_v63  ;;  %v1010_v19 = vmul.f32 %v1006_v0, %v1002_v50  ;;  %v1011_v35 = vmul.f32 %v1006_v0, %v1003_v8  ;;  %v1202_v10 = vld [vmem:[%s4147_s19 + $0x590] sm:$0xff] }
 0x2a2   : > { %v1282_v63 = vunpack.c.l.s8.bf16 %v1026_v12  ;;  %v1538_v50 = vunpack.c.l.s8.bf16 %v1154_v3  ;;  %v1602_v22 = vunpack.c.l.s8.bf16 %v1186_v37  ;;  %v1363_v38 = vunpack.c.h.s8.bf16 %v1059_v4  ;;  %v1139_v4 = vld [vmem:[%s4147_s19 + $0x398] sm:$0xff] }
 0x2a3   : > { %v1619_v47 = vunpack.c.h.s8.bf16 %v1187_v49  ;;  %v1618_v60 = vunpack.c.h.s8.bf16 %v1186_v37  ;;  %v1379_v39 = vunpack.c.l.s8.bf16 %v1075_v53  ;;  %v1635_v55 = vunpack.c.l.s8.bf16 %v1203_v16  ;;  %v1267_v49 = vld [vmem:[%s4147_s19 + $0x798] sm:$0xff]  ;;  %v1266_v37 = vld [vmem:[%s4147_s19 + $0x790] sm:$0xff] }
 0x2a4   : > { %v1014_v7 = vpop.permute.xlu1 %1013  ;;  %v1378_v0 = vunpack.c.l.s8.bf16 %v1074_v61  ;;  %v1634_v62 = vunpack.c.l.s8.bf16 %v1202_v10  ;;  %v1395_v25 = vunpack.c.h.s8.bf16 %v1075_v53  ;;  %v1651_v40 = vunpack.c.h.s8.bf16 %v1203_v16  ;;  %v1029_v53 = vld [vmem:[%s4147_s19 + $0x28] sm:$0xff] }
 0x2a5   : > { %v1016_v20 = vadd.f32 %v1014_v7, %v1008_v52  ;;  %v1017_v5 = vadd.f32 %v1014_v7, %v1009_v36  ;;  %v1018_v9 = vadd.f32 %v1014_v7, %v1010_v19  ;;  %v1019_v2 = vadd.f32 %v1014_v7, %v1011_v35  ;;  %v1219_v52 = vld [vmem:[%s4147_s19 + $0x618] sm:$0xff]  ;;  %v1157_v16 = vld [vmem:[%s4147_s19 + $0x428] sm:$0xff] }
 0x2a6   : > { %v1394_v36 = vunpack.c.h.s8.bf16 %v1074_v61  ;;  %v1650_v19 = vunpack.c.h.s8.bf16 %v1202_v10  ;;  %v1411_v35 = vunpack.c.l.s8.bf16 %v1091_v18  ;;  %v1028_v61 = vld [vmem:[%s4147_s19 + $0x20] sm:$0xff] }
 0x2a7   : > { %v1020_v28 = vmul.f32 %v1016_v20, %v992_v48  ;;  %v1021_v21 = vmul.f32 %v1017_v5, %v993_v57  ;;  %v1022_v41 = vmul.f32 %v1018_v9, %v994_v59  ;;  %v1023_v42 = vmul.f32 %v1019_v2, %v995_v34  ;;  %v1090_v57 = vld [vmem:[%s4147_s19 + $0x210] sm:$0xff]  ;;  %v1107_v9 = vld [vmem:[%s4147_s19 + $0x298] sm:$0xff]  ;;  %v1156_v10 = vld [vmem:[%s4147_s19 + $0x420] sm:$0xff] }
 0x2a8   : > { %v1667_v48 = vunpack.c.l.s8.bf16 %v1219_v52  ;;  %v1218_v59 = vld [vmem:[%s4147_s19 + $0x610] sm:$0xff]  ;;  %v1410_v34 = vunpack.c.l.s8.bf16 %v1090_v57  ;;  %v1427_v20 = vunpack.c.h.s8.bf16 %v1091_v18  ;;  %v1683_v5 = vunpack.c.h.s8.bf16 %v1219_v52  ;;  %v1235_v2 = vld [vmem:[%s4147_s19 + $0x698] sm:$0xff]  ;;  %v1045_v18 = vld [vmem:[%s4147_s19 + $0xa8] sm:$0xff] }
 0x2a9   : > { %v4518_v8 = vpack.c.bf16 %v1020_v28, %v1020_v28  ;;  %v4520_v11 = vpack.c.bf16 %v1021_v21, %v1021_v21  ;;  %v4522_v43 = vpack.c.bf16 %v1022_v41, %v1022_v41  ;;  %v4524_v1 = vpack.c.bf16 %v1023_v42, %v1023_v42  ;;  %v1106_v41 = vld [vmem:[%s4147_s19 + $0x290] sm:$0xff]  ;;  %v1173_v52 = vld [vmem:[%s4147_s19 + $0x4a8] sm:$0xff] }
 0x2aa   : > { %v1666_v7 = vunpack.c.l.s8.bf16 %v1218_v59  ;;  %v1426_v12 = vunpack.c.h.s8.bf16 %v1090_v57  ;;  %v1682_v3 = vunpack.c.h.s8.bf16 %v1218_v59  ;;  %v1443_v28 = vunpack.c.l.s8.bf16 %v1107_v9  ;;  %v1234_v42 = vld [vmem:[%s4147_s19 + $0x690] sm:$0xff]  ;;  %v1172_v59 = vld [vmem:[%s4147_s19 + $0x4a0] sm:$0xff] }
 0x2ab   : > { %1844 = vmatprep.mubr.bf16.mxu0 %v4520_v11  ;;  %1885 = vmatprep.mubr.bf16.mxu1 %v4524_v1  ;;  %v1699_v21 = vunpack.c.l.s8.bf16 %v1235_v2  ;;  %v1573_v57 = vunpack.c.l.s8.bf16 %v1173_v52 }
 0x2ac   : > { %1845 = vmatmul.mubr.bf16.vlgmr.msra.gmra.mrb[0].mxu0 %v4518_v8  ;;  %1886 = vmatmul.mubr.bf16.vlgmr.msra.gmra.mrb[0].mxu1 %v4522_v43 }
 0x2ad   : > { %1895 = vmatpush1.bf16.msra.mxu0 %v1282_v63  ;;  %1936 = vmatpush1.bf16.msra.mxu1 %v1538_v50  ;;  %v1442_v63 = vunpack.c.l.s8.bf16 %v1106_v41  ;;  %v1698_v50 = vunpack.c.l.s8.bf16 %v1234_v42 }
 0x2ae   : > { %1926 = vmatprep.mubr.bf16.mxu0 %v4520_v11  ;;  %1967 = vmatprep.mubr.bf16.mxu1 %v4524_v1 }
 0x2af   : > { %1896 = vmatprep.subr.bf16.mxu0 %v1299_v33  ;;  %1937 = vmatprep.subr.bf16.mxu1 %v1555_v58  ;;  %v1459_v33 = vunpack.c.h.s8.bf16 %v1107_v9  ;;  %v1715_v58 = vunpack.c.h.s8.bf16 %v1235_v2  ;;  %v1061_v9 = vld [vmem:[%s4147_s19 + $0x128] sm:$0xff] }
 0x2b0   : > { %v1189_v2 = vld [vmem:[%s4147_s19 + $0x528] sm:$0xff] }
 0x2b1   : > { %1897 = vmatpush1.bf16.msra.mxu0 %v1298_v56  ;;  %1938 = vmatpush1.bf16.msra.mxu1 %v1554_v31  ;;  %v1458_v56 = vunpack.c.h.s8.bf16 %v1106_v41  ;;  %v1714_v31 = vunpack.c.h.s8.bf16 %v1234_v42  ;;  %v1605_v41 = vunpack.c.l.s8.bf16 %v1189_v2  ;;  %v1188_v42 = vld [vmem:[%s4147_s19 + $0x520] sm:$0xff] }
 0x2b2   : > { %1898 = vmatprep.subr.bf16.mxu0 %v1315_v24  ;;  %1939 = vmatprep.subr.bf16.mxu1 %v1571_v26  ;;  %v1475_v24 = vunpack.c.l.s8.bf16 %v1123_v32  ;;  %v1731_v26 = vunpack.c.l.s8.bf16 %v1251_v23 }
 0x2b5   : > { %1899 = vmatpush1.bf16.msra.mxu0 %v1314_v44  ;;  %1940 = vmatpush1.bf16.msra.mxu1 %v1570_v29  ;;  %v1474_v44 = vunpack.c.l.s8.bf16 %v1122_v30  ;;  %v1730_v29 = vunpack.c.l.s8.bf16 %v1250_v27 }
 0x2b6   : > { %1900 = vmatprep.subr.bf16.mxu0 %v1331_v13  ;;  %1941 = vmatprep.subr.bf16.mxu1 %v1587_v45  ;;  %v1491_v13 = vunpack.c.h.s8.bf16 %v1123_v32  ;;  %v1747_v45 = vunpack.c.h.s8.bf16 %v1251_v23  ;;  %v1077_v32 = vld [vmem:[%s4147_s19 + $0x1a8] sm:$0xff] }
 0x2b7   : > { %v1205_v23 = vld [vmem:[%s4147_s19 + $0x5a8] sm:$0xff] }
 0x2b9   : > { %1901 = vmatpush1.bf16.msra.mxu0 %v1330_v14  ;;  %1942 = vmatpush1.bf16.msra.mxu1 %v1586_v46  ;;  %v1490_v14 = vunpack.c.h.s8.bf16 %v1122_v30  ;;  %v1746_v46 = vunpack.c.h.s8.bf16 %v1250_v27  ;;  %v1637_v30 = vunpack.c.l.s8.bf16 %v1205_v23  ;;  %v1204_v27 = vld [vmem:[%s4147_s19 + $0x5a0] sm:$0xff] }
 0x2ba   : > { %1902 = vmatprep.subr.bf16.mxu0 %v1347_v51  ;;  %1943 = vmatprep.subr.bf16.mxu1 %v1603_v15  ;;  %v1507_v51 = vunpack.c.l.s8.bf16 %v1139_v4  ;;  %v1763_v15 = vunpack.c.l.s8.bf16 %v1267_v49 }
 0x2bd   : > { %1903 = vmatpush1.bf16.msra.mxu0 %v1346_v6  ;;  %1944 = vmatpush1.bf16.msra.mxu1 %v1602_v22  ;;  %v1506_v6 = vunpack.c.l.s8.bf16 %v1138_v17  ;;  %v1762_v22 = vunpack.c.l.s8.bf16 %v1266_v37 }
 0x2be   : > { %1904 = vmatprep.subr.bf16.mxu0 %v1363_v38  ;;  %1945 = vmatprep.subr.bf16.mxu1 %v1619_v47  ;;  %v1523_v38 = vunpack.c.h.s8.bf16 %v1139_v4  ;;  %v1779_v47 = vunpack.c.h.s8.bf16 %v1267_v49  ;;  %v1093_v4 = vld [vmem:[%s4147_s19 + $0x228] sm:$0xff] }
 0x2bf   : > { %v1221_v49 = vld [vmem:[%s4147_s19 + $0x628] sm:$0xff] }
 0x2c1   : > { %1905 = vmatpush1.bf16.msra.mxu0 %v1362_v54  ;;  %1946 = vmatpush1.bf16.msra.mxu1 %v1618_v60  ;;  %v1522_v54 = vunpack.c.h.s8.bf16 %v1138_v17  ;;  %v1778_v60 = vunpack.c.h.s8.bf16 %v1266_v37  ;;  %v1669_v17 = vunpack.c.l.s8.bf16 %v1221_v49  ;;  %v1220_v37 = vld [vmem:[%s4147_s19 + $0x620] sm:$0xff] }
 0x2c2   : > { %1906 = vmatprep.subr.bf16.mxu0 %v1379_v39  ;;  %1947 = vmatprep.subr.bf16.mxu1 %v1635_v55  ;;  %v1285_v39 = vunpack.c.l.s8.bf16 %v1029_v53  ;;  %v1541_v55 = vunpack.c.l.s8.bf16 %v1157_v16 }
 0x2c5   : > { %1907 = vmatpush1.bf16.msra.mxu0 %v1378_v0  ;;  %1948 = vmatpush1.bf16.msra.mxu1 %v1634_v62  ;;  %v1284_v0 = vunpack.c.l.s8.bf16 %v1028_v61  ;;  %v1540_v62 = vunpack.c.l.s8.bf16 %v1156_v10 }
 0x2c6   : > { %1908 = vmatprep.subr.bf16.mxu0 %v1395_v25  ;;  %1949 = vmatprep.subr.bf16.mxu1 %v1651_v40  ;;  %v1301_v25 = vunpack.c.h.s8.bf16 %v1029_v53  ;;  %v1557_v40 = vunpack.c.h.s8.bf16 %v1157_v16  ;;  %v1109_v53 = vld [vmem:[%s4147_s19 + $0x2a8] sm:$0xff] }
 0x2c7   : > { %v1237_v16 = vld [vmem:[%s4147_s19 + $0x6a8] sm:$0xff] }
 0x2c9   : > { %1909 = vmatpush1.bf16.msra.mxu0 %v1394_v36  ;;  %1950 = vmatpush1.bf16.msra.mxu1 %v1650_v19  ;;  %v1300_v36 = vunpack.c.h.s8.bf16 %v1028_v61  ;;  %v1556_v19 = vunpack.c.h.s8.bf16 %v1156_v10  ;;  %v1701_v61 = vunpack.c.l.s8.bf16 %v1237_v16  ;;  %v1236_v10 = vld [vmem:[%s4147_s19 + $0x6a0] sm:$0xff] }
 0x2ca   : > { %1910 = vmatprep.subr.bf16.mxu0 %v1411_v35  ;;  %1951 = vmatprep.subr.bf16.mxu1 %v1667_v48  ;;  %v1317_v35 = vunpack.c.l.s8.bf16 %v1045_v18  ;;  %v1044_v48 = vld [vmem:[%s4147_s19 + $0xa0] sm:$0xff] }
 0x2cd   : > { %1911 = vmatpush1.bf16.msra.mxu0 %v1410_v34  ;;  %1952 = vmatpush1.bf16.msra.mxu1 %v1666_v7  ;;  %v1316_v34 = vunpack.c.l.s8.bf16 %v1044_v48  ;;  %v1572_v7 = vunpack.c.l.s8.bf16 %v1172_v59 }
 0x2ce   : > { %1912 = vmatprep.subr.bf16.mxu0 %v1427_v20  ;;  %1953 = vmatprep.subr.bf16.mxu1 %v1683_v5  ;;  %v1333_v20 = vunpack.c.h.s8.bf16 %v1045_v18  ;;  %v1589_v5 = vunpack.c.h.s8.bf16 %v1173_v52  ;;  %v1125_v18 = vld [vmem:[%s4147_s19 + $0x328] sm:$0xff] }
 0x2cf   : > { %v1253_v52 = vld [vmem:[%s4147_s19 + $0x728] sm:$0xff] }
 0x2d1   : > { %1913 = vmatpush1.bf16.msra.mxu0 %v1426_v12  ;;  %1954 = vmatpush1.bf16.msra.mxu1 %v1682_v3  ;;  %v1332_v12 = vunpack.c.h.s8.bf16 %v1044_v48  ;;  %v1588_v3 = vunpack.c.h.s8.bf16 %v1172_v59  ;;  %v1124_v48 = vld [vmem:[%s4147_s19 + $0x320] sm:$0xff] }
 0x2d2   : > { %1914 = vmatprep.subr.bf16.mxu0 %v1443_v28  ;;  %1955 = vmatprep.subr.bf16.mxu1 %v1699_v21  ;;  %v1349_v28 = vunpack.c.l.s8.bf16 %v1061_v9  ;;  %v1060_v21 = vld [vmem:[%s4147_s19 + $0x120] sm:$0xff] }
 0x2d3   : > { %v1252_v59 = vld [vmem:[%s4147_s19 + $0x720] sm:$0xff] }
 0x2d5   : > { %1915 = vmatpush1.bf16.msra.mxu0 %v1442_v63  ;;  %1956 = vmatpush1.bf16.msra.mxu1 %v1698_v50  ;;  %v1348_v63 = vunpack.c.l.s8.bf16 %v1060_v21  ;;  %v1604_v50 = vunpack.c.l.s8.bf16 %v1188_v42 }
 0x2d6   : > { %1916 = vmatprep.subr.bf16.mxu0 %v1459_v33  ;;  %1957 = vmatprep.subr.bf16.mxu1 %v1715_v58  ;;  %v1365_v33 = vunpack.c.h.s8.bf16 %v1061_v9  ;;  %v1621_v58 = vunpack.c.h.s8.bf16 %v1189_v2  ;;  %v1141_v9 = vld [vmem:[%s4147_s19 + $0x3a8] sm:$0xff] }
 0x2d7   : > { %v1269_v2 = vld [vmem:[%s4147_s19 + $0x7a8] sm:$0xff] }
 0x2d9   : > { %1917 = vmatpush1.bf16.msra.mxu0 %v1458_v56  ;;  %1958 = vmatpush1.bf16.msra.mxu1 %v1714_v31  ;;  %v1364_v56 = vunpack.c.h.s8.bf16 %v1060_v21  ;;  %v1620_v31 = vunpack.c.h.s8.bf16 %v1188_v42  ;;  %v1140_v21 = vld [vmem:[%s4147_s19 + $0x3a0] sm:$0xff] }
 0x2da   : > { %1918 = vmatprep.subr.bf16.mxu0 %v1475_v24  ;;  %1959 = vmatprep.subr.bf16.mxu1 %v1731_v26  ;;  %v1381_v24 = vunpack.c.l.s8.bf16 %v1077_v32  ;;  %v1076_v26 = vld [vmem:[%s4147_s19 + $0x1a0] sm:$0xff] }
 0x2db   : > { %v1268_v42 = vld [vmem:[%s4147_s19 + $0x7a0] sm:$0xff] }
 0x2dd   : > { %1919 = vmatpush1.bf16.msra.mxu0 %v1474_v44  ;;  %1960 = vmatpush1.bf16.msra.mxu1 %v1730_v29  ;;  %v1380_v44 = vunpack.c.l.s8.bf16 %v1076_v26  ;;  %v1636_v29 = vunpack.c.l.s8.bf16 %v1204_v27 }
 0x2de   : > { %1920 = vmatprep.subr.bf16.mxu0 %v1491_v13  ;;  %1961 = vmatprep.subr.bf16.mxu1 %v1747_v45  ;;  %v1397_v13 = vunpack.c.h.s8.bf16 %v1077_v32  ;;  %v1653_v45 = vunpack.c.h.s8.bf16 %v1205_v23  ;;  %v1031_v32 = vld [vmem:[%s4147_s19 + $0x38] sm:$0xff] }
 0x2df   : > { %v1159_v23 = vld [vmem:[%s4147_s19 + $0x438] sm:$0xff] }
 0x2e1   : > { %1921 = vmatpush1.bf16.msra.mxu0 %v1490_v14  ;;  %1962 = vmatpush1.bf16.msra.mxu1 %v1746_v46  ;;  %v1396_v14 = vunpack.c.h.s8.bf16 %v1076_v26  ;;  %v1652_v46 = vunpack.c.h.s8.bf16 %v1204_v27  ;;  %v1030_v26 = vld [vmem:[%s4147_s19 + $0x30] sm:$0xff] }
 0x2e2   : > { %1922 = vmatprep.subr.bf16.mxu0 %v1507_v51  ;;  %1963 = vmatprep.subr.bf16.mxu1 %v1763_v15  ;;  %v1413_v51 = vunpack.c.l.s8.bf16 %v1093_v4  ;;  %v1092_v15 = vld [vmem:[%s4147_s19 + $0x220] sm:$0xff]  ;;  %v1158_v27 = vld [vmem:[%s4147_s19 + $0x430] sm:$0xff] }
 0x2e5   : > { %1923 = vmatpush1.bf16.msra.mxu0 %v1506_v6  ;;  %1964 = vmatpush1.bf16.msra.mxu1 %v1762_v22  ;;  %v1412_v6 = vunpack.c.l.s8.bf16 %v1092_v15  ;;  %v1668_v22 = vunpack.c.l.s8.bf16 %v1220_v37 }
 0x2e6   : > { %1924 = vmatprep.subr.bf16.mxu0 %v1523_v38  ;;  %1965 = vmatprep.subr.bf16.mxu1 %v1779_v47  ;;  %v1429_v38 = vunpack.c.h.s8.bf16 %v1093_v4  ;;  %v1685_v47 = vunpack.c.h.s8.bf16 %v1221_v49  ;;  %v1559_v4 = vunpack.c.h.s8.bf16 %v1159_v23  ;;  %v1175_v49 = vld [vmem:[%s4147_s19 + $0x4b8] sm:$0xff] }
 0x2e9   : > { %1925 = vmatpush1.bf16.msra.mxu0 %v1522_v54  ;;  %1966 = vmatpush1.bf16.msra.mxu1 %v1778_v60  ;;  %v1428_v54 = vunpack.c.h.s8.bf16 %v1092_v15  ;;  %v1684_v60 = vunpack.c.h.s8.bf16 %v1220_v37  ;;  %v1046_v15 = vld [vmem:[%s4147_s19 + $0xb0] sm:$0xff] }
 0x2ea   : > { %1976 = vmatprep.subr.bf16.mxu0 %v1285_v39  ;;  %2017 = vmatprep.subr.bf16.mxu1 %v1541_v55  ;;  %v1445_v39 = vunpack.c.l.s8.bf16 %v1109_v53  ;;  %v1108_v55 = vld [vmem:[%s4147_s19 + $0x2a0] sm:$0xff]  ;;  %v1174_v37 = vld [vmem:[%s4147_s19 + $0x4b0] sm:$0xff] }
 0x2ec   : > { %1927 = vmatmul.mubr.bf16.vlgmr.msra.gmra.mrb[4].mxu0 %v4518_v8  ;;  %1968 = vmatmul.mubr.bf16.vlgmr.msra.gmra.mrb[4].mxu1 %v4522_v43 }
 0x2ed   : > { %1977 = vmatpush1.bf16.msra.mxu0 %v1284_v0  ;;  %2008 = vmatprep.mubr.bf16.mxu0 %v4520_v11  ;;  %v1444_v0 = vunpack.c.l.s8.bf16 %v1108_v55 }
 0x2ee   : > { %2018 = vmatpush1.bf16.msra.mxu1 %v1540_v62  ;;  %2049 = vmatprep.mubr.bf16.mxu1 %v4524_v1  ;;  %v1700_v62 = vunpack.c.l.s8.bf16 %v1236_v10 }
 0x2ef   : > { %1978 = vmatprep.subr.bf16.mxu0 %v1301_v25  ;;  %2019 = vmatprep.subr.bf16.mxu1 %v1557_v40  ;;  %v1461_v25 = vunpack.c.h.s8.bf16 %v1109_v53  ;;  %v1717_v40 = vunpack.c.h.s8.bf16 %v1237_v16  ;;  %v1063_v53 = vld [vmem:[%s4147_s19 + $0x138] sm:$0xff] }
 0x2f0   : > { %v1191_v16 = vld [vmem:[%s4147_s19 + $0x538] sm:$0xff] }
 0x2f1   : > { %1979 = vmatpush1.bf16.msra.mxu0 %v1300_v36  ;;  %v1460_v36 = vunpack.c.h.s8.bf16 %v1108_v55  ;;  %v1062_v55 = vld [vmem:[%s4147_s19 + $0x130] sm:$0xff] }
 0x2f2   : > { %2020 = vmatpush1.bf16.msra.mxu1 %v1556_v19  ;;  %1980 = vmatprep.subr.bf16.mxu0 %v1317_v35  ;;  %v1716_v19 = vunpack.c.h.s8.bf16 %v1236_v10  ;;  %v1477_v35 = vunpack.c.l.s8.bf16 %v1125_v18  ;;  %v1190_v10 = vld [vmem:[%s4147_s19 + $0x530] sm:$0xff] }
 0x2f3   : > { %2021 = vmatprep.subr.bf16.mxu1 %v1573_v57  ;;  %v1733_v57 = vunpack.c.l.s8.bf16 %v1253_v52 }
 0x2f5   : > { %1981 = vmatpush1.bf16.msra.mxu0 %v1316_v34  ;;  %v1476_v34 = vunpack.c.l.s8.bf16 %v1124_v48 }
 0x2f6   : > { %2022 = vmatpush1.bf16.msra.mxu1 %v1572_v7  ;;  %1982 = vmatprep.subr.bf16.mxu0 %v1333_v20  ;;  %v1732_v7 = vunpack.c.l.s8.bf16 %v1252_v59  ;;  %v1493_v20 = vunpack.c.h.s8.bf16 %v1125_v18  ;;  %v1079_v18 = vld [vmem:[%s4147_s19 + $0x1b8] sm:$0xff] }
 0x2f7   : > { %2023 = vmatprep.subr.bf16.mxu1 %v1589_v5  ;;  %v1749_v5 = vunpack.c.h.s8.bf16 %v1253_v52  ;;  %v1207_v52 = vld [vmem:[%s4147_s19 + $0x5b8] sm:$0xff] }
 0x2f9   : > { %1983 = vmatpush1.bf16.msra.mxu0 %v1332_v12  ;;  %v1492_v12 = vunpack.c.h.s8.bf16 %v1124_v48  ;;  %v1078_v48 = vld [vmem:[%s4147_s19 + $0x1b0] sm:$0xff] }
 0x2fa   : > { %2024 = vmatpush1.bf16.msra.mxu1 %v1588_v3  ;;  %1984 = vmatprep.subr.bf16.mxu0 %v1349_v28  ;;  %v1748_v3 = vunpack.c.h.s8.bf16 %v1252_v59  ;;  %v1509_v28 = vunpack.c.l.s8.bf16 %v1141_v9  ;;  %v1206_v59 = vld [vmem:[%s4147_s19 + $0x5b0] sm:$0xff] }
 0x2fb   : > { %2025 = vmatprep.subr.bf16.mxu1 %v1605_v41  ;;  %v1765_v41 = vunpack.c.l.s8.bf16 %v1269_v2 }
 0x2fd   : > { %1985 = vmatpush1.bf16.msra.mxu0 %v1348_v63  ;;  %v1508_v63 = vunpack.c.l.s8.bf16 %v1140_v21 }
 0x2fe   : > { %2026 = vmatpush1.bf16.msra.mxu1 %v1604_v50  ;;  %1986 = vmatprep.subr.bf16.mxu0 %v1365_v33  ;;  %v1764_v50 = vunpack.c.l.s8.bf16 %v1268_v42  ;;  %v1525_v33 = vunpack.c.h.s8.bf16 %v1141_v9  ;;  %v1095_v9 = vld [vmem:[%s4147_s19 + $0x238] sm:$0xff] }
 0x2ff   : > { %2027 = vmatprep.subr.bf16.mxu1 %v1621_v58  ;;  %v1781_v58 = vunpack.c.h.s8.bf16 %v1269_v2  ;;  %v1223_v2 = vld [vmem:[%s4147_s19 + $0x638] sm:$0xff] }
 0x301   : > { %1987 = vmatpush1.bf16.msra.mxu0 %v1364_v56  ;;  %v1524_v56 = vunpack.c.h.s8.bf16 %v1140_v21  ;;  %v1094_v21 = vld [vmem:[%s4147_s19 + $0x230] sm:$0xff] }
 0x302   : > { %2028 = vmatpush1.bf16.msra.mxu1 %v1620_v31  ;;  %1988 = vmatprep.subr.bf16.mxu0 %v1381_v24  ;;  %v1780_v31 = vunpack.c.h.s8.bf16 %v1268_v42  ;;  %v1287_v24 = vunpack.c.l.s8.bf16 %v1031_v32  ;;  %v1222_v42 = vld [vmem:[%s4147_s19 + $0x630] sm:$0xff] }
 0x303   : > { %2029 = vmatprep.subr.bf16.mxu1 %v1637_v30  ;;  %v1543_v30 = vunpack.c.l.s8.bf16 %v1159_v23  ;;  %v1239_v23 = vld [vmem:[%s4147_s19 + $0x6b8] sm:$0xff] }
 0x305   : > { %1989 = vmatpush1.bf16.msra.mxu0 %v1380_v44  ;;  %v1286_v44 = vunpack.c.l.s8.bf16 %v1030_v26 }
 0x306   : > { %2030 = vmatpush1.bf16.msra.mxu1 %v1636_v29  ;;  %1990 = vmatprep.subr.bf16.mxu0 %v1397_v13  ;;  %v1542_v29 = vunpack.c.l.s8.bf16 %v1158_v27  ;;  %v1303_v13 = vunpack.c.h.s8.bf16 %v1031_v32  ;;  %v1111_v32 = vld [vmem:[%s4147_s19 + $0x2b8] sm:$0xff] }
 0x307   : > { %2031 = vmatprep.subr.bf16.mxu1 %v1653_v45  ;;  %v1047_v45 = vld [vmem:[%s4147_s19 + $0xb8] sm:$0xff] }
 0x309   : > { %1991 = vmatpush1.bf16.msra.mxu0 %v1396_v14  ;;  %v1302_v14 = vunpack.c.h.s8.bf16 %v1030_v26  ;;  %v1110_v26 = vld [vmem:[%s4147_s19 + $0x2b0] sm:$0xff] }
 0x30a   : > { %2032 = vmatpush1.bf16.msra.mxu1 %v1652_v46  ;;  %1992 = vmatprep.subr.bf16.mxu0 %v1413_v51  ;;  %v1558_v46 = vunpack.c.h.s8.bf16 %v1158_v27  ;;  %v1319_v51 = vunpack.c.l.s8.bf16 %v1047_v45  ;;  %v1238_v27 = vld [vmem:[%s4147_s19 + $0x6b0] sm:$0xff] }
 0x30b   : > { %2033 = vmatprep.subr.bf16.mxu1 %v1669_v17  ;;  %v1575_v17 = vunpack.c.l.s8.bf16 %v1175_v49 }
 0x30d   : > { %1993 = vmatpush1.bf16.msra.mxu0 %v1412_v6  ;;  %v1318_v6 = vunpack.c.l.s8.bf16 %v1046_v15 }
 0x30e   : > { %2034 = vmatpush1.bf16.msra.mxu1 %v1668_v22  ;;  %1994 = vmatprep.subr.bf16.mxu0 %v1429_v38  ;;  %v1574_v22 = vunpack.c.l.s8.bf16 %v1174_v37  ;;  %v1335_v38 = vunpack.c.h.s8.bf16 %v1047_v45  ;;  %v1719_v45 = vunpack.c.h.s8.bf16 %v1239_v23 }
 0x30f   : > { %2035 = vmatprep.subr.bf16.mxu1 %v1685_v47  ;;  %v1591_v47 = vunpack.c.h.s8.bf16 %v1175_v49  ;;  %v1255_v49 = vld [vmem:[%s4147_s19 + $0x738] sm:$0xff] }
 0x311   : > { %1995 = vmatpush1.bf16.msra.mxu0 %v1428_v54  ;;  %v1334_v54 = vunpack.c.h.s8.bf16 %v1046_v15  ;;  %v1126_v15 = vld [vmem:[%s4147_s19 + $0x330] sm:$0xff] }
 0x312   : > { %2036 = vmatpush1.bf16.msra.mxu1 %v1684_v60  ;;  %1996 = vmatprep.subr.bf16.mxu0 %v1445_v39  ;;  %v1590_v60 = vunpack.c.h.s8.bf16 %v1174_v37  ;;  %v1351_v39 = vunpack.c.l.s8.bf16 %v1063_v53  ;;  %v1254_v37 = vld [vmem:[%s4147_s19 + $0x730] sm:$0xff] }
 0x313   : > { %2037 = vmatprep.subr.bf16.mxu1 %v1701_v61  ;;  %v1607_v61 = vunpack.c.l.s8.bf16 %v1191_v16 }
 0x315   : > { %1997 = vmatpush1.bf16.msra.mxu0 %v1444_v0  ;;  %v1350_v0 = vunpack.c.l.s8.bf16 %v1062_v55 }
 0x316   : > { %2038 = vmatpush1.bf16.msra.mxu1 %v1700_v62  ;;  %1998 = vmatprep.subr.bf16.mxu0 %v1461_v25  ;;  %v1606_v62 = vunpack.c.l.s8.bf16 %v1190_v10  ;;  %v1367_v25 = vunpack.c.h.s8.bf16 %v1063_v53  ;;  %v1143_v53 = vld [vmem:[%s4147_s19 + $0x3b8] sm:$0xff] }
 0x317   : > { %2039 = vmatprep.subr.bf16.mxu1 %v1717_v40  ;;  %v1623_v40 = vunpack.c.h.s8.bf16 %v1191_v16  ;;  %v1271_v16 = vld [vmem:[%s4147_s19 + $0x7b8] sm:$0xff] }
 0x319   : > { %1999 = vmatpush1.bf16.msra.mxu0 %v1460_v36  ;;  %v1366_v36 = vunpack.c.h.s8.bf16 %v1062_v55  ;;  %v1142_v55 = vld [vmem:[%s4147_s19 + $0x3b0] sm:$0xff] }
 0x31a   : > { %2040 = vmatpush1.bf16.msra.mxu1 %v1716_v19  ;;  %2000 = vmatprep.subr.bf16.mxu0 %v1477_v35  ;;  %v1622_v19 = vunpack.c.h.s8.bf16 %v1190_v10  ;;  %v1383_v35 = vunpack.c.l.s8.bf16 %v1079_v18  ;;  %v1270_v10 = vld [vmem:[%s4147_s19 + $0x7b0] sm:$0xff] }
 0x31b   : > { %2041 = vmatprep.subr.bf16.mxu1 %v1733_v57  ;;  %v1639_v57 = vunpack.c.l.s8.bf16 %v1207_v52 }
 0x31d   : > { %2001 = vmatpush1.bf16.msra.mxu0 %v1476_v34  ;;  %v1382_v34 = vunpack.c.l.s8.bf16 %v1078_v48 }
 0x31e   : > { %2042 = vmatpush1.bf16.msra.mxu1 %v1732_v7  ;;  %2002 = vmatprep.subr.bf16.mxu0 %v1493_v20  ;;  %v1638_v7 = vunpack.c.l.s8.bf16 %v1206_v59  ;;  %v1399_v20 = vunpack.c.h.s8.bf16 %v1079_v18  ;;  %v1033_v18 = vld [vmem:[%s4147_s19 + $0x48] sm:$0xff] }
 0x31f   : > { %2043 = vmatprep.subr.bf16.mxu1 %v1749_v5  ;;  %v1655_v5 = vunpack.c.h.s8.bf16 %v1207_v52  ;;  %v1161_v52 = vld [vmem:[%s4147_s19 + $0x448] sm:$0xff] }
 0x321   : > { %2003 = vmatpush1.bf16.msra.mxu0 %v1492_v12  ;;  %v1398_v12 = vunpack.c.h.s8.bf16 %v1078_v48  ;;  %v1032_v48 = vld [vmem:[%s4147_s19 + $0x40] sm:$0xff] }
 0x322   : > { %2044 = vmatpush1.bf16.msra.mxu1 %v1748_v3  ;;  %2004 = vmatprep.subr.bf16.mxu0 %v1509_v28  ;;  %v1654_v3 = vunpack.c.h.s8.bf16 %v1206_v59  ;;  %v1415_v28 = vunpack.c.l.s8.bf16 %v1095_v9  ;;  %v1160_v59 = vld [vmem:[%s4147_s19 + $0x440] sm:$0xff] }
 0x323   : > { %2045 = vmatprep.subr.bf16.mxu1 %v1765_v41  ;;  %v1671_v41 = vunpack.c.l.s8.bf16 %v1223_v2 }
 0x325   : > { %2005 = vmatpush1.bf16.msra.mxu0 %v1508_v63  ;;  %v1414_v63 = vunpack.c.l.s8.bf16 %v1094_v21 }
 0x326   : > { %2046 = vmatpush1.bf16.msra.mxu1 %v1764_v50  ;;  %2006 = vmatprep.subr.bf16.mxu0 %v1525_v33  ;;  %v1670_v50 = vunpack.c.l.s8.bf16 %v1222_v42  ;;  %v1431_v33 = vunpack.c.h.s8.bf16 %v1095_v9  ;;  %v1561_v9 = vunpack.c.h.s8.bf16 %v1161_v52 }
 0x327   : > { %2047 = vmatprep.subr.bf16.mxu1 %v1781_v58  ;;  %v1687_v58 = vunpack.c.h.s8.bf16 %v1223_v2  ;;  %v1177_v2 = vld [vmem:[%s4147_s19 + $0x4c8] sm:$0xff] }
 0x329   : > { %2007 = vmatpush1.bf16.msra.mxu0 %v1524_v56  ;;  %v1430_v56 = vunpack.c.h.s8.bf16 %v1094_v21  ;;  %v1048_v21 = vld [vmem:[%s4147_s19 + $0xc0] sm:$0xff] }
 0x32a   : > { %2048 = vmatpush1.bf16.msra.mxu1 %v1780_v31  ;;  %2058 = vmatprep.subr.bf16.mxu0 %v1287_v24  ;;  %v1686_v31 = vunpack.c.h.s8.bf16 %v1222_v42  ;;  %v1447_v24 = vunpack.c.l.s8.bf16 %v1111_v32  ;;  %v1176_v42 = vld [vmem:[%s4147_s19 + $0x4c0] sm:$0xff] }
 0x32b   : > { %2099 = vmatprep.subr.bf16.mxu1 %v1543_v30  ;;  %v1703_v30 = vunpack.c.l.s8.bf16 %v1239_v23  ;;  %v1193_v23 = vld [vmem:[%s4147_s19 + $0x548] sm:$0xff] }
 0x32c   : > { %2009 = vmatmul.mubr.bf16.vlgmr.msra.gmra.mrb[8].mxu0 %v4518_v8 }
 0x32d   : > { %2050 = vmatmul.mubr.bf16.vlgmr.msra.gmra.mrb[8].mxu1 %v4522_v43  ;;  %2059 = vmatpush1.bf16.msra.mxu0 %v1286_v44  ;;  %v1446_v44 = vunpack.c.l.s8.bf16 %v1110_v26 }
 0x32e   : > { %2090 = vmatprep.mubr.bf16.mxu0 %v4520_v11  ;;  %2100 = vmatpush1.bf16.msra.mxu1 %v1542_v29  ;;  %v1702_v29 = vunpack.c.l.s8.bf16 %v1238_v27 }
 0x32f   : > { %2131 = vmatprep.mubr.bf16.mxu1 %v4524_v1  ;;  %2060 = vmatprep.subr.bf16.mxu0 %v1303_v13  ;;  %v1463_v13 = vunpack.c.h.s8.bf16 %v1111_v32  ;;  %v1065_v32 = vld [vmem:[%s4147_s19 + $0x148] sm:$0xff] }
 0x330   : > { %2101 = vmatprep.subr.bf16.mxu1 %v1559_v4  ;;  %v1127_v4 = vld [vmem:[%s4147_s19 + $0x338] sm:$0xff] }
 0x331   : > { %2061 = vmatpush1.bf16.msra.mxu0 %v1302_v14  ;;  %v1462_v14 = vunpack.c.h.s8.bf16 %v1110_v26  ;;  %v1064_v26 = vld [vmem:[%s4147_s19 + $0x140] sm:$0xff] }
 0x332   : > { %2102 = vmatpush1.bf16.msra.mxu1 %v1558_v46  ;;  %2062 = vmatprep.subr.bf16.mxu0 %v1319_v51  ;;  %v1718_v46 = vunpack.c.h.s8.bf16 %v1238_v27  ;;  %v1479_v51 = vunpack.c.l.s8.bf16 %v1127_v4  ;;  %v1192_v27 = vld [vmem:[%s4147_s19 + $0x540] sm:$0xff] }
 0x333   : > { %2103 = vmatprep.subr.bf16.mxu1 %v1575_v17  ;;  %v1735_v17 = vunpack.c.l.s8.bf16 %v1255_v49 }
 0x335   : > { %2063 = vmatpush1.bf16.msra.mxu0 %v1318_v6  ;;  %v1478_v6 = vunpack.c.l.s8.bf16 %v1126_v15 }
 0x336   : > { %2104 = vmatpush1.bf16.msra.mxu1 %v1574_v22  ;;  %2064 = vmatprep.subr.bf16.mxu0 %v1335_v38  ;;  %v1734_v22 = vunpack.c.l.s8.bf16 %v1254_v37  ;;  %v1495_v38 = vunpack.c.h.s8.bf16 %v1127_v4  ;;  %v1081_v4 = vld [vmem:[%s4147_s19 + $0x1c8] sm:$0xff] }
 0x337   : > { %2105 = vmatprep.subr.bf16.mxu1 %v1591_v47  ;;  %v1751_v47 = vunpack.c.h.s8.bf16 %v1255_v49  ;;  %v1209_v49 = vld [vmem:[%s4147_s19 + $0x5c8] sm:$0xff] }
 0x339   : > { %2065 = vmatpush1.bf16.msra.mxu0 %v1334_v54  ;;  %v1494_v54 = vunpack.c.h.s8.bf16 %v1126_v15  ;;  %v1080_v15 = vld [vmem:[%s4147_s19 + $0x1c0] sm:$0xff] }
 0x33a   : > { %2106 = vmatpush1.bf16.msra.mxu1 %v1590_v60  ;;  %2066 = vmatprep.subr.bf16.mxu0 %v1351_v39  ;;  %v1750_v60 = vunpack.c.h.s8.bf16 %v1254_v37  ;;  %v1511_v39 = vunpack.c.l.s8.bf16 %v1143_v53  ;;  %v1792_v37 = vld [vmem:[#allocation2] sm:$0xff] }
 0x33b   : > { %2107 = vmatprep.subr.bf16.mxu1 %v1607_v61  ;;  %v1767_v61 = vunpack.c.l.s8.bf16 %v1271_v16 }
 0x33d   : > { %2067 = vmatpush1.bf16.msra.mxu0 %v1350_v0  ;;  %v1510_v0 = vunpack.c.l.s8.bf16 %v1142_v55 }
 0x33e   : > { %2108 = vmatpush1.bf16.msra.mxu1 %v1606_v62  ;;  %2068 = vmatprep.subr.bf16.mxu0 %v1367_v25  ;;  %v1766_v62 = vunpack.c.l.s8.bf16 %v1270_v10  ;;  %v1527_v25 = vunpack.c.h.s8.bf16 %v1143_v53 }
 0x33f   : > { %2109 = vmatprep.subr.bf16.mxu1 %v1623_v40  ;;  %v1783_v40 = vunpack.c.h.s8.bf16 %v1271_v16  ;;  %v1793_v16 = vld [vmem:[#allocation2 + $0x8] sm:$0xff] }
 0x341   : > { %2069 = vmatpush1.bf16.msra.mxu0 %v1366_v36  ;;  %v1526_v36 = vunpack.c.h.s8.bf16 %v1142_v55 }
 0x342   : > { %2110 = vmatpush1.bf16.msra.mxu1 %v1622_v19  ;;  %2070 = vmatprep.subr.bf16.mxu0 %v1383_v35  ;;  %v1782_v19 = vunpack.c.h.s8.bf16 %v1270_v10  ;;  %v1289_v35 = vunpack.c.l.s8.bf16 %v1033_v18 }
 0x343   : > { %2111 = vmatprep.subr.bf16.mxu1 %v1639_v57  ;;  %v1545_v57 = vunpack.c.l.s8.bf16 %v1161_v52  ;;  %v1657_v52 = vunpack.c.h.s8.bf16 %v1209_v49 }
 0x345   : > { %2071 = vmatpush1.bf16.msra.mxu0 %v1382_v34  ;;  %v1288_v34 = vunpack.c.l.s8.bf16 %v1032_v48 }
 0x346   : > { %2112 = vmatpush1.bf16.msra.mxu1 %v1638_v7  ;;  %2072 = vmatprep.subr.bf16.mxu0 %v1399_v20  ;;  %v1544_v7 = vunpack.c.l.s8.bf16 %v1160_v59  ;;  %v1305_v20 = vunpack.c.h.s8.bf16 %v1033_v18 }
 0x347   : > { %2113 = vmatprep.subr.bf16.mxu1 %v1655_v5  ;;  %v1049_v5 = vld [vmem:[%s4147_s19 + $0xc8] sm:$0xff] }
 0x349   : > { %2073 = vmatpush1.bf16.msra.mxu0 %v1398_v12  ;;  %v1304_v12 = vunpack.c.h.s8.bf16 %v1032_v48 }
 0x34a   : > { %2114 = vmatpush1.bf16.msra.mxu1 %v1654_v3  ;;  %2074 = vmatprep.subr.bf16.mxu0 %v1415_v28  ;;  %v1560_v3 = vunpack.c.h.s8.bf16 %v1160_v59  ;;  %v1321_v28 = vunpack.c.l.s8.bf16 %v1049_v5  ;;  %v1096_v59 = vld [vmem:[%s4147_s19 + $0x240] sm:$0xff] }
 0x34b   : > { %2115 = vmatprep.subr.bf16.mxu1 %v1671_v41  ;;  %v1577_v41 = vunpack.c.l.s8.bf16 %v1177_v2 }
 0x34d   : > { %2075 = vmatpush1.bf16.msra.mxu0 %v1414_v63  ;;  %v1320_v63 = vunpack.c.l.s8.bf16 %v1048_v21 }
 0x34e   : > { %2116 = vmatpush1.bf16.msra.mxu1 %v1670_v50  ;;  %2076 = vmatprep.subr.bf16.mxu0 %v1431_v33  ;;  %v1576_v50 = vunpack.c.l.s8.bf16 %v1176_v42  ;;  %v1337_v33 = vunpack.c.h.s8.bf16 %v1049_v5 }
 0x34f   : > { %2117 = vmatprep.subr.bf16.mxu1 %v1687_v58  ;;  %v1593_v58 = vunpack.c.h.s8.bf16 %v1177_v2 }
 0x351   : > { %2077 = vmatpush1.bf16.msra.mxu0 %v1430_v56  ;;  %v1336_v56 = vunpack.c.h.s8.bf16 %v1048_v21 }
 0x352   : > { %2118 = vmatpush1.bf16.msra.mxu1 %v1686_v31  ;;  %2078 = vmatprep.subr.bf16.mxu0 %v1447_v24  ;;  %v1592_v31 = vunpack.c.h.s8.bf16 %v1176_v42  ;;  %v1353_v24 = vunpack.c.l.s8.bf16 %v1065_v32  ;;  %v1112_v42 = vld [vmem:[%s4147_s19 + $0x2c0] sm:$0xff] }
 0x353   : > { %2119 = vmatprep.subr.bf16.mxu1 %v1703_v30  ;;  %v1609_v30 = vunpack.c.l.s8.bf16 %v1193_v23 }
 0x355   : > { %2079 = vmatpush1.bf16.msra.mxu0 %v1446_v44  ;;  %v1352_v44 = vunpack.c.l.s8.bf16 %v1064_v26 }
 0x356   : > { %2120 = vmatpush1.bf16.msra.mxu1 %v1702_v29  ;;  %2080 = vmatprep.subr.bf16.mxu0 %v1463_v13  ;;  %v1608_v29 = vunpack.c.l.s8.bf16 %v1192_v27  ;;  %v1369_v13 = vunpack.c.h.s8.bf16 %v1065_v32 }
 0x357   : > { %2121 = vmatprep.subr.bf16.mxu1 %v1719_v45  ;;  %v1625_v45 = vunpack.c.h.s8.bf16 %v1193_v23 }
 0x359   : > { %2081 = vmatpush1.bf16.msra.mxu0 %v1462_v14  ;;  %v1368_v14 = vunpack.c.h.s8.bf16 %v1064_v26 }
 0x35a   : > { %2122 = vmatpush1.bf16.msra.mxu1 %v1718_v46  ;;  %2082 = vmatprep.subr.bf16.mxu0 %v1479_v51  ;;  %v1624_v46 = vunpack.c.h.s8.bf16 %v1192_v27  ;;  %v1385_v51 = vunpack.c.l.s8.bf16 %v1081_v4  ;;  %v1128_v27 = vld [vmem:[%s4147_s19 + $0x340] sm:$0xff] }
 0x35b   : > { %2123 = vmatprep.subr.bf16.mxu1 %v1735_v17 }
 0x35d   : > { %2083 = vmatpush1.bf16.msra.mxu0 %v1478_v6 }
 0x35e   : > { %2124 = vmatpush1.bf16.msra.mxu1 %v1734_v22  ;;  %2084 = vmatprep.subr.bf16.mxu0 %v1495_v38  ;;  %v1641_v22 = vunpack.c.l.s8.bf16 %v1209_v49  ;;  %v1208_v38 = vld [vmem:[%s4147_s19 + $0x5c0] sm:$0xff] }
 0x35f   : > { %2125 = vmatprep.subr.bf16.mxu1 %v1751_v47  ;;  %v1656_v48 = vunpack.c.h.s8.bf16 %v1208_v38 }
 0x361   : > { %2085 = vmatpush1.bf16.msra.mxu0 %v1494_v54 }
 0x362   : > { %2126 = vmatpush1.bf16.msra.mxu1 %v1750_v60  ;;  %2086 = vmatprep.subr.bf16.mxu0 %v1511_v39 }
 0x363   : > { %2127 = vmatprep.subr.bf16.mxu1 %v1767_v61  ;;  %v1384_v61 = vunpack.c.l.s8.bf16 %v1080_v15 }
 0x365   : > { %2087 = vmatpush1.bf16.msra.mxu0 %v1510_v0 }
 0x366   : > { %2128 = vmatpush1.bf16.msra.mxu1 %v1766_v62  ;;  %2088 = vmatprep.subr.bf16.mxu0 %v1527_v25  ;;  %v1640_v25 = vunpack.c.l.s8.bf16 %v1208_v38 }
 0x367   : > { %2129 = vmatprep.subr.bf16.mxu1 %v1783_v40  ;;  %v1401_v40 = vunpack.c.h.s8.bf16 %v1081_v4 }
 0x369   : > { %2089 = vmatpush1.bf16.msra.mxu0 %v1526_v36  ;;  %v1097_v36 = vld [vmem:[%s4147_s19 + $0x248] sm:$0xff] }
 0x36a   : > { %2130 = vmatpush1.bf16.msra.mxu1 %v1782_v19  ;;  %2140 = vmatprep.subr.bf16.mxu0 %v1289_v35  ;;  %v1225_v19 = vld [vmem:[%s4147_s19 + $0x648] sm:$0xff]  ;;  %v1400_v35 = vunpack.c.h.s8.bf16 %v1080_v15 }
 0x36b   : > { %2181 = vmatprep.subr.bf16.mxu1 %v1545_v57  ;;  %v1417_v57 = vunpack.c.l.s8.bf16 %v1097_v36  ;;  %v1689_v2 = vunpack.c.h.s8.bf16 %v1225_v19 }
 0x36c   : > { %2091 = vmatmul.mubr.bf16.vlgmr.msra.gmra.mrb[12].mxu0 %v4518_v8 }
 0x36d   : > { %2132 = vmatmul.mubr.bf16.vlgmr.msra.gmra.mrb[12].mxu1 %v4522_v43  ;;  %2141 = vmatpush1.bf16.msra.mxu0 %v1288_v34  ;;  %v1673_v34 = vunpack.c.l.s8.bf16 %v1225_v19  ;;  %v1179_v19 = vld [vmem:[%s4147_s19 + $0x4d8] sm:$0xff] }
 0x36e   : > { %2172 = vmatprep.mubr.bf16.mxu0 %v4520_v11  ;;  %2182 = vmatpush1.bf16.msra.mxu1 %v1544_v7  ;;  %v1224_v7 = vld [vmem:[%s4147_s19 + $0x640] sm:$0xff] }
 0x36f   : > { %2213 = vmatprep.mubr.bf16.mxu1 %v4524_v1  ;;  %2142 = vmatprep.subr.bf16.mxu0 %v1305_v20  ;;  %v1416_v20 = vunpack.c.l.s8.bf16 %v1096_v59  ;;  %v1672_v5 = vunpack.c.l.s8.bf16 %v1224_v7  ;;  %v1688_v21 = vunpack.c.h.s8.bf16 %v1224_v7  ;;  %v1178_v7 = vld [vmem:[%s4147_s19 + $0x4d0] sm:$0xff] }
 0x370   : > { %2183 = vmatprep.subr.bf16.mxu1 %v1561_v9  ;;  %v1433_v9 = vunpack.c.h.s8.bf16 %v1097_v36 }
 0x371   : > { %2143 = vmatpush1.bf16.msra.mxu0 %v1304_v12  ;;  %v1113_v12 = vld [vmem:[%s4147_s19 + $0x2c8] sm:$0xff] }
 0x372   : > { %2184 = vmatpush1.bf16.msra.mxu1 %v1560_v3  ;;  %2144 = vmatprep.subr.bf16.mxu0 %v1321_v28  ;;  %v1241_v3 = vld [vmem:[%s4147_s19 + $0x6c8] sm:$0xff]  ;;  %v1432_v28 = vunpack.c.h.s8.bf16 %v1096_v59  ;;  %v1465_v32 = vunpack.c.h.s8.bf16 %v1113_v12  ;;  %v1050_v59 = vld [vmem:[%s4147_s19 + $0xd0] sm:$0xff] }
 0x373   : > { %2185 = vmatprep.subr.bf16.mxu1 %v1577_v41  ;;  %v1449_v41 = vunpack.c.l.s8.bf16 %v1113_v12  ;;  %v1721_v23 = vunpack.c.h.s8.bf16 %v1241_v3  ;;  %v1067_v12 = vld [vmem:[%s4147_s19 + $0x158] sm:$0xff] }
 0x375   : > { %2145 = vmatpush1.bf16.msra.mxu0 %v1320_v63  ;;  %v1705_v63 = vunpack.c.l.s8.bf16 %v1241_v3  ;;  %v1195_v3 = vld [vmem:[%s4147_s19 + $0x558] sm:$0xff] }
 0x376   : > { %2186 = vmatpush1.bf16.msra.mxu1 %v1576_v50  ;;  %2146 = vmatprep.subr.bf16.mxu0 %v1337_v33  ;;  %v1240_v50 = vld [vmem:[%s4147_s19 + $0x6c0] sm:$0xff]  ;;  %v1448_v33 = vunpack.c.l.s8.bf16 %v1112_v42 }
 0x377   : > { %2187 = vmatprep.subr.bf16.mxu1 %v1593_v58  ;;  %v1704_v58 = vunpack.c.l.s8.bf16 %v1240_v50  ;;  %v1720_v26 = vunpack.c.h.s8.bf16 %v1240_v50  ;;  %v1194_v50 = vld [vmem:[%s4147_s19 + $0x550] sm:$0xff] }
 0x379   : > { %2147 = vmatpush1.bf16.msra.mxu0 %v1336_v56  ;;  %v1129_v56 = vld [vmem:[%s4147_s19 + $0x348] sm:$0xff] }
 0x37a   : > { %2188 = vmatpush1.bf16.msra.mxu1 %v1592_v31  ;;  %2148 = vmatprep.subr.bf16.mxu0 %v1353_v24  ;;  %v1257_v31 = vld [vmem:[%s4147_s19 + $0x748] sm:$0xff]  ;;  %v1464_v24 = vunpack.c.h.s8.bf16 %v1112_v42  ;;  %v1497_v4 = vunpack.c.h.s8.bf16 %v1129_v56  ;;  %v1066_v42 = vld [vmem:[%s4147_s19 + $0x150] sm:$0xff] }
 0x37b   : > { %2189 = vmatprep.subr.bf16.mxu1 %v1609_v30  ;;  %v1481_v30 = vunpack.c.l.s8.bf16 %v1129_v56  ;;  %v1753_v49 = vunpack.c.h.s8.bf16 %v1257_v31  ;;  %v1083_v56 = vld [vmem:[%s4147_s19 + $0x1d8] sm:$0xff] }
 0x37d   : > { %2149 = vmatpush1.bf16.msra.mxu0 %v1352_v44  ;;  %v1737_v44 = vunpack.c.l.s8.bf16 %v1257_v31  ;;  %v1211_v31 = vld [vmem:[%s4147_s19 + $0x5d8] sm:$0xff] }
 0x37e   : > { %2190 = vmatpush1.bf16.msra.mxu1 %v1608_v29  ;;  %2150 = vmatprep.subr.bf16.mxu0 %v1369_v13  ;;  %v1256_v29 = vld [vmem:[%s4147_s19 + $0x740] sm:$0xff]  ;;  %v1480_v13 = vunpack.c.l.s8.bf16 %v1128_v27 }
 0x37f   : > { %v1846_v17 = vpop.f32.mrb[0].mxu0  ;;  %v1887_v6 = vpop.f32.mrb[0].mxu1  ;;  %2191 = vmatprep.subr.bf16.mxu1 %v1625_v45  ;;  %v1736_v45 = vunpack.c.l.s8.bf16 %v1256_v29  ;;  %v1752_v15 = vunpack.c.h.s8.bf16 %v1256_v29  ;;  %v1794_v29 = vld [vmem:[#allocation2 + $0x10] sm:$0xff] }
 0x380   : > { %v1888_v47 = vadd.f32 %v1887_v6, %v1846_v17  ;;  %v1848_v53 = vpop.f32.mrb[1].mxu0  ;;  %v1889_v54 = vpop.f32.mrb[1].mxu1 }
 0x381   : > { %v1890_v60 = vadd.f32 %v1889_v54, %v1848_v53  ;;  %2151 = vmatpush1.bf16.msra.mxu0 %v1368_v14  ;;  %v1850_v39 = vpop.f32.mrb[2].mxu0  ;;  %v1891_v55 = vpop.f32.mrb[2].mxu1  ;;  %v1145_v14 = vld [vmem:[%s4147_s19 + $0x3c8] sm:$0xff]  ;;  %v1035_v54 = vld [vmem:[%s4147_s19 + $0x58] sm:$0xff] }
 0x382   : > { %v2468_v10 = vadd.f32 %v1888_v47, %v1792_v37  ;;  %2192 = vmatpush1.bf16.msra.mxu1 %v1624_v46  ;;  %v1851_v0 = vpop.f32.mrb[3].mxu0  ;;  %v1892_v62 = vpop.f32.mrb[3].mxu1  ;;  %2152 = vmatprep.subr.bf16.mxu0 %v1385_v51  ;;  %v1273_v46 = vld [vmem:[%s4147_s19 + $0x7c8] sm:$0xff]  ;;  %v1496_v51 = vunpack.c.h.s8.bf16 %v1128_v27  ;;  %v1513_v17 = vunpack.c.l.s8.bf16 %v1145_v14  ;;  %v1144_v37 = vld [vmem:[%s4147_s19 + $0x3c0] sm:$0xff]  ;;  %v1529_v53 = vunpack.c.h.s8.bf16 %v1145_v14  ;;  %v1082_v27 = vld [vmem:[%s4147_s19 + $0x1d0] sm:$0xff] }
 0x383   : > { %v2469_v18 = vadd.f32 %v1890_v60, %v1793_v16  ;;  %2193 = vmatprep.subr.bf16.mxu1 %v1641_v22  ;;  %v1769_v6 = vunpack.c.l.s8.bf16 %v1273_v46  ;;  %v1272_v22 = vld [vmem:[%s4147_s19 + $0x7c0] sm:$0xff]  ;;  %v1512_v38 = vunpack.c.l.s8.bf16 %v1144_v37  ;;  %v1785_v16 = vunpack.c.h.s8.bf16 %v1273_v46  ;;  %v1163_v60 = vld [vmem:[%s4147_s19 + $0x458] sm:$0xff]  ;;  %v1162_v62 = vld [vmem:[%s4147_s19 + $0x450] sm:$0xff] }
 0x384   : > { %2484 = vst [vmem:[#allocation2] sm:$0xff] %v2468_v10  ;;  %v1768_v47 = vunpack.c.l.s8.bf16 %v1272_v22  ;;  %v1528_v39 = vunpack.c.h.s8.bf16 %v1144_v37  ;;  %v1784_v55 = vunpack.c.h.s8.bf16 %v1272_v22  ;;  %v1034_v10 = vld [vmem:[%s4147_s19 + $0x50] sm:$0xff]  ;;  %v1547_v0 = vunpack.c.l.s8.bf16 %v1163_v60  ;;  %v1795_v46 = vld [vmem:[#allocation2 + $0x18] sm:$0xff] }
 0x385   : > { %2485 = vst [vmem:[#allocation2 + $0x8] sm:$0xff] %v2469_v18  ;;  %2153 = vmatpush1.bf16.msra.mxu0 %v1384_v61  ;;  %v1291_v61 = vunpack.c.l.s8.bf16 %v1035_v54  ;;  %v1307_v18 = vunpack.c.h.s8.bf16 %v1035_v54  ;;  %v1563_v36 = vunpack.c.h.s8.bf16 %v1163_v60  ;;  %v1659_v60 = vunpack.c.h.s8.bf16 %v1211_v31 }
 0x386   : > { %2194 = vmatpush1.bf16.msra.mxu1 %v1640_v25  ;;  %2154 = vmatprep.subr.bf16.mxu0 %v1401_v40  ;;  %v1290_v25 = vunpack.c.l.s8.bf16 %v1034_v10  ;;  %v1546_v40 = vunpack.c.l.s8.bf16 %v1162_v62 }
 0x387   : > { %2195 = vmatprep.subr.bf16.mxu1 %v1657_v52  ;;  %v1051_v52 = vld [vmem:[%s4147_s19 + $0xd8] sm:$0xff] }
 0x389   : > { %2155 = vmatpush1.bf16.msra.mxu0 %v1400_v35  ;;  %v1306_v35 = vunpack.c.h.s8.bf16 %v1034_v10 }
 0x38a   : > { %2196 = vmatpush1.bf16.msra.mxu1 %v1656_v48  ;;  %2156 = vmatprep.subr.bf16.mxu0 %v1417_v57  ;;  %v1562_v48 = vunpack.c.h.s8.bf16 %v1162_v62  ;;  %v1323_v57 = vunpack.c.l.s8.bf16 %v1051_v52  ;;  %v1098_v62 = vld [vmem:[%s4147_s19 + $0x250] sm:$0xff] }
 0x38b   : > { %2197 = vmatprep.subr.bf16.mxu1 %v1673_v34  ;;  %v1579_v34 = vunpack.c.l.s8.bf16 %v1179_v19 }
 0x38d   : > { %2157 = vmatpush1.bf16.msra.mxu0 %v1416_v20  ;;  %v1322_v20 = vunpack.c.l.s8.bf16 %v1050_v59 }
 0x38e   : > { %2198 = vmatpush1.bf16.msra.mxu1 %v1672_v5  ;;  %2158 = vmatprep.subr.bf16.mxu0 %v1433_v9  ;;  %v1578_v5 = vunpack.c.l.s8.bf16 %v1178_v7  ;;  %v1339_v9 = vunpack.c.h.s8.bf16 %v1051_v52 }
 0x38f   : > { %2199 = vmatprep.subr.bf16.mxu1 %v1689_v2  ;;  %v1595_v2 = vunpack.c.h.s8.bf16 %v1179_v19 }
 0x391   : > { %2159 = vmatpush1.bf16.msra.mxu0 %v1432_v28  ;;  %v1338_v28 = vunpack.c.h.s8.bf16 %v1050_v59 }
 0x392   : > { %2200 = vmatpush1.bf16.msra.mxu1 %v1688_v21  ;;  %2160 = vmatprep.subr.bf16.mxu0 %v1449_v41  ;;  %v1594_v21 = vunpack.c.h.s8.bf16 %v1178_v7  ;;  %v1355_v41 = vunpack.c.l.s8.bf16 %v1067_v12  ;;  %v1114_v7 = vld [vmem:[%s4147_s19 + $0x2d0] sm:$0xff] }
 0x393   : > { %2201 = vmatprep.subr.bf16.mxu1 %v1705_v63  ;;  %v1611_v63 = vunpack.c.l.s8.bf16 %v1195_v3 }
 0x395   : > { %2161 = vmatpush1.bf16.msra.mxu0 %v1448_v33  ;;  %v1354_v33 = vunpack.c.l.s8.bf16 %v1066_v42 }
 0x396   : > { %2202 = vmatpush1.bf16.msra.mxu1 %v1704_v58  ;;  %2162 = vmatprep.subr.bf16.mxu0 %v1465_v32  ;;  %v1610_v58 = vunpack.c.l.s8.bf16 %v1194_v50  ;;  %v1371_v32 = vunpack.c.h.s8.bf16 %v1067_v12 }
 0x397   : > { %2203 = vmatprep.subr.bf16.mxu1 %v1721_v23  ;;  %v1627_v23 = vunpack.c.h.s8.bf16 %v1195_v3 }
 0x399   : > { %2163 = vmatpush1.bf16.msra.mxu0 %v1464_v24  ;;  %v1370_v24 = vunpack.c.h.s8.bf16 %v1066_v42 }
 0x39a   : > { %2204 = vmatpush1.bf16.msra.mxu1 %v1720_v26  ;;  %2164 = vmatprep.subr.bf16.mxu0 %v1481_v30  ;;  %v1626_v26 = vunpack.c.h.s8.bf16 %v1194_v50  ;;  %v1387_v30 = vunpack.c.l.s8.bf16 %v1083_v56  ;;  %v1130_v50 = vld [vmem:[%s4147_s19 + $0x350] sm:$0xff] }
 0x39b   : > { %2205 = vmatprep.subr.bf16.mxu1 %v1737_v44 }
 0x39d   : > { %2165 = vmatpush1.bf16.msra.mxu0 %v1480_v13 }
 0x39e   : > { %2206 = vmatpush1.bf16.msra.mxu1 %v1736_v45  ;;  %2166 = vmatprep.subr.bf16.mxu0 %v1497_v4  ;;  %v1643_v45 = vunpack.c.l.s8.bf16 %v1211_v31  ;;  %v1210_v4 = vld [vmem:[%s4147_s19 + $0x5d0] sm:$0xff] }
 0x39f   : > { %2207 = vmatprep.subr.bf16.mxu1 %v1753_v49  ;;  %v1658_v10 = vunpack.c.h.s8.bf16 %v1210_v4 }
 0x3a1   : > { %2167 = vmatpush1.bf16.msra.mxu0 %v1496_v51 }
 0x3a2   : > { %2208 = vmatpush1.bf16.msra.mxu1 %v1752_v15  ;;  %2168 = vmatprep.subr.bf16.mxu0 %v1513_v17 }
 0x3a3   : > { %2209 = vmatprep.subr.bf16.mxu1 %v1769_v6  ;;  %v1386_v6 = vunpack.c.l.s8.bf16 %v1082_v27 }
 0x3a5   : > { %2169 = vmatpush1.bf16.msra.mxu0 %v1512_v38 }
 0x3a6   : > { %2210 = vmatpush1.bf16.msra.mxu1 %v1768_v47  ;;  %2170 = vmatprep.subr.bf16.mxu0 %v1529_v53  ;;  %v1642_v53 = vunpack.c.l.s8.bf16 %v1210_v4 }
 0x3a7   : > { %2211 = vmatprep.subr.bf16.mxu1 %v1785_v16  ;;  %v1403_v16 = vunpack.c.h.s8.bf16 %v1083_v56 }
 0x3a9   : > { %2171 = vmatpush1.bf16.msra.mxu0 %v1528_v39  ;;  %v1099_v39 = vld [vmem:[%s4147_s19 + $0x258] sm:$0xff] }
 0x3aa   : > { %2212 = vmatpush1.bf16.msra.mxu1 %v1784_v55  ;;  %2222 = vmatprep.subr.bf16.mxu0 %v1291_v61  ;;  %v1227_v55 = vld [vmem:[%s4147_s19 + $0x658] sm:$0xff]  ;;  %v1402_v61 = vunpack.c.h.s8.bf16 %v1082_v27 }
 0x3ab   : > { %2263 = vmatprep.subr.bf16.mxu1 %v1547_v0  ;;  %v1419_v0 = vunpack.c.l.s8.bf16 %v1099_v39  ;;  %v1691_v19 = vunpack.c.h.s8.bf16 %v1227_v55 }
 0x3ac   : > { %2173 = vmatmul.mubr.bf16.vlgmr.msra.gmra.mrb[16].mxu0 %v4518_v8 }
 0x3ad   : > { %2214 = vmatmul.mubr.bf16.vlgmr.msra.gmra.mrb[16].mxu1 %v4522_v43  ;;  %2223 = vmatpush1.bf16.msra.mxu0 %v1290_v25  ;;  %v1675_v25 = vunpack.c.l.s8.bf16 %v1227_v55  ;;  %v1181_v55 = vld [vmem:[%s4147_s19 + $0x4e8] sm:$0xff] }
 0x3ae   : > { %2254 = vmatprep.mubr.bf16.mxu0 %v4520_v11  ;;  %2264 = vmatpush1.bf16.msra.mxu1 %v1546_v40  ;;  %v1226_v40 = vld [vmem:[%s4147_s19 + $0x650] sm:$0xff] }
 0x3af   : > { %2295 = vmatprep.mubr.bf16.mxu1 %v4524_v1  ;;  %2224 = vmatprep.subr.bf16.mxu0 %v1307_v18  ;;  %v1418_v18 = vunpack.c.l.s8.bf16 %v1098_v62  ;;  %v1674_v52 = vunpack.c.l.s8.bf16 %v1226_v40  ;;  %v1690_v59 = vunpack.c.h.s8.bf16 %v1226_v40  ;;  %v1180_v40 = vld [vmem:[%s4147_s19 + $0x4e0] sm:$0xff] }
 0x3b0   : > { %2265 = vmatprep.subr.bf16.mxu1 %v1563_v36  ;;  %v1435_v36 = vunpack.c.h.s8.bf16 %v1099_v39 }
 0x3b1   : > { %2225 = vmatpush1.bf16.msra.mxu0 %v1306_v35  ;;  %v1115_v35 = vld [vmem:[%s4147_s19 + $0x2d8] sm:$0xff] }
 0x3b2   : > { %2266 = vmatpush1.bf16.msra.mxu1 %v1562_v48  ;;  %2226 = vmatprep.subr.bf16.mxu0 %v1323_v57  ;;  %v1243_v48 = vld [vmem:[%s4147_s19 + $0x6d8] sm:$0xff]  ;;  %v1434_v57 = vunpack.c.h.s8.bf16 %v1098_v62  ;;  %v1467_v12 = vunpack.c.h.s8.bf16 %v1115_v35  ;;  %v1052_v62 = vld [vmem:[%s4147_s19 + $0xe0] sm:$0xff] }
 0x3b3   : > { %2267 = vmatprep.subr.bf16.mxu1 %v1579_v34  ;;  %v1451_v34 = vunpack.c.l.s8.bf16 %v1115_v35  ;;  %v1723_v3 = vunpack.c.h.s8.bf16 %v1243_v48  ;;  %v1069_v35 = vld [vmem:[%s4147_s19 + $0x168] sm:$0xff] }
 0x3b5   : > { %2227 = vmatpush1.bf16.msra.mxu0 %v1322_v20  ;;  %v1707_v20 = vunpack.c.l.s8.bf16 %v1243_v48  ;;  %v1197_v48 = vld [vmem:[%s4147_s19 + $0x568] sm:$0xff] }
 0x3b6   : > { %2268 = vmatpush1.bf16.msra.mxu1 %v1578_v5  ;;  %2228 = vmatprep.subr.bf16.mxu0 %v1339_v9  ;;  %v1242_v5 = vld [vmem:[%s4147_s19 + $0x6d0] sm:$0xff]  ;;  %v1450_v9 = vunpack.c.l.s8.bf16 %v1114_v7 }
 0x3b7   : > { %2269 = vmatprep.subr.bf16.mxu1 %v1595_v2  ;;  %v1706_v2 = vunpack.c.l.s8.bf16 %v1242_v5  ;;  %v1722_v42 = vunpack.c.h.s8.bf16 %v1242_v5  ;;  %v1196_v5 = vld [vmem:[%s4147_s19 + $0x560] sm:$0xff] }
 0x3b9   : > { %2229 = vmatpush1.bf16.msra.mxu0 %v1338_v28  ;;  %v1131_v28 = vld [vmem:[%s4147_s19 + $0x358] sm:$0xff] }
 0x3ba   : > { %2270 = vmatpush1.bf16.msra.mxu1 %v1594_v21  ;;  %2230 = vmatprep.subr.bf16.mxu0 %v1355_v41  ;;  %v1259_v21 = vld [vmem:[%s4147_s19 + $0x758] sm:$0xff]  ;;  %v1466_v41 = vunpack.c.h.s8.bf16 %v1114_v7  ;;  %v1499_v56 = vunpack.c.h.s8.bf16 %v1131_v28  ;;  %v1068_v7 = vld [vmem:[%s4147_s19 + $0x160] sm:$0xff] }
 0x3bb   : > { %2271 = vmatprep.subr.bf16.mxu1 %v1611_v63  ;;  %v1483_v63 = vunpack.c.l.s8.bf16 %v1131_v28  ;;  %v1755_v31 = vunpack.c.h.s8.bf16 %v1259_v21  ;;  %v1085_v28 = vld [vmem:[%s4147_s19 + $0x1e8] sm:$0xff] }
 0x3bd   : > { %2231 = vmatpush1.bf16.msra.mxu0 %v1354_v33  ;;  %v1739_v33 = vunpack.c.l.s8.bf16 %v1259_v21  ;;  %v1213_v21 = vld [vmem:[%s4147_s19 + $0x5e8] sm:$0xff] }
 0x3be   : > { %2272 = vmatpush1.bf16.msra.mxu1 %v1610_v58  ;;  %2232 = vmatprep.subr.bf16.mxu0 %v1371_v32  ;;  %v1258_v58 = vld [vmem:[%s4147_s19 + $0x750] sm:$0xff]  ;;  %v1482_v32 = vunpack.c.l.s8.bf16 %v1130_v50 }
 0x3bf   : > { %v1928_v44 = vpop.f32.mrb[4].mxu0  ;;  %v1969_v13 = vpop.f32.mrb[4].mxu1  ;;  %2273 = vmatprep.subr.bf16.mxu1 %v1627_v23  ;;  %v1738_v23 = vunpack.c.l.s8.bf16 %v1258_v58  ;;  %v1754_v27 = vunpack.c.h.s8.bf16 %v1258_v58  ;;  %v1645_v58 = vunpack.c.l.s8.bf16 %v1213_v21 }
 0x3c0   : > { %v1970_v49 = vadd.f32 %v1969_v13, %v1928_v44  ;;  %v1930_v14 = vpop.f32.mrb[5].mxu0  ;;  %v1971_v51 = vpop.f32.mrb[5].mxu1 }
 0x3c1   : > { %v1972_v15 = vadd.f32 %v1971_v51, %v1930_v14  ;;  %v1932_v17 = vpop.f32.mrb[6].mxu0  ;;  %v1973_v37 = vpop.f32.mrb[6].mxu1  ;;  %2233 = vmatpush1.bf16.msra.mxu0 %v1370_v24  ;;  %v1147_v24 = vld [vmem:[%s4147_s19 + $0x3d8] sm:$0xff]  ;;  %v1037_v51 = vld [vmem:[%s4147_s19 + $0x68] sm:$0xff] }
 0x3c2   : > { %v2470_v22 = vadd.f32 %v1970_v49, %v1794_v29  ;;  %2274 = vmatpush1.bf16.msra.mxu1 %v1626_v26  ;;  %v1933_v38 = vpop.f32.mrb[7].mxu0  ;;  %v1974_v47 = vpop.f32.mrb[7].mxu1  ;;  %2234 = vmatprep.subr.bf16.mxu0 %v1387_v30  ;;  %v1275_v26 = vld [vmem:[%s4147_s19 + $0x7d8] sm:$0xff]  ;;  %v1498_v30 = vunpack.c.h.s8.bf16 %v1130_v50  ;;  %v1515_v44 = vunpack.c.l.s8.bf16 %v1147_v24  ;;  %v1146_v29 = vld [vmem:[%s4147_s19 + $0x3d0] sm:$0xff]  ;;  %v1531_v14 = vunpack.c.h.s8.bf16 %v1147_v24  ;;  %v1084_v50 = vld [vmem:[%s4147_s19 + $0x1e0] sm:$0xff] }
 0x3c3   : > { %v2471_v54 = vadd.f32 %v1972_v15, %v1795_v46  ;;  %2275 = vmatprep.subr.bf16.mxu1 %v1643_v45  ;;  %v1771_v13 = vunpack.c.l.s8.bf16 %v1275_v26  ;;  %v1274_v45 = vld [vmem:[%s4147_s19 + $0x7d0] sm:$0xff]  ;;  %v1514_v4 = vunpack.c.l.s8.bf16 %v1146_v29  ;;  %v1787_v46 = vunpack.c.h.s8.bf16 %v1275_v26  ;;  %v1165_v15 = vld [vmem:[%s4147_s19 + $0x468] sm:$0xff]  ;;  %v1164_v47 = vld [vmem:[%s4147_s19 + $0x460] sm:$0xff] }
 0x3c4   : > { %2486 = vst [vmem:[#allocation2 + $0x10] sm:$0xff] %v2470_v22  ;;  %v1770_v49 = vunpack.c.l.s8.bf16 %v1274_v45  ;;  %v1530_v17 = vunpack.c.h.s8.bf16 %v1146_v29  ;;  %v1786_v37 = vunpack.c.h.s8.bf16 %v1274_v45  ;;  %v1036_v22 = vld [vmem:[%s4147_s19 + $0x60] sm:$0xff]  ;;  %v1549_v38 = vunpack.c.l.s8.bf16 %v1165_v15  ;;  %v1797_v26 = vld [vmem:[#allocation2 + $0x28] sm:$0xff] }
 0x3c5   : > { %2487 = vst [vmem:[#allocation2 + $0x18] sm:$0xff] %v2471_v54  ;;  %2235 = vmatpush1.bf16.msra.mxu0 %v1386_v6  ;;  %v1293_v6 = vunpack.c.l.s8.bf16 %v1037_v51  ;;  %v1309_v54 = vunpack.c.h.s8.bf16 %v1037_v51  ;;  %v1565_v39 = vunpack.c.h.s8.bf16 %v1165_v15  ;;  %v1661_v51 = vunpack.c.h.s8.bf16 %v1213_v21  ;;  %v1101_v15 = vld [vmem:[%s4147_s19 + $0x268] sm:$0xff] }
 0x3c6   : > { %2276 = vmatpush1.bf16.msra.mxu1 %v1642_v53  ;;  %2236 = vmatprep.subr.bf16.mxu0 %v1403_v16  ;;  %v1292_v53 = vunpack.c.l.s8.bf16 %v1036_v22  ;;  %v1548_v16 = vunpack.c.l.s8.bf16 %v1164_v47 }
 0x3c7   : > { %2277 = vmatprep.subr.bf16.mxu1 %v1659_v60  ;;  %v1053_v60 = vld [vmem:[%s4147_s19 + $0xe8] sm:$0xff] }
 0x3c9   : > { %2237 = vmatpush1.bf16.msra.mxu0 %v1402_v61  ;;  %v1308_v61 = vunpack.c.h.s8.bf16 %v1036_v22 }
 0x3ca   : > { %2278 = vmatpush1.bf16.msra.mxu1 %v1658_v10  ;;  %2238 = vmatprep.subr.bf16.mxu0 %v1419_v0  ;;  %v1564_v10 = vunpack.c.h.s8.bf16 %v1164_v47  ;;  %v1325_v0 = vunpack.c.l.s8.bf16 %v1053_v60  ;;  %v1100_v47 = vld [vmem:[%s4147_s19 + $0x260] sm:$0xff] }
 0x3cb   : > { %2279 = vmatprep.subr.bf16.mxu1 %v1675_v25  ;;  %v1581_v25 = vunpack.c.l.s8.bf16 %v1181_v55 }
 0x3cd   : > { %2239 = vmatpush1.bf16.msra.mxu0 %v1418_v18  ;;  %v1324_v18 = vunpack.c.l.s8.bf16 %v1052_v62 }
 0x3ce   : > { %2280 = vmatpush1.bf16.msra.mxu1 %v1674_v52  ;;  %2240 = vmatprep.subr.bf16.mxu0 %v1435_v36  ;;  %v1580_v52 = vunpack.c.l.s8.bf16 %v1180_v40  ;;  %v1341_v36 = vunpack.c.h.s8.bf16 %v1053_v60 }
 0x3cf   : > { %2281 = vmatprep.subr.bf16.mxu1 %v1691_v19  ;;  %v1597_v19 = vunpack.c.h.s8.bf16 %v1181_v55 }
 0x3d1   : > { %2241 = vmatpush1.bf16.msra.mxu0 %v1434_v57  ;;  %v1340_v57 = vunpack.c.h.s8.bf16 %v1052_v62 }
 0x3d2   : > { %2282 = vmatpush1.bf16.msra.mxu1 %v1690_v59  ;;  %2242 = vmatprep.subr.bf16.mxu0 %v1451_v34  ;;  %v1596_v59 = vunpack.c.h.s8.bf16 %v1180_v40  ;;  %v1357_v34 = vunpack.c.l.s8.bf16 %v1069_v35  ;;  %v1116_v40 = vld [vmem:[%s4147_s19 + $0x2e0] sm:$0xff] }
 0x3d3   : > { %2283 = vmatprep.subr.bf16.mxu1 %v1707_v20  ;;  %v1613_v20 = vunpack.c.l.s8.bf16 %v1197_v48 }
 0x3d5   : > { %2243 = vmatpush1.bf16.msra.mxu0 %v1450_v9  ;;  %v1356_v9 = vunpack.c.l.s8.bf16 %v1068_v7 }
 0x3d6   : > { %2284 = vmatpush1.bf16.msra.mxu1 %v1706_v2  ;;  %2244 = vmatprep.subr.bf16.mxu0 %v1467_v12  ;;  %v1612_v2 = vunpack.c.l.s8.bf16 %v1196_v5  ;;  %v1373_v12 = vunpack.c.h.s8.bf16 %v1069_v35 }
 0x3d7   : > { %2285 = vmatprep.subr.bf16.mxu1 %v1723_v3  ;;  %v1629_v3 = vunpack.c.h.s8.bf16 %v1197_v48 }
 0x3d9   : > { %2245 = vmatpush1.bf16.msra.mxu0 %v1466_v41  ;;  %v1372_v41 = vunpack.c.h.s8.bf16 %v1068_v7 }
 0x3da   : > { %2286 = vmatpush1.bf16.msra.mxu1 %v1722_v42  ;;  %2246 = vmatprep.subr.bf16.mxu0 %v1483_v63  ;;  %v1628_v42 = vunpack.c.h.s8.bf16 %v1196_v5  ;;  %v1389_v63 = vunpack.c.l.s8.bf16 %v1085_v28  ;;  %v1132_v5 = vld [vmem:[%s4147_s19 + $0x360] sm:$0xff] }
 0x3db   : > { %2287 = vmatprep.subr.bf16.mxu1 %v1739_v33 }
 0x3dd   : > { %2247 = vmatpush1.bf16.msra.mxu0 %v1482_v32  ;;  %v1212_v32 = vld [vmem:[%s4147_s19 + $0x5e0] sm:$0xff] }
 0x3de   : > { %2288 = vmatpush1.bf16.msra.mxu1 %v1738_v23  ;;  %2248 = vmatprep.subr.bf16.mxu0 %v1499_v56  ;;  %v1796_v23 = vld [vmem:[#allocation2 + $0x20] sm:$0xff]  ;;  %v1660_v22 = vunpack.c.h.s8.bf16 %v1212_v32 }
 0x3df   : > { %2289 = vmatprep.subr.bf16.mxu1 %v1755_v31 }
 0x3e1   : > { %2249 = vmatpush1.bf16.msra.mxu0 %v1498_v30 }
 0x3e2   : > { %2290 = vmatpush1.bf16.msra.mxu1 %v1754_v27  ;;  %2250 = vmatprep.subr.bf16.mxu0 %v1515_v44  ;;  %v1388_v44 = vunpack.c.l.s8.bf16 %v1084_v50 }
 0x3e3   : > { %2291 = vmatprep.subr.bf16.mxu1 %v1771_v13 }
 0x3e5   : > { %2251 = vmatpush1.bf16.msra.mxu0 %v1514_v4  ;;  %v1644_v4 = vunpack.c.l.s8.bf16 %v1212_v32 }
 0x3e6   : > { %2292 = vmatpush1.bf16.msra.mxu1 %v1770_v49  ;;  %2252 = vmatprep.subr.bf16.mxu0 %v1531_v14  ;;  %v1405_v49 = vunpack.c.h.s8.bf16 %v1085_v28 }
 0x3e7   : > { %2293 = vmatprep.subr.bf16.mxu1 %v1787_v46 }
 0x3e9   : > { %2253 = vmatpush1.bf16.msra.mxu0 %v1530_v17 }
 0x3ea   : > { %2294 = vmatpush1.bf16.msra.mxu1 %v1786_v37  ;;  %2304 = vmatprep.subr.bf16.mxu0 %v1293_v6  ;;  %v1229_v37 = vld [vmem:[%s4147_s19 + $0x668] sm:$0xff]  ;;  %v1404_v6 = vunpack.c.h.s8.bf16 %v1084_v50 }
 0x3eb   : > { %2345 = vmatprep.subr.bf16.mxu1 %v1549_v38  ;;  %v1421_v38 = vunpack.c.l.s8.bf16 %v1101_v15  ;;  %v1693_v55 = vunpack.c.h.s8.bf16 %v1229_v37 }
 0x3ec   : > { %2255 = vmatmul.mubr.bf16.vlgmr.msra.gmra.mrb[20].mxu0 %v4518_v8 }
 0x3ed   : > { %2296 = vmatmul.mubr.bf16.vlgmr.msra.gmra.mrb[20].mxu1 %v4522_v43  ;;  %2305 = vmatpush1.bf16.msra.mxu0 %v1292_v53  ;;  %v1677_v53 = vunpack.c.l.s8.bf16 %v1229_v37  ;;  %v1183_v37 = vld [vmem:[%s4147_s19 + $0x4f8] sm:$0xff] }
 0x3ee   : > { %2336 = vmatprep.mubr.bf16.mxu0 %v4520_v11  ;;  %2346 = vmatpush1.bf16.msra.mxu1 %v1548_v16  ;;  %v1228_v16 = vld [vmem:[%s4147_s19 + $0x660] sm:$0xff] }
 0x3ef   : > { %2377 = vmatprep.mubr.bf16.mxu1 %v4524_v1  ;;  %2306 = vmatprep.subr.bf16.mxu0 %v1309_v54  ;;  %v1420_v54 = vunpack.c.l.s8.bf16 %v1100_v47  ;;  %v1676_v60 = vunpack.c.l.s8.bf16 %v1228_v16  ;;  %v1692_v62 = vunpack.c.h.s8.bf16 %v1228_v16  ;;  %v1182_v16 = vld [vmem:[%s4147_s19 + $0x4f0] sm:$0xff] }
 0x3f0   : > { %2347 = vmatprep.subr.bf16.mxu1 %v1565_v39  ;;  %v1437_v39 = vunpack.c.h.s8.bf16 %v1101_v15  ;;  %v1055_v15 = vld [vmem:[%s4147_s19 + $0xf8] sm:$0xff] }
 0x3f1   : > { %2307 = vmatpush1.bf16.msra.mxu0 %v1308_v61  ;;  %v1117_v61 = vld [vmem:[%s4147_s19 + $0x2e8] sm:$0xff] }
 0x3f2   : > { %2348 = vmatpush1.bf16.msra.mxu1 %v1564_v10  ;;  %2308 = vmatprep.subr.bf16.mxu0 %v1325_v0  ;;  %v1245_v10 = vld [vmem:[%s4147_s19 + $0x6e8] sm:$0xff]  ;;  %v1436_v0 = vunpack.c.h.s8.bf16 %v1100_v47  ;;  %v1469_v35 = vunpack.c.h.s8.bf16 %v1117_v61  ;;  %v1054_v47 = vld [vmem:[%s4147_s19 + $0xf0] sm:$0xff] }
 0x3f3   : > { %2349 = vmatprep.subr.bf16.mxu1 %v1581_v25  ;;  %v1453_v25 = vunpack.c.l.s8.bf16 %v1117_v61  ;;  %v1725_v48 = vunpack.c.h.s8.bf16 %v1245_v10  ;;  %v1199_v61 = vld [vmem:[%s4147_s19 + $0x578] sm:$0xff] }
 0x3f5   : > { %2309 = vmatpush1.bf16.msra.mxu0 %v1324_v18  ;;  %v1709_v18 = vunpack.c.l.s8.bf16 %v1245_v10  ;;  %v1342_v10 = vunpack.c.h.s8.bf16 %v1054_v47 }
 0x3f6   : > { %2350 = vmatpush1.bf16.msra.mxu1 %v1580_v52  ;;  %2310 = vmatprep.subr.bf16.mxu0 %v1341_v36  ;;  %v1244_v52 = vld [vmem:[%s4147_s19 + $0x6e0] sm:$0xff]  ;;  %v1452_v36 = vunpack.c.l.s8.bf16 %v1116_v40 }
 0x3f7   : > { %2351 = vmatprep.subr.bf16.mxu1 %v1597_v19  ;;  %v1708_v19 = vunpack.c.l.s8.bf16 %v1244_v52  ;;  %v1724_v7 = vunpack.c.h.s8.bf16 %v1244_v52 }
 0x3f9   : > { %2311 = vmatpush1.bf16.msra.mxu0 %v1340_v57  ;;  %v1133_v57 = vld [vmem:[%s4147_s19 + $0x368] sm:$0xff] }
 0x3fa   : > { %2352 = vmatpush1.bf16.msra.mxu1 %v1596_v59  ;;  %2312 = vmatprep.subr.bf16.mxu0 %v1357_v34  ;;  %v1261_v59 = vld [vmem:[%s4147_s19 + $0x768] sm:$0xff]  ;;  %v1468_v34 = vunpack.c.h.s8.bf16 %v1116_v40  ;;  %v1501_v28 = vunpack.c.h.s8.bf16 %v1133_v57  ;;  %v1198_v40 = vld [vmem:[%s4147_s19 + $0x570] sm:$0xff] }
 0x3fb   : > { %2353 = vmatprep.subr.bf16.mxu1 %v1613_v20  ;;  %v1485_v20 = vunpack.c.l.s8.bf16 %v1133_v57  ;;  %v1757_v21 = vunpack.c.h.s8.bf16 %v1261_v59  ;;  %v1614_v52 = vunpack.c.l.s8.bf16 %v1198_v40 }
 0x3fd   : > { %2313 = vmatpush1.bf16.msra.mxu0 %v1356_v9  ;;  %v1741_v9 = vunpack.c.l.s8.bf16 %v1261_v59  ;;  %v1630_v59 = vunpack.c.h.s8.bf16 %v1198_v40  ;;  %v1262_v40 = vld [vmem:[%s4147_s19 + $0x770] sm:$0xff] }
 0x3fe   : > { %2354 = vmatpush1.bf16.msra.mxu1 %v1612_v2  ;;  %2314 = vmatprep.subr.bf16.mxu0 %v1373_v12  ;;  %v1260_v2 = vld [vmem:[%s4147_s19 + $0x760] sm:$0xff]  ;;  %v1484_v12 = vunpack.c.l.s8.bf16 %v1132_v5 }
 0x3ff   : > { %v2010_v33 = vpop.f32.mrb[8].mxu0  ;;  %2355 = vmatprep.subr.bf16.mxu1 %v1629_v3  ;;  %v1740_v3 = vunpack.c.l.s8.bf16 %v1260_v2  ;;  %v1756_v50 = vunpack.c.h.s8.bf16 %v1260_v2  ;;  %v1798_v2 = vld [vmem:[#allocation2 + $0x30] sm:$0xff] }
 0x400   : > { %v2051_v56 = vpop.f32.mrb[8].mxu1  ;;  %v2012_v31 = vpop.f32.mrb[9].mxu0 }
 0x401   : > { %v2052_v24 = vadd.f32 %v2051_v56, %v2010_v33  ;;  %v2053_v30 = vpop.f32.mrb[9].mxu1  ;;  %v2014_v27 = vpop.f32.mrb[10].mxu0  ;;  %2315 = vmatpush1.bf16.msra.mxu0 %v1372_v41  ;;  %v1149_v41 = vld [vmem:[%s4147_s19 + $0x3e8] sm:$0xff] }
 0x402   : > { %v2054_v29 = vadd.f32 %v2053_v30, %v2012_v31  ;;  %v2055_v13 = vpop.f32.mrb[10].mxu1  ;;  %2356 = vmatpush1.bf16.msra.mxu1 %v1628_v42  ;;  %v2015_v45 = vpop.f32.mrb[11].mxu0  ;;  %2316 = vmatprep.subr.bf16.mxu0 %v1389_v63  ;;  %v1277_v42 = vld [vmem:[%s4147_s19 + $0x7e8] sm:$0xff]  ;;  %v1500_v63 = vunpack.c.h.s8.bf16 %v1132_v5  ;;  %v1517_v33 = vunpack.c.l.s8.bf16 %v1149_v41  ;;  %v1039_v30 = vld [vmem:[%s4147_s19 + $0x78] sm:$0xff] }
 0x403   : > { %v2472_v14 = vadd.f32 %v2052_v24, %v1796_v23  ;;  %v2056_v46 = vpop.f32.mrb[11].mxu1  ;;  %2357 = vmatprep.subr.bf16.mxu1 %v1645_v58  ;;  %v1148_v58 = vld [vmem:[%s4147_s19 + $0x3e0] sm:$0xff]  ;;  %v1773_v32 = vunpack.c.l.s8.bf16 %v1277_v42  ;;  %v1533_v24 = vunpack.c.h.s8.bf16 %v1149_v41  ;;  %v1167_v27 = vld [vmem:[%s4147_s19 + $0x478] sm:$0xff]  ;;  %v1295_v13 = vunpack.c.l.s8.bf16 %v1039_v30  ;;  %v1038_v45 = vld [vmem:[%s4147_s19 + $0x70] sm:$0xff] }
 0x404   : > { %v2473_v17 = vadd.f32 %v2054_v29, %v1797_v26  ;;  %v1276_v23 = vld [vmem:[%s4147_s19 + $0x7e0] sm:$0xff]  ;;  %v1516_v56 = vunpack.c.l.s8.bf16 %v1148_v58  ;;  %v1789_v26 = vunpack.c.h.s8.bf16 %v1277_v42 }
 0x405   : > { %2488 = vst [vmem:[#allocation2 + $0x20] sm:$0xff] %v2472_v14  ;;  %2317 = vmatpush1.bf16.msra.mxu0 %v1388_v44  ;;  %v1772_v31 = vunpack.c.l.s8.bf16 %v1276_v23  ;;  %v1532_v44 = vunpack.c.h.s8.bf16 %v1148_v58  ;;  %v1788_v29 = vunpack.c.h.s8.bf16 %v1276_v23  ;;  %v1294_v14 = vunpack.c.l.s8.bf16 %v1038_v45 }
 0x406   : > { %2489 = vst [vmem:[#allocation2 + $0x28] sm:$0xff] %v2473_v17  ;;  %2358 = vmatpush1.bf16.msra.mxu1 %v1644_v4  ;;  %2318 = vmatprep.subr.bf16.mxu0 %v1405_v49  ;;  %v1551_v4 = vunpack.c.l.s8.bf16 %v1167_v27  ;;  %v1166_v49 = vld [vmem:[%s4147_s19 + $0x470] sm:$0xff]  ;;  %v1567_v17 = vunpack.c.h.s8.bf16 %v1167_v27  ;;  %v1231_v27 = vld [vmem:[%s4147_s19 + $0x678] sm:$0xff] }
 0x407   : > { %2359 = vmatprep.subr.bf16.mxu1 %v1661_v51  ;;  %v1550_v46 = vunpack.c.l.s8.bf16 %v1166_v49  ;;  %v1311_v51 = vunpack.c.h.s8.bf16 %v1039_v30 }
 0x409   : > { %2319 = vmatpush1.bf16.msra.mxu0 %v1404_v6  ;;  %v1310_v6 = vunpack.c.h.s8.bf16 %v1038_v45  ;;  %v1102_v45 = vld [vmem:[%s4147_s19 + $0x270] sm:$0xff] }
 0x40a   : > { %2360 = vmatpush1.bf16.msra.mxu1 %v1660_v22  ;;  %2320 = vmatprep.subr.bf16.mxu0 %v1421_v38  ;;  %v1566_v22 = vunpack.c.h.s8.bf16 %v1166_v49  ;;  %v1327_v38 = vunpack.c.l.s8.bf16 %v1055_v15  ;;  %v1230_v49 = vld [vmem:[%s4147_s19 + $0x670] sm:$0xff] }
 0x40b   : > { %2361 = vmatprep.subr.bf16.mxu1 %v1677_v53  ;;  %v1583_v53 = vunpack.c.l.s8.bf16 %v1183_v37 }
 0x40d   : > { %2321 = vmatpush1.bf16.msra.mxu0 %v1420_v54  ;;  %v1326_v54 = vunpack.c.l.s8.bf16 %v1054_v47  ;;  %v1118_v47 = vld [vmem:[%s4147_s19 + $0x2f0] sm:$0xff] }
 0x40e   : > { %2362 = vmatpush1.bf16.msra.mxu1 %v1676_v60  ;;  %2322 = vmatprep.subr.bf16.mxu0 %v1437_v39  ;;  %v1582_v60 = vunpack.c.l.s8.bf16 %v1182_v16  ;;  %v1599_v39 = vunpack.c.h.s8.bf16 %v1183_v37  ;;  %v1247_v37 = vld [vmem:[%s4147_s19 + $0x6f8] sm:$0xff] }
 0x40f   : > { %2363 = vmatprep.subr.bf16.mxu1 %v1693_v55  ;;  %v1071_v55 = vld [vmem:[%s4147_s19 + $0x178] sm:$0xff] }
 0x411   : > { %2323 = vmatpush1.bf16.msra.mxu0 %v1436_v0  ;;  %v1359_v0 = vunpack.c.l.s8.bf16 %v1071_v55 }
 0x412   : > { %2364 = vmatpush1.bf16.msra.mxu1 %v1692_v62  ;;  %2324 = vmatprep.subr.bf16.mxu0 %v1453_v25  ;;  %v1070_v62 = vld [vmem:[%s4147_s19 + $0x170] sm:$0xff]  ;;  %v1615_v25 = vunpack.c.l.s8.bf16 %v1199_v61 }
 0x413   : > { %2365 = vmatprep.subr.bf16.mxu1 %v1709_v18  ;;  %v1358_v18 = vunpack.c.l.s8.bf16 %v1070_v62  ;;  %v1374_v57 = vunpack.c.h.s8.bf16 %v1070_v62  ;;  %v1134_v62 = vld [vmem:[%s4147_s19 + $0x370] sm:$0xff] }
 0x415   : > { %2325 = vmatpush1.bf16.msra.mxu0 %v1452_v36  ;;  %v1375_v36 = vunpack.c.h.s8.bf16 %v1071_v55  ;;  %v1135_v55 = vld [vmem:[%s4147_s19 + $0x378] sm:$0xff] }
 0x416   : > { %2366 = vmatpush1.bf16.msra.mxu1 %v1708_v19  ;;  %2326 = vmatprep.subr.bf16.mxu0 %v1469_v35  ;;  %v1631_v19 = vunpack.c.h.s8.bf16 %v1199_v61  ;;  %v1087_v35 = vld [vmem:[%s4147_s19 + $0x1f8] sm:$0xff] }
 0x417   : > { %2367 = vmatprep.subr.bf16.mxu1 %v1725_v48  ;;  %v1215_v48 = vld [vmem:[%s4147_s19 + $0x5f8] sm:$0xff]  ;;  %v1407_v23 = vunpack.c.h.s8.bf16 %v1087_v35 }
 0x418   : > { %v1647_v5 = vunpack.c.l.s8.bf16 %v1215_v48  ;;  %v1263_v61 = vld [vmem:[%s4147_s19 + $0x778] sm:$0xff] }
 0x419   : > { %2327 = vmatpush1.bf16.msra.mxu0 %v1468_v34  ;;  %v1391_v34 = vunpack.c.l.s8.bf16 %v1087_v35  ;;  %v1151_v35 = vld [vmem:[%s4147_s19 + $0x3f8] sm:$0xff] }
 0x41a   : > { %2368 = vmatpush1.bf16.msra.mxu1 %v1724_v7  ;;  %2328 = vmatprep.subr.bf16.mxu0 %v1485_v20  ;;  %v1086_v7 = vld [vmem:[%s4147_s19 + $0x1f0] sm:$0xff] }
 0x41b   : > { %2369 = vmatprep.subr.bf16.mxu1 %v1741_v9  ;;  %v1214_v9 = vld [vmem:[%s4147_s19 + $0x5f0] sm:$0xff] }
 0x41d   : > { %2329 = vmatpush1.bf16.msra.mxu0 %v1484_v12 }
 0x41e   : > { %2370 = vmatpush1.bf16.msra.mxu1 %v1740_v3  ;;  %2330 = vmatprep.subr.bf16.mxu0 %v1501_v28 }
 0x41f   : > { %2371 = vmatprep.subr.bf16.mxu1 %v1757_v21  ;;  %v1799_v21 = vld [vmem:[#allocation2 + $0x38] sm:$0xff] }
 0x421   : > { %2331 = vmatpush1.bf16.msra.mxu0 %v1500_v63  ;;  %v1390_v63 = vunpack.c.l.s8.bf16 %v1086_v7 }
 0x422   : > { %2372 = vmatpush1.bf16.msra.mxu1 %v1756_v50  ;;  %2332 = vmatprep.subr.bf16.mxu0 %v1517_v33 }
 0x423   : > { %2373 = vmatprep.subr.bf16.mxu1 %v1773_v32  ;;  %v1646_v32 = vunpack.c.l.s8.bf16 %v1214_v9 }
 0x425   : > { %2333 = vmatpush1.bf16.msra.mxu0 %v1516_v56 }
 0x426   : > { %2374 = vmatpush1.bf16.msra.mxu1 %v1772_v31  ;;  %2334 = vmatprep.subr.bf16.mxu0 %v1533_v24  ;;  %v1663_v24 = vunpack.c.h.s8.bf16 %v1215_v48  ;;  %v1279_v48 = vld [vmem:[%s4147_s19 + $0x7f8] sm:$0xff] }
 0x427   : > { %2375 = vmatprep.subr.bf16.mxu1 %v1789_v26  ;;  %v1103_v26 = vld [vmem:[%s4147_s19 + $0x278] sm:$0xff] }
 0x429   : > { %2335 = vmatpush1.bf16.msra.mxu0 %v1532_v44  ;;  %v1406_v44 = vunpack.c.h.s8.bf16 %v1086_v7  ;;  %v1150_v7 = vld [vmem:[%s4147_s19 + $0x3f0] sm:$0xff] }
 0x42a   : > { %2376 = vmatpush1.bf16.msra.mxu1 %v1788_v29  ;;  %2386 = vmatprep.subr.bf16.mxu0 %v1295_v13  ;;  %v1662_v29 = vunpack.c.h.s8.bf16 %v1214_v9  ;;  %v1423_v13 = vunpack.c.l.s8.bf16 %v1103_v26  ;;  %v1518_v9 = vunpack.c.l.s8.bf16 %v1150_v7 }
 0x42b   : > { %2427 = vmatprep.subr.bf16.mxu1 %v1551_v4  ;;  %v1679_v4 = vunpack.c.l.s8.bf16 %v1231_v27 }
 0x42c   : > { %2337 = vmatmul.mubr.bf16.vlgmr.msra.gmra.mrb[24].mxu0 %v4518_v8 }
 0x42d   : > { %2378 = vmatmul.mubr.bf16.vlgmr.msra.gmra.mrb[24].mxu1 %v4522_v43  ;;  %2387 = vmatpush1.bf16.msra.mxu0 %v1294_v14  ;;  %v1422_v14 = vunpack.c.l.s8.bf16 %v1102_v45 }
 0x42e   : > { %2418 = vmatprep.mubr.bf16.mxu0 %v4520_v11  ;;  %2428 = vmatpush1.bf16.msra.mxu1 %v1550_v46  ;;  %v1343_v11 = vunpack.c.h.s8.bf16 %v1055_v15  ;;  %v1678_v46 = vunpack.c.l.s8.bf16 %v1230_v49  ;;  %v1695_v15 = vunpack.c.h.s8.bf16 %v1231_v27 }
 0x42f   : > { %2459 = vmatprep.mubr.bf16.mxu1 %v4524_v1  ;;  %2388 = vmatprep.subr.bf16.mxu0 %v1311_v51  ;;  %v1598_v1 = vunpack.c.h.s8.bf16 %v1182_v16  ;;  %v1439_v51 = vunpack.c.h.s8.bf16 %v1103_v26  ;;  %v1246_v16 = vld [vmem:[%s4147_s19 + $0x6f0] sm:$0xff] }
 0x430   : > { %2429 = vmatprep.subr.bf16.mxu1 %v1567_v17  ;;  %v1119_v17 = vld [vmem:[%s4147_s19 + $0x2f8] sm:$0xff] }
 0x431   : > { %2389 = vmatpush1.bf16.msra.mxu0 %v1310_v6  ;;  %v1438_v6 = vunpack.c.h.s8.bf16 %v1102_v45  ;;  %v1803_v45 = vld [vmem:[#allocation2 + $0x58] sm:$0xff] }
 0x432   : > { %2430 = vmatpush1.bf16.msra.mxu1 %v1566_v22  ;;  %2390 = vmatprep.subr.bf16.mxu0 %v1327_v38  ;;  %v1694_v22 = vunpack.c.h.s8.bf16 %v1230_v49  ;;  %v1455_v38 = vunpack.c.l.s8.bf16 %v1119_v17 }
 0x433   : > { %2431 = vmatprep.subr.bf16.mxu1 %v1583_v53  ;;  %v1711_v53 = vunpack.c.l.s8.bf16 %v1247_v37 }
 0x435   : > { %2391 = vmatpush1.bf16.msra.mxu0 %v1326_v54  ;;  %v1454_v54 = vunpack.c.l.s8.bf16 %v1118_v47 }
 0x436   : > { %2432 = vmatpush1.bf16.msra.mxu1 %v1582_v60  ;;  %2392 = vmatprep.subr.bf16.mxu0 %v1343_v11  ;;  %v1710_v60 = vunpack.c.l.s8.bf16 %v1246_v16  ;;  %v1471_v11 = vunpack.c.h.s8.bf16 %v1119_v17 }
 0x437   : > { %2433 = vmatprep.subr.bf16.mxu1 %v1599_v39  ;;  %v1727_v39 = vunpack.c.h.s8.bf16 %v1247_v37 }
 0x439   : > { %2393 = vmatpush1.bf16.msra.mxu0 %v1342_v10  ;;  %v1470_v10 = vunpack.c.h.s8.bf16 %v1118_v47 }
 0x43a   : > { %2434 = vmatpush1.bf16.msra.mxu1 %v1598_v1  ;;  %2394 = vmatprep.subr.bf16.mxu0 %v1359_v0  ;;  %v1726_v1 = vunpack.c.h.s8.bf16 %v1246_v16  ;;  %v1487_v0 = vunpack.c.l.s8.bf16 %v1135_v55  ;;  %v1805_v16 = vld [vmem:[#allocation2 + $0x68] sm:$0xff] }
 0x43b   : > { %2435 = vmatprep.subr.bf16.mxu1 %v1615_v25  ;;  %v1743_v25 = vunpack.c.l.s8.bf16 %v1263_v61 }
 0x43d   : > { %2395 = vmatpush1.bf16.msra.mxu0 %v1358_v18  ;;  %v1486_v18 = vunpack.c.l.s8.bf16 %v1134_v62 }
 0x43e   : > { %2436 = vmatpush1.bf16.msra.mxu1 %v1614_v52  ;;  %2396 = vmatprep.subr.bf16.mxu0 %v1375_v36  ;;  %v1742_v52 = vunpack.c.l.s8.bf16 %v1262_v40  ;;  %v1503_v36 = vunpack.c.h.s8.bf16 %v1135_v55 }
 0x43f   : > { %v2092_v20 = vpop.f32.mrb[12].mxu0  ;;  %2437 = vmatprep.subr.bf16.mxu1 %v1631_v19  ;;  %v1759_v19 = vunpack.c.h.s8.bf16 %v1263_v61 }
 0x440   : > { %v2133_v12 = vpop.f32.mrb[12].mxu1  ;;  %v2094_v3 = vpop.f32.mrb[13].mxu0 }
 0x441   : > { %v2134_v28 = vadd.f32 %v2133_v12, %v2092_v20  ;;  %v2135_v41 = vpop.f32.mrb[13].mxu1  ;;  %v2096_v42 = vpop.f32.mrb[14].mxu0  ;;  %2397 = vmatpush1.bf16.msra.mxu0 %v1374_v57  ;;  %v1502_v57 = vunpack.c.h.s8.bf16 %v1134_v62  ;;  %v1775_v20 = vunpack.c.l.s8.bf16 %v1279_v48  ;;  %v1535_v12 = vunpack.c.h.s8.bf16 %v1151_v35  ;;  %v1806_v62 = vld [vmem:[#allocation2 + $0x70] sm:$0xff] }
 0x442   : > { %v2136_v50 = vadd.f32 %v2135_v41, %v2094_v3  ;;  %v2137_v33 = vpop.f32.mrb[14].mxu1  ;;  %2438 = vmatpush1.bf16.msra.mxu1 %v1630_v59  ;;  %v2097_v58 = vpop.f32.mrb[15].mxu0  ;;  %2398 = vmatprep.subr.bf16.mxu0 %v1391_v34  ;;  %v1758_v59 = vunpack.c.h.s8.bf16 %v1262_v40  ;;  %v1519_v34 = vunpack.c.l.s8.bf16 %v1151_v35  ;;  %v1791_v3 = vunpack.c.h.s8.bf16 %v1279_v48  ;;  %v1800_v42 = vld [vmem:[#allocation2 + $0x40] sm:$0xff] }
 0x443   : > { %v2474_v56 = vadd.f32 %v2134_v28, %v1798_v2  ;;  %v2138_v31 = vpop.f32.mrb[15].mxu1  ;;  %2439 = vmatprep.subr.bf16.mxu1 %v1647_v5  ;;  %v1278_v5 = vld [vmem:[%s4147_s19 + $0x7f0] sm:$0xff]  ;;  %v1534_v28 = vunpack.c.h.s8.bf16 %v1150_v7 }
 0x444   : > { %v2475_v30 = vadd.f32 %v2136_v50, %v1799_v21  ;;  %v1774_v2 = vunpack.c.l.s8.bf16 %v1278_v5  ;;  %v1790_v21 = vunpack.c.h.s8.bf16 %v1278_v5  ;;  %v1801_v58 = vld [vmem:[#allocation2 + $0x48] sm:$0xff] }
 0x445   : > { %2490 = vst [vmem:[#allocation2 + $0x30] sm:$0xff] %v2474_v56  ;;  %2399 = vmatpush1.bf16.msra.mxu0 %v1390_v63  ;;  %v2561_v5 = vld [vmem:[%s5197_s4 + $0x88] sm:$0xff] (!%p3169_p3) }
 0x446   : > { %2491 = vst [vmem:[#allocation2 + $0x38] sm:$0xff] %v2475_v30  ;;  %2440 = vmatpush1.bf16.msra.mxu1 %v1646_v32  ;;  %2400 = vmatprep.subr.bf16.mxu0 %v1407_v23 }
 0x447   : > { %2441 = vmatprep.subr.bf16.mxu1 %v1663_v24 }
 0x449   : > { %2401 = vmatpush1.bf16.msra.mxu0 %v1406_v44 }
 0x44a   : > { %2442 = vmatpush1.bf16.msra.mxu1 %v1662_v29  ;;  %2402 = vmatprep.subr.bf16.mxu0 %v1423_v13 }
 0x44b   : > { %2443 = vmatprep.subr.bf16.mxu1 %v1679_v4 }
 0x44d   : > { %2403 = vmatpush1.bf16.msra.mxu0 %v1422_v14 }
 0x44e   : > { %2444 = vmatpush1.bf16.msra.mxu1 %v1678_v46  ;;  %2404 = vmatprep.subr.bf16.mxu0 %v1439_v51 }
 0x44f   : > { %2445 = vmatprep.subr.bf16.mxu1 %v1695_v15 }
 0x451   : > { %2405 = vmatpush1.bf16.msra.mxu0 %v1438_v6 }
 0x452   : > { %2446 = vmatpush1.bf16.msra.mxu1 %v1694_v22  ;;  %2406 = vmatprep.subr.bf16.mxu0 %v1455_v38  ;;  %v1804_v22 = vld [vmem:[#allocation2 + $0x60] sm:$0xff] }
 0x453   : > { %2447 = vmatprep.subr.bf16.mxu1 %v1711_v53 }
 0x455   : > { %2407 = vmatpush1.bf16.msra.mxu0 %v1454_v54 }
 0x456   : > { %2448 = vmatpush1.bf16.msra.mxu1 %v1710_v60  ;;  %2408 = vmatprep.subr.bf16.mxu0 %v1471_v11 }
 0x457   : > { %2449 = vmatprep.subr.bf16.mxu1 %v1727_v39 }
 0x459   : > { %2409 = vmatpush1.bf16.msra.mxu0 %v1470_v10 }
 0x45a   : > { %2450 = vmatpush1.bf16.msra.mxu1 %v1726_v1  ;;  %2410 = vmatprep.subr.bf16.mxu0 %v1487_v0 }
 0x45b   : > { %2451 = vmatprep.subr.bf16.mxu1 %v1743_v25 }
 0x45d   : > { %2411 = vmatpush1.bf16.msra.mxu0 %v1486_v18 }
 0x45e   : > { %2452 = vmatpush1.bf16.msra.mxu1 %v1742_v52  ;;  %2412 = vmatprep.subr.bf16.mxu0 %v1503_v36  ;;  %v1807_v52 = vld [vmem:[#allocation2 + $0x78] sm:$0xff] }
 0x45f   : > { %2453 = vmatprep.subr.bf16.mxu1 %v1759_v19 }
 0x461   : > { %2413 = vmatpush1.bf16.msra.mxu0 %v1502_v57 }
 0x462   : > { %2454 = vmatpush1.bf16.msra.mxu1 %v1758_v59  ;;  %2414 = vmatprep.subr.bf16.mxu0 %v1519_v34 }
 0x463   : > { %2455 = vmatprep.subr.bf16.mxu1 %v1775_v20  ;;  %v2560_v20 = vld [vmem:[%s5197_s4 + $0x80] sm:$0xff] (!%p3169_p3) }
 0x465   : > { %2415 = vmatpush1.bf16.msra.mxu0 %v1518_v9  ;;  %v2544_v9 = vld [vmem:[%s5197_s4] sm:$0xff] (!%p3169_p3) }
 0x466   : > { %2456 = vmatpush1.bf16.msra.mxu1 %v1774_v2  ;;  %2416 = vmatprep.subr.bf16.mxu0 %v1535_v12  ;;  %v3346_v2 = vpack.c.bf16 (!%p3169_p3), %v2561_v5, %v2560_v20  ;;  %v2545_v12 = vld [vmem:[%s5197_s4 + $0x8] sm:$0xff] (!%p3169_p3)  ;;  %v2554_v5 = vld [vmem:[%s5197_s4 + $0x50] sm:$0xff] (!%p3169_p3) }
 0x467   : > { %2457 = vmatprep.subr.bf16.mxu1 %v1791_v3  ;;  %v2592_v3 = vld [vmem:[%s5197_s4 + $0x180] sm:$0xff] (!%p3169_p3) }
 0x469   : > { %2417 = vmatpush1.bf16.msra.mxu0 %v1534_v28  ;;  %v2593_v28 = vld [vmem:[%s5197_s4 + $0x188] sm:$0xff] (!%p3169_p3) }
 0x46a   : > { %2458 = vmatpush1.bf16.msra.mxu1 %v1790_v21  ;;  %v3348_v21 = vpack.c.bf16 (!%p3169_p3), %v2545_v12, %v2544_v9  ;;  %3347 = vmatprep.subr.bf16.mxu0 (!%p3169_p3), %v3346_v2  ;;  %v2555_v9 = vld [vmem:[%s5197_s4 + $0x58] sm:$0xff] (!%p3169_p3)  ;;  %v2586_v2 = vld [vmem:[%s5197_s4 + $0x150] sm:$0xff] (!%p3169_p3) }
 0x46c   : > { %2419 = vmatmul.mubr.bf16.vlgmr.msra.gmra.mrb[28].mxu0 %v4518_v8  ;;  %v1802_v8 = vld [vmem:[#allocation2 + $0x50] sm:$0xff] }
 0x46d   : > { %2460 = vmatmul.mubr.bf16.vlgmr.msra.gmra.mrb[28].mxu1 %v4522_v43  ;;  %3349 = vmatpush3.bf16.msra.mxu0 (!%p3169_p3), %v3348_v21  ;;  %v2573_v21 = vld [vmem:[%s5197_s4 + $0xe8] sm:$0xff] (!%p3169_p3) }
 0x47f   : > { %v2174_v41 = vpop.f32.mrb[16].mxu0 }
 0x480   : > { %v2215_v63 = vpop.f32.mrb[16].mxu1  ;;  %v2176_v50 = vpop.f32.mrb[17].mxu0 }
 0x481   : > { %v2216_v33 = vadd.f32 %v2215_v63, %v2174_v41  ;;  %v2217_v32 = vpop.f32.mrb[17].mxu1  ;;  %v2178_v23 = vpop.f32.mrb[18].mxu0  ;;  %v3378_v41 = vpack.c.bf16 (!%p3169_p3), %v2593_v28, %v2592_v3  ;;  %v2577_v63 = vld [vmem:[%s5197_s4 + $0x108] sm:$0xff] (!%p3169_p3)  ;;  %v2587_v3 = vld [vmem:[%s5197_s4 + $0x158] sm:$0xff] (!%p3169_p3)  ;;  %v2572_v28 = vld [vmem:[%s5197_s4 + $0xe0] sm:$0xff] (!%p3169_p3) }
 0x482   : > { %v2218_v56 = vadd.f32 %v2217_v32, %v2176_v50  ;;  %v2219_v31 = vpop.f32.mrb[18].mxu1  ;;  %v2179_v24 = vpop.f32.mrb[19].mxu0  ;;  %v2562_v50 = vld [vmem:[%s5197_s4 + $0x90] sm:$0xff] (!%p3169_p3)  ;;  %v2547_v23 = vld [vmem:[%s5197_s4 + $0x18] sm:$0xff] (!%p3169_p3) }
 0x483   : > { %v2476_v26 = vadd.f32 %v2216_v33, %v1800_v42  ;;  %v2220_v30 = vpop.f32.mrb[19].mxu1  ;;  %v2576_v42 = vld [vmem:[%s5197_s4 + $0x100] sm:$0xff] (!%p3169_p3)  ;;  %v2546_v32 = vld [vmem:[%s5197_s4 + $0x10] sm:$0xff] (!%p3169_p3)  ;;  %3379 = vmatprep.subr.bf16.mxu1 (!%p3169_p3), %v3378_v41 }
 0x484   : > { %v2477_v27 = vadd.f32 %v2218_v56, %v1801_v58  ;;  %v3380_v33 = vpack.c.bf16 (!%p3169_p3), %v2577_v63, %v2576_v42  ;;  %v2563_v58 = vld [vmem:[%s5197_s4 + $0x98] sm:$0xff] (!%p3169_p3)  ;;  %v3352_v31 = vpack.c.bf16 (!%p3169_p3), %v2547_v23, %v2546_v32  ;;  %v2594_v24 = vld [vmem:[%s5197_s4 + $0x190] sm:$0xff] (!%p3169_p3)  ;;  %v2604_v41 = vld [vmem:[%s5197_s4 + $0x1e0] sm:$0xff] (!%p3169_p3)  ;;  %v3368_v63 = vpack.c.bf16 (!%p3169_p3), %v2555_v9, %v2554_v5 }
 0x485   : > { %2492 = vst [vmem:[#allocation2 + $0x40] sm:$0xff] %v2476_v26  ;;  %v3350_v56 = vpack.c.bf16 (!%p3169_p3), %v2563_v58, %v2562_v50  ;;  %v2595_v26 = vld [vmem:[%s5197_s4 + $0x198] sm:$0xff] (!%p3169_p3)  ;;  %v2578_v30 = vld [vmem:[%s5197_s4 + $0x110] sm:$0xff] (!%p3169_p3)  ;;  %v2605_v42 = vld [vmem:[%s5197_s4 + $0x1e8] sm:$0xff] (!%p3169_p3)  ;;  %v3400_v32 = vpack.c.bf16 (!%p3169_p3), %v2587_v3, %v2586_v2  ;;  %v3370_v23 = vpack.c.bf16 (!%p3169_p3), %v2573_v21, %v2572_v28 }
 0x486   : > { %2493 = vst [vmem:[#allocation2 + $0x48] sm:$0xff] %v2477_v27  ;;  %3381 = vmatpush3.bf16.msra.mxu1 (!%p3169_p3), %v3380_v33  ;;  %v3382_v27 = vpack.c.bf16 (!%p3169_p3), %v2595_v26, %v2594_v24  ;;  %v2556_v50 = vld [vmem:[%s5197_s4 + $0x60] sm:$0xff] (!%p3169_p3)  ;;  %v2557_v33 = vld [vmem:[%s5197_s4 + $0x68] sm:$0xff] (!%p3169_p3)  ;;  %v3402_v26 = vpack.c.bf16 (!%p3169_p3), %v2605_v42, %v2604_v41  ;;  %v2610_v3 = vld [vmem:[%s5197_s4 + $0x210] sm:$0xff] (!%p3169_p3) }
 0x487   : > { %3351 = vmatprep.subr.bf16.mxu0 (!%p3169_p3), %v3350_v56  ;;  %v2588_v58 = vld [vmem:[%s5197_s4 + $0x160] sm:$0xff] (!%p3169_p3)  ;;  %v2589_v56 = vld [vmem:[%s5197_s4 + $0x168] sm:$0xff] (!%p3169_p3)  ;;  %v2611_v28 = vld [vmem:[%s5197_s4 + $0x218] sm:$0xff] (!%p3169_p3) }
 0x488   : > { %3383 = vmatprep.subr.bf16.mxu1 (!%p3169_p3), %v3382_v27  ;;  %3353 = vmatpush3.bf16.msra.mxu0 (!%p3169_p3), %v3352_v31  ;;  %v2505_v31 = vld [vmem:[#allocation2 + $0x8] sm:$0xff] (!%p3169_p3)  ;;  %v2575_v27 = vld [vmem:[%s5197_s4 + $0xf8] sm:$0xff] (!%p3169_p3)  ;;  %v2642_v21 = vld [vmem:[%s5197_s4 + $0x310] sm:$0xff] (!%p3169_p3) }
 0x489   : > { %v2643_v42 = vld [vmem:[%s5197_s4 + $0x318] sm:$0xff] (!%p3169_p3) }
 0x48d   : > { %v2513_v24 = vld [vmem:[#allocation2 + $0x48] sm:$0xff] (!%p3169_p3) }
 0x4bf   : > { %v2256_v44 = vpop.f32.mrb[20].mxu0 }
 0x4c0   : > { %v2297_v29 = vpop.f32.mrb[20].mxu1  ;;  %v2258_v43 = vpop.f32.mrb[21].mxu0 }
 0x4c1   : > { %v2298_v13 = vadd.f32 %v2297_v29, %v2256_v44  ;;  %v2299_v4 = vpop.f32.mrb[21].mxu1  ;;  %v2260_v49 = vpop.f32.mrb[22].mxu0  ;;  %v2579_v44 = vld [vmem:[%s5197_s4 + $0x118] sm:$0xff] (!%p3169_p3)  ;;  %v2565_v29 = vld [vmem:[%s5197_s4 + $0xa8] sm:$0xff] (!%p3169_p3) }
 0x4c2   : > { %v2300_v14 = vadd.f32 %v2299_v4, %v2258_v43  ;;  %v2301_v46 = vpop.f32.mrb[22].mxu1  ;;  %v2261_v51 = vpop.f32.mrb[23].mxu0  ;;  %v3384_v43 = vpack.c.bf16 (!%p3169_p3), %v2579_v44, %v2578_v30  ;;  %v2549_v4 = vld [vmem:[%s5197_s4 + $0x28] sm:$0xff] (!%p3169_p3)  ;;  %v2596_v49 = vld [vmem:[%s5197_s4 + $0x1a0] sm:$0xff] (!%p3169_p3)  ;;  %v2574_v30 = vld [vmem:[%s5197_s4 + $0xf0] sm:$0xff] (!%p3169_p3) }
 0x4c3   : > { %v2478_v15 = vadd.f32 %v2298_v13, %v1802_v8  ;;  %v2302_v17 = vpop.f32.mrb[23].mxu1  ;;  %v2564_v8 = vld [vmem:[%s5197_s4 + $0xa0] sm:$0xff] (!%p3169_p3)  ;;  %v2581_v51 = vld [vmem:[%s5197_s4 + $0x128] sm:$0xff] (!%p3169_p3)  ;;  %v2606_v44 = vld [vmem:[%s5197_s4 + $0x1f0] sm:$0xff] (!%p3169_p3) }
 0x4c4   : > { %v2479_v37 = vadd.f32 %v2300_v14, %v1803_v45  ;;  %v3354_v13 = vpack.c.bf16 (!%p3169_p3), %v2565_v29, %v2564_v8  ;;  %v2548_v45 = vld [vmem:[%s5197_s4 + $0x20] sm:$0xff] (!%p3169_p3)  ;;  %v2597_v14 = vld [vmem:[%s5197_s4 + $0x1a8] sm:$0xff] (!%p3169_p3)  ;;  %3385 = vmatpush3.bf16.msra.mxu1 (!%p3169_p3), %v3384_v43  ;;  %v2521_v8 = vmul.f32 (!%p3169_p3), %v2505_v31, %v2505_v31  ;;  %v2529_v29 = vmul.f32 (!%p3169_p3), %v2513_v24, %v2513_v24  ;;  %v2558_v43 = vld [vmem:[%s5197_s4 + $0x70] sm:$0xff] (!%p3169_p3) }
 0x4c5   : > { %2494 = vst [vmem:[#allocation2 + $0x50] sm:$0xff] %v2478_v15  ;;  %v2580_v46 = vld [vmem:[%s5197_s4 + $0x120] sm:$0xff] (!%p3169_p3)  ;;  %v3356_v15 = vpack.c.bf16 (!%p3169_p3), %v2549_v4, %v2548_v45  ;;  %v3386_v17 = vpack.c.bf16 (!%p3169_p3), %v2597_v14, %v2596_v49  ;;  %v2507_v45 = vld [vmem:[#allocation2 + $0x18] sm:$0xff] (!%p3169_p3)  ;;  %v3372_v49 = vpack.c.bf16 (!%p3169_p3), %v2557_v33, %v2556_v50  ;;  %v2629_v50 = vld [vmem:[%s5197_s4 + $0x2a8] sm:$0xff] (!%p3169_p3) }
 0x4c6   : > { %2495 = vst [vmem:[#allocation2 + $0x58] sm:$0xff] %v2479_v37  ;;  %v2566_v37 = vld [vmem:[%s5197_s4 + $0xb0] sm:$0xff] (!%p3169_p3)  ;;  %3355 = vmatprep.subr.bf16.mxu0 (!%p3169_p3), %v3354_v13  ;;  %v2607_v13 = vld [vmem:[%s5197_s4 + $0x1f8] sm:$0xff] (!%p3169_p3)  ;;  %v2660_v33 = vld [vmem:[%s5197_s4 + $0x3a0] sm:$0xff] (!%p3169_p3) }
 0x4c7   : > { %3387 = vmatprep.subr.bf16.mxu1 (!%p3169_p3), %v3386_v17  ;;  %3357 = vmatpush3.bf16.msra.mxu0 (!%p3169_p3), %v3356_v15  ;;  %v2559_v14 = vld [vmem:[%s5197_s4 + $0x78] sm:$0xff] (!%p3169_p3)  ;;  %v2512_v15 = vld [vmem:[#allocation2 + $0x40] sm:$0xff] (!%p3169_p3)  ;;  %v2523_v17 = vmul.f32 (!%p3169_p3), %v2507_v45, %v2507_v45  ;;  %v2613_v24 = vld [vmem:[%s5197_s4 + $0x228] sm:$0xff] (!%p3169_p3) }
 0x4c8   : > { %v2612_v31 = vld [vmem:[%s5197_s4 + $0x220] sm:$0xff] (!%p3169_p3) }
 0x4cd   : > { %v2515_v4 = vld [vmem:[#allocation2 + $0x58] sm:$0xff] (!%p3169_p3) }
 0x4ff   : > { %v2338_v6 = vpop.f32.mrb[24].mxu0 }
 0x500   : > { %v2379_v38 = vpop.f32.mrb[24].mxu1  ;;  %v2340_v47 = vpop.f32.mrb[25].mxu0 }
 0x501   : > { %v2380_v53 = vadd.f32 %v2379_v38, %v2338_v6  ;;  %v2381_v54 = vpop.f32.mrb[25].mxu1  ;;  %v2342_v60 = vpop.f32.mrb[26].mxu0  ;;  %v2567_v6 = vld [vmem:[%s5197_s4 + $0xb8] sm:$0xff] (!%p3169_p3)  ;;  %v3388_v38 = vpack.c.bf16 (!%p3169_p3), %v2581_v51, %v2580_v46  ;;  %v2537_v46 = vadd.f32 (!%p3169_p3), %v2529_v29, %v2521_v8  ;;  %v2504_v51 = vld [vmem:[#allocation2] sm:$0xff] (!%p3169_p3)  ;;  %v2662_v29 = vld [vmem:[%s5197_s4 + $0x3b0] sm:$0xff] (!%p3169_p3) }
 0x502   : > { %v2382_v11 = vadd.f32 %v2381_v54, %v2340_v47  ;;  %v2383_v39 = vpop.f32.mrb[26].mxu1  ;;  %v2343_v55 = vpop.f32.mrb[27].mxu0  ;;  %v3358_v47 = vpack.c.bf16 (!%p3169_p3), %v2567_v6, %v2566_v37  ;;  %v2599_v54 = vld [vmem:[%s5197_s4 + $0x1b8] sm:$0xff] (!%p3169_p3)  ;;  %v2531_v37 = vmul.f32 (!%p3169_p3), %v2515_v4, %v2515_v4  ;;  %v3404_v6 = vpack.c.bf16 (!%p3169_p3), %v2589_v56, %v2588_v58  ;;  %v2661_v58 = vld [vmem:[%s5197_s4 + $0x3a8] sm:$0xff] (!%p3169_p3) }
 0x503   : > { %v2480_v61 = vadd.f32 %v2380_v53, %v1804_v22  ;;  %v2384_v10 = vpop.f32.mrb[27].mxu1  ;;  %v2550_v22 = vld [vmem:[%s5197_s4 + $0x30] sm:$0xff] (!%p3169_p3)  ;;  %v2551_v53 = vld [vmem:[%s5197_s4 + $0x38] sm:$0xff] (!%p3169_p3)  ;;  %v2568_v55 = vld [vmem:[%s5197_s4 + $0xc0] sm:$0xff] (!%p3169_p3)  ;;  %3389 = vmatpush3.bf16.msra.mxu1 (!%p3169_p3), %v3388_v38  ;;  %2743 = vmatprep.mubr.f32.mxu0 (!%p3169_p3), %v2537_v46 }
 0x504   : > { %v2481_v1 = vadd.f32 %v2382_v11, %v1805_v16  ;;  %v2598_v16 = vld [vmem:[%s5197_s4 + $0x1b0] sm:$0xff] (!%p3169_p3)  ;;  %v2583_v39 = vld [vmem:[%s5197_s4 + $0x138] sm:$0xff] (!%p3169_p3)  ;;  %v3360_v10 = vpack.c.bf16 (!%p3169_p3), %v2551_v53, %v2550_v22  ;;  %3359 = vmatprep.subr.bf16.mxu0 (!%p3169_p3), %v3358_v47  ;;  %v3374_v22 = vpack.c.bf16 (!%p3169_p3), %v2575_v27, %v2574_v30  ;;  %v3450_v30 = vpack.c.bf16 (!%p3169_p3), %v2661_v58, %v2660_v33  ;;  %v2645_v27 = vld [vmem:[%s5197_s4 + $0x328] sm:$0xff] (!%p3169_p3) }
 0x505   : > { %2496 = vst [vmem:[#allocation2 + $0x60] sm:$0xff] %v2480_v61  ;;  %v3390_v60 = vpack.c.bf16 (!%p3169_p3), %v2599_v54, %v2598_v16  ;;  %v2582_v11 = vld [vmem:[%s5197_s4 + $0x130] sm:$0xff] (!%p3169_p3)  ;;  %v2569_v61 = vld [vmem:[%s5197_s4 + $0xc8] sm:$0xff] (!%p3169_p3)  ;;  %v3406_v16 = vpack.c.bf16 (!%p3169_p3), %v2607_v13, %v2606_v44  ;;  %v2591_v54 = vld [vmem:[%s5197_s4 + $0x178] sm:$0xff] (!%p3169_p3)  ;;  %v3420_v13 = vpack.c.bf16 (!%p3169_p3), %v2613_v24, %v2612_v31 }
 0x506   : > { %2497 = vst [vmem:[#allocation2 + $0x68] sm:$0xff] %v2481_v1  ;;  %v2600_v1 = vld [vmem:[%s5197_s4 + $0x1c0] sm:$0xff] (!%p3169_p3)  ;;  %3361 = vmatpush3.bf16.msra.mxu0 (!%p3169_p3), %v3360_v10  ;;  %v2590_v38 = vld [vmem:[%s5197_s4 + $0x170] sm:$0xff] (!%p3169_p3)  ;;  %v2631_v8 = vld [vmem:[%s5197_s4 + $0x2b8] sm:$0xff] (!%p3169_p3) }
 0x507   : > { %3391 = vmatprep.subr.bf16.mxu1 (!%p3169_p3), %v3390_v60  ;;  %v2506_v47 = vld [vmem:[#allocation2 + $0x10] sm:$0xff] (!%p3169_p3)  ;;  %v2624_v60 = vld [vmem:[%s5197_s4 + $0x280] sm:$0xff] (!%p3169_p3)  ;;  %v2621_v33 = vld [vmem:[%s5197_s4 + $0x268] sm:$0xff] (!%p3169_p3) }
 0x508   : > { %v2514_v53 = vld [vmem:[#allocation2 + $0x50] sm:$0xff] (!%p3169_p3)  ;;  %v2656_v10 = vld [vmem:[%s5197_s4 + $0x380] sm:$0xff] (!%p3169_p3)  ;;  %v2639_v31 = vld [vmem:[%s5197_s4 + $0x2f8] sm:$0xff] (!%p3169_p3) }
 0x509   : > { %v2630_v44 = vld [vmem:[%s5197_s4 + $0x2b0] sm:$0xff] (!%p3169_p3)  ;;  %v2652_v58 = vld [vmem:[%s5197_s4 + $0x360] sm:$0xff] (!%p3169_p3) }
 0x50a   : > { %v3422_v4 = vpack.c.bf16 (!%p3169_p3), %v2631_v8, %v2630_v44  ;;  %v2646_v46 = vld [vmem:[%s5197_s4 + $0x330] sm:$0xff] (!%p3169_p3)  ;;  %v2508_v44 = vld [vmem:[#allocation2 + $0x20] sm:$0xff] (!%p3169_p3) }
 0x50b   : > { %v2670_v24 = vld [vmem:[%s5197_s4 + $0x3f0] sm:$0xff] (!%p3169_p3) }
 0x50c   : > { %v2516_v8 = vld [vmem:[#allocation2 + $0x60] sm:$0xff] (!%p3169_p3) }
 0x53f   : > { %v2420_v0 = vpop.f32.mrb[28].mxu0 }
 0x540   : > { %v2461_v25 = vpop.f32.mrb[28].mxu1  ;;  %v2422_v40 = vpop.f32.mrb[29].mxu0  ;;  %2503 = sbr.rel (%p3169_p3) target bundleno = 1836 (0x72c), region = 84 }
 0x541   : > { %v2462_v18 = vadd.f32 %v2461_v25, %v2420_v0  ;;  %v2463_v36 = vpop.f32.mrb[29].mxu1  ;;  %v2424_v19 = vpop.f32.mrb[30].mxu0  ;;  %v2601_v0 = vld [vmem:[%s5197_s4 + $0x1c8] sm:$0xff] (!%p3169_p3)  ;;  %v3362_v25 = vpack.c.bf16 (!%p3169_p3), %v2569_v61, %v2568_v55  ;;  %v2520_v55 = vmul.f32 (!%p3169_p3), %v2504_v51, %v2504_v51  ;;  %v2528_v61 = vmul.f32 (!%p3169_p3), %v2512_v15, %v2512_v15  ;;  %v2647_v15 = vld [vmem:[%s5197_s4 + $0x338] sm:$0xff] (!%p3169_p3) }
 0x542   : > { %v2464_v35 = vadd.f32 %v2463_v36, %v2422_v40  ;;  %v2465_v48 = vpop.f32.mrb[30].mxu1  ;;  %v2425_v57 = vpop.f32.mrb[31].mxu0  ;;  %v2552_v40 = vld [vmem:[%s5197_s4 + $0x40] sm:$0xff] (!%p3169_p3)  ;;  %v3394_v36 = vpack.c.bf16 (!%p3169_p3), %v2601_v0, %v2600_v1  ;;  %v2585_v19 = vld [vmem:[%s5197_s4 + $0x148] sm:$0xff] (!%p3169_p3)  ;;  %v3376_v0 = vpack.c.bf16 (!%p3169_p3), %v2559_v14, %v2558_v43  ;;  %v2663_v43 = vld [vmem:[%s5197_s4 + $0x3b8] sm:$0xff] (!%p3169_p3) }
 0x543   : > { %v2482_v59 = vadd.f32 %v2462_v18, %v1806_v62  ;;  %v2466_v34 = vpop.f32.mrb[31].mxu1  ;;  %v3392_v62 = vpack.c.bf16 (!%p3169_p3), %v2583_v39, %v2582_v11  ;;  %v2553_v18 = vld [vmem:[%s5197_s4 + $0x48] sm:$0xff] (!%p3169_p3)  ;;  %v2571_v48 = vld [vmem:[%s5197_s4 + $0xd8] sm:$0xff] (!%p3169_p3)  ;;  %v2602_v57 = vld [vmem:[%s5197_s4 + $0x1d0] sm:$0xff] (!%p3169_p3)  ;;  %3363 = vmatprep.subr.bf16.mxu0 (!%p3169_p3), %v3362_v25  ;;  %v2539_v39 = vadd.f32 (!%p3169_p3), %v2531_v37, %v2523_v17  ;;  %v2530_v25 = vmul.f32 (!%p3169_p3), %v2514_v53, %v2514_v53 }
 0x544   : > { %v2483_v7 = vadd.f32 %v2464_v35, %v1807_v52  ;;  %v2584_v52 = vld [vmem:[%s5197_s4 + $0x140] sm:$0xff] (!%p3169_p3)  ;;  %v2570_v35 = vld [vmem:[%s5197_s4 + $0xd0] sm:$0xff] (!%p3169_p3)  ;;  %v3364_v34 = vpack.c.bf16 (!%p3169_p3), %v2553_v18, %v2552_v40  ;;  %v2625_v11 = vld [vmem:[%s5197_s4 + $0x288] sm:$0xff] (!%p3169_p3)  ;;  %v3408_v40 = vpack.c.bf16 (!%p3169_p3), %v2591_v54, %v2590_v38  ;;  %v3454_v51 = vpack.c.bf16 (!%p3169_p3), %v2663_v43, %v2662_v29 }
 0x545   : > { %2498 = vst [vmem:[#allocation2 + $0x70] sm:$0xff] %v2482_v59  ;;  %v2603_v59 = vld [vmem:[%s5197_s4 + $0x1d8] sm:$0xff] (!%p3169_p3)  ;;  %3393 = vmatpush3.bf16.msra.mxu1 (!%p3169_p3), %v3392_v62  ;;  %v3366_v20 = vpack.c.bf16 (!%p3169_p3), %v2571_v48, %v2570_v35  ;;  %v2657_v1 = vld [vmem:[%s5197_s4 + $0x388] sm:$0xff] (!%p3169_p3)  ;;  %2813 = vmatprep.mubr.f32.mxu1 (!%p3169_p3), %v2539_v39  ;;  %v2522_v62 = vmul.f32 (!%p3169_p3), %v2506_v47, %v2506_v47  ;;  %v2632_v17 = vld [vmem:[%s5197_s4 + $0x2c0] sm:$0xff] (!%p3169_p3) }
 0x546   : > { %2499 = vst [vmem:[#allocation2 + $0x78] sm:$0xff] %v2483_v7  ;;  %v3396_v7 = vpack.c.bf16 (!%p3169_p3), %v2585_v19, %v2584_v52  ;;  %3395 = vmatprep.subr.bf16.mxu1 (!%p3169_p3), %v3394_v36  ;;  %v3398_v12 = vpack.c.bf16 (!%p3169_p3), %v2603_v59, %v2602_v57  ;;  %3365 = vmatpush3.bf16.msra.mxu0 (!%p3169_p3), %v3364_v34  ;;  %v2608_v52 = vld [vmem:[%s5197_s4 + $0x200] sm:$0xff] (!%p3169_p3)  ;;  %v2609_v36 = vld [vmem:[%s5197_s4 + $0x208] sm:$0xff] (!%p3169_p3)  ;;  %v2626_v57 = vld [vmem:[%s5197_s4 + $0x290] sm:$0xff] (!%p3169_p3) }
 0x547   : > { %3367 = vmatprep.subr.bf16.mxu0 %v3366_v20  ;;  %v3410_v18 = vpack.c.bf16 %v2625_v11, %v2624_v60  ;;  %v2640_v19 = vld [vmem:[%s5197_s4 + $0x300] sm:$0xff]  ;;  %v3442_v35 = vpack.c.bf16 %v2657_v1, %v2656_v10  ;;  %v2641_v48 = vld [vmem:[%s5197_s4 + $0x308] sm:$0xff]  ;;  %v2627_v59 = vld [vmem:[%s5197_s4 + $0x298] sm:$0xff]  ;;  %v2536_v34 = vadd.f32 %v2528_v61, %v2520_v55  ;;  %v3412_v5 = vpack.c.bf16 %v2609_v36, %v2608_v52 }
 0x548   : > { %v2659_v20 = vld [vmem:[%s5197_s4 + $0x398] sm:$0xff]  ;;  %v2538_v9 = vadd.f32 %v2530_v25, %v2522_v62  ;;  %v3444_v2 = vpack.c.bf16 %v2641_v48, %v2640_v19  ;;  %v2633_v37 = vld [vmem:[%s5197_s4 + $0x2c8] sm:$0xff]  ;;  %v2616_v47 = vld [vmem:[%s5197_s4 + $0x240] sm:$0xff]  ;;  %v3456_v54 = vpack.c.bf16 %v2647_v15, %v2646_v46  ;;  %v2532_v15 = vmul.f32 %v2516_v8, %v2516_v8 }
 0x549   : > { %3397 = vmatpush3.bf16.msra.mxu1 %v3396_v7  ;;  %v2658_v7 = vld [vmem:[%s5197_s4 + $0x390] sm:$0xff]  ;;  %v2615_v14 = vld [vmem:[%s5197_s4 + $0x238] sm:$0xff]  ;;  %v2617_v53 = vld [vmem:[%s5197_s4 + $0x248] sm:$0xff]  ;;  %v3426_v60 = vpack.c.bf16 %v2633_v37, %v2632_v17 }
 0x54a   : > { %3399 = vmatprep.subr.bf16.mxu1 %v3398_v12  ;;  %3369 = vmatpush3.bf16.msra.mxu0 %v3368_v63  ;;  %v3414_v12 = vpack.c.bf16 %v2627_v59, %v2626_v57  ;;  %v3446_v41 = vpack.c.bf16 %v2659_v20, %v2658_v7  ;;  %v2628_v63 = vld [vmem:[%s5197_s4 + $0x2a0] sm:$0xff]  ;;  %v2649_v11 = vld [vmem:[%s5197_s4 + $0x348] sm:$0xff]  ;;  %v2634_v10 = vld [vmem:[%s5197_s4 + $0x2d0] sm:$0xff]  ;;  %v3428_v19 = vpack.c.bf16 %v2617_v53, %v2616_v47 }
 0x54b   : > { %3371 = vmatprep.subr.bf16.mxu0 %v3370_v23  ;;  %v3448_v23 = vpack.c.bf16 %v2643_v42, %v2642_v21  ;;  %v3418_v56 = vpack.c.bf16 %v2629_v50, %v2628_v63  ;;  %v2509_v39 = vld [vmem:[#allocation2 + $0x28] sm:$0xff]  ;;  %v2635_v1 = vld [vmem:[%s5197_s4 + $0x2d8] sm:$0xff]  ;;  %v2650_v20 = vld [vmem:[%s5197_s4 + $0x350] sm:$0xff] }
 0x54c   : > { %v2517_v55 = vld [vmem:[#allocation2 + $0x68] sm:$0xff]  ;;  %v2511_v25 = vld [vmem:[#allocation2 + $0x38] sm:$0xff]  ;;  %v3430_v59 = vpack.c.bf16 %v2635_v1, %v2634_v10  ;;  %v2620_v50 = vld [vmem:[%s5197_s4 + $0x260] sm:$0xff] }
 0x54d   : > { %3401 = vmatpush3.bf16.msra.mxu1 %v3400_v32  ;;  %v3416_v32 = vpack.c.bf16 %v2611_v28, %v2610_v3  ;;  %v2533_v62 = vmul.f32 %v2517_v55, %v2517_v55  ;;  %v2519_v52 = vld [vmem:[#allocation2 + $0x78] sm:$0xff]  ;;  %v2527_v36 = vmul.f32 %v2511_v25, %v2511_v25  ;;  %v2668_v28 = vld [vmem:[%s5197_s4 + $0x3e0] sm:$0xff]  ;;  %v2669_v21 = vld [vmem:[%s5197_s4 + $0x3e8] sm:$0xff] }
 0x54e   : > { %3403 = vmatprep.subr.bf16.mxu1 %v3402_v26  ;;  %3373 = vmatpush3.bf16.msra.mxu0 %v3372_v49  ;;  %v2644_v26 = vld [vmem:[%s5197_s4 + $0x320] sm:$0xff]  ;;  %v2614_v49 = vld [vmem:[%s5197_s4 + $0x230] sm:$0xff]  ;;  %v2535_v48 = vmul.f32 %v2519_v52, %v2519_v52  ;;  %v2619_v7 = vld [vmem:[%s5197_s4 + $0x258] sm:$0xff] }
 0x54f   : > { %3375 = vmatprep.subr.bf16.mxu0 %v3374_v22  ;;  %v3452_v45 = vpack.c.bf16 %v2645_v27, %v2644_v26  ;;  %v2665_v22 = vld [vmem:[%s5197_s4 + $0x3c8] sm:$0xff]  ;;  %v3424_v38 = vpack.c.bf16 %v2615_v14, %v2614_v49  ;;  %v2671_v26 = vld [vmem:[%s5197_s4 + $0x3f8] sm:$0xff]  ;;  %v2622_v27 = vld [vmem:[%s5197_s4 + $0x270] sm:$0xff] }
 0x550   : > { %v2543_v3 = vadd.f32 %v2535_v48, %v2527_v36  ;;  %v3470_v49 = vpack.c.bf16 %v2671_v26, %v2670_v24  ;;  %v2654_v14 = vld [vmem:[%s5197_s4 + $0x370] sm:$0xff]  ;;  %v2655_v46 = vld [vmem:[%s5197_s4 + $0x378] sm:$0xff]  ;;  %v2962_v53 = vld [vmem:[%s5199_s6] sm:$0xff] }
 0x551   : > { %3405 = vmatpush3.bf16.msra.mxu1 %v3404_v6  ;;  %v2664_v6 = vld [vmem:[%s5197_s4 + $0x3c0] sm:$0xff]  ;;  %v3170_v1 = vld [vmem:[#allocation13] ss:$0 sm:$0xff] }
 0x552   : > { %3407 = vmatprep.subr.bf16.mxu1 %v3406_v16  ;;  %3377 = vmatpush3.bf16.msra.mxu0 %v3376_v0  ;;  %v2648_v16 = vld [vmem:[%s5197_s4 + $0x340] sm:$0xff]  ;;  %v3458_v61 = vpack.c.bf16 %v2665_v22, %v2664_v6  ;;  %v2525_v0 = vmul.f32 %v2509_v39, %v2509_v39  ;;  %v3472_v22 = vpack.c.bf16 %v2655_v46, %v2654_v14  ;;  %v2965_v39 = vld [vmem:[%s5199_s6 + $0x18] sm:$0xff] }
 0x553   : > { %3411 = vmatprep.subr.bf16.mxu0 %v3410_v18  ;;  %v2667_v18 = vld [vmem:[%s5197_s4 + $0x3d8] sm:$0xff]  ;;  %v3460_v57 = vpack.c.bf16 %v2649_v11, %v2648_v16  ;;  %v2963_v16 = vld [vmem:[%s5199_s6 + $0x8] sm:$0xff]  ;;  %v2964_v11 = vld [vmem:[%s5199_s6 + $0x10] sm:$0xff] }
 0x554   : > { %v3478_v55 = vpack.c.bf16 %v2965_v39, %v2964_v11 }
 0x555   : > { %3409 = vmatpush3.bf16.msra.mxu1 %v3408_v40  ;;  %2744 = vmatmul.mubr.f32.vlgmr.msra.gmra.mrb[0].mxu0 %v2536_v34  ;;  %v2666_v40 = vld [vmem:[%s5197_s4 + $0x3d0] sm:$0xff] }
 0x556   : > { %3443 = vmatprep.subr.bf16.mxu1 %v3442_v35  ;;  %3413 = vmatpush3.bf16.msra.mxu0 %v3412_v5  ;;  %v2541_v35 = vadd.f32 %v2533_v62, %v2525_v0  ;;  %v2618_v34 = vld [vmem:[%s5197_s4 + $0x250] sm:$0xff]  ;;  %v3462_v5 = vpack.c.bf16 %v2667_v18, %v2666_v40 }
 0x557   : > { %3415 = vmatprep.subr.bf16.mxu0 %v3414_v12  ;;  %v2637_v12 = vld [vmem:[%s5197_s4 + $0x2e8] sm:$0xff] }
 0x558   : > { %2814 = vmatmul.mubr.f32.vlgmr.msra.gmra.mrb[0].mxu1 %v2538_v9  ;;  %v2651_v9 = vld [vmem:[%s5197_s4 + $0x358] sm:$0xff]  ;;  %2883 = vmatprep.mubr.f32.mxu0 %v2541_v35 }
 0x559   : > { %3445 = vmatpush3.bf16.msra.mxu1 %v3444_v2  ;;  %v2636_v2 = vld [vmem:[%s5197_s4 + $0x2e0] sm:$0xff]  ;;  %2953 = vmatprep.mubr.f32.mxu1 %v2543_v3  ;;  %v3464_v42 = vpack.c.bf16 %v2651_v9, %v2650_v20 }
 0x55a   : > { %3447 = vmatprep.subr.bf16.mxu1 %v3446_v41  ;;  %3417 = vmatpush3.bf16.msra.mxu0 %v3416_v32  ;;  %v3432_v41 = vpack.c.bf16 %v2619_v7, %v2618_v34  ;;  %v3434_v63 = vpack.c.bf16 %v2637_v12, %v2636_v2  ;;  %v3466_v32 = vpack.c.bf16 %v2669_v21, %v2668_v28  ;;  %v3171_v12 = vld [vmem:[#allocation14] ss:$0 sm:$0xff] }
 0x55b   : > { %3419 = vmatprep.subr.bf16.mxu0 %v3418_v56  ;;  %v2638_v56 = vld [vmem:[%s5197_s4 + $0x2f0] sm:$0xff] }
 0x55c   : > { %v3438_v43 = vpack.c.bf16 %v2639_v31, %v2638_v56 }
 0x55d   : > { %3449 = vmatpush3.bf16.msra.mxu1 %v3448_v23  ;;  %v2653_v23 = vld [vmem:[%s5197_s4 + $0x368] sm:$0xff] }
 0x55e   : > { %3451 = vmatprep.subr.bf16.mxu1 %v3450_v30  ;;  %3421 = vmatpush3.bf16.msra.mxu0 %v3420_v13  ;;  %v3436_v30 = vpack.c.bf16 %v2621_v33, %v2620_v50  ;;  %v3468_v29 = vpack.c.bf16 %v2653_v23, %v2652_v58  ;;  %v2623_v13 = vld [vmem:[%s5197_s4 + $0x278] sm:$0xff] }
 0x55f   : > { %3423 = vmatprep.subr.bf16.mxu0 %v3422_v4  ;;  %v2518_v4 = vld [vmem:[#allocation2 + $0x70] sm:$0xff]  ;;  %v3440_v17 = vpack.c.bf16 %v2623_v13, %v2622_v27 }
 0x560   : > { %v2534_v6 = vmul.f32 %v2518_v4, %v2518_v4 }
 0x561   : > { %3453 = vmatpush3.bf16.msra.mxu1 %v3452_v45  ;;  %v2510_v45 = vld [vmem:[#allocation2 + $0x30] sm:$0xff] }
 0x562   : > { %3455 = vmatprep.subr.bf16.mxu1 %v3454_v51  ;;  %3425 = vmatpush3.bf16.msra.mxu0 %v3424_v38  ;;  %v2524_v51 = vmul.f32 %v2508_v44, %v2508_v44  ;;  %v2526_v37 = vmul.f32 %v2510_v45, %v2510_v45 }
 0x563   : > { %3427 = vmatprep.subr.bf16.mxu0 %v3426_v60  ;;  %v3871_v60 = vmov 0.0|0.0  }
 0x564   : > { %v2540_v38 = vadd.f32 %v2532_v15, %v2524_v51  ;;  %v2542_v47 = vadd.f32 %v2534_v6, %v2526_v37 }
 0x565   : > { %3457 = vmatpush3.bf16.msra.mxu1 %v3456_v54  ;;  %v3475_v54 = vpack.c.bf16 %v2963_v16, %v2962_v53 }
 0x566   : > { %3459 = vmatprep.subr.bf16.mxu1 %v3458_v61  ;;  %3429 = vmatpush3.bf16.msra.mxu0 %v3428_v19  ;;  %v3873_v61 = vmov 0.0  }
 0x567   : > { %3431 = vmatprep.subr.bf16.mxu0 %v3430_v59 }
 0x569   : > { %3461 = vmatpush3.bf16.msra.mxu1 %v3460_v57 }
 0x56a   : > { %3463 = vmatprep.subr.bf16.mxu1 %v3462_v5  ;;  %3433 = vmatpush3.bf16.msra.mxu0 %v3432_v41  ;;  %v2960_v5 = vld [vmem:[#allocation3] sm:$0xff] }
 0x56b   : > { %3435 = vmatprep.subr.bf16.mxu0 %v3434_v63 }
 0x56d   : > { %3465 = vmatpush3.bf16.msra.mxu1 %v3464_v42 }
 0x56e   : > { %3467 = vmatprep.subr.bf16.mxu1 %v3466_v32  ;;  %3437 = vmatpush3.bf16.msra.mxu0 %v3436_v30 }
 0x56f   : > { %3439 = vmatprep.subr.bf16.mxu0 %v3438_v43 }
 0x571   : > { %3469 = vmatpush3.bf16.msra.mxu1 %v3468_v29 }
 0x572   : > { %3471 = vmatprep.subr.bf16.mxu1 %v3470_v49  ;;  %3441 = vmatpush3.bf16.msra.mxu0 %v3440_v17 }
 0x573   : > { %3474 = vmatprep.subr.bf16.mxu0 %v3871_v60 }
 0x575   : > { %3473 = vmatpush3.bf16.msra.mxu1 %v3472_v22  ;;  %2884 = vmatmul.mubr.f32.vlgmr.msra.gmra.mrb[2].mxu0 %v2540_v38 }
 0x576   : > { %3476 = vmatpush3.bf16.msra.mxu0 %v3475_v54  ;;  %3340 = vmatprep.mubr.msk.f32.mxu0 %vm3872_vm4, %v3873_v61 }
 0x577   : > { %3477 = vmatprep.subr.bf16.mxu0 %v3871_v60 }
 0x578   : > { %2954 = vmatmul.mubr.f32.vlgmr.msra.gmra.mrb[2].mxu1 %v2542_v47 }
 0x57a   : > { %3479 = vmatpush3.bf16.msra.mxu0 %v3478_v55 }
 0x628   : > { %v3212_v10 = vpop.f32.mrb[0].mxu0 }
 0x629   : > { %v3213_v0 = vpop.f32.mrb[1].mxu0 }
 0x62a   : > { %v3214_v25 = vadd.f32 %v3213_v0, %v3212_v10 }
 0x62b   : > { %v3247_v62 = vpop.f32.mrb[0].mxu1 }
 0x62c   : > { %v3248_v40 = vpop.f32.mrb[1].mxu1  ;;  %v2746_v52 = vadd.f32 %v3214_v25, %v3170_v1 }
 0x62d   : > { %v3249_v18 = vadd.f32 %v3248_v40, %v3247_v62 }
 0x62f   : > { %v2816_v36 = vadd.f32 %v3249_v18, %v2746_v52 }
 0x648   : > { %v3282_v19 = vpop.f32.mrb[2].mxu0 }
 0x649   : > { %v3283_v35 = vpop.f32.mrb[3].mxu0 }
 0x64a   : > { %v3284_v57 = vadd.f32 %v3283_v35, %v3282_v19 }
 0x64b   : > { %v3317_v48 = vpop.f32.mrb[2].mxu1 }
 0x64c   : > { %v3318_v59 = vpop.f32.mrb[3].mxu1  ;;  %v2886_v7 = vadd.f32 %v3284_v57, %v2816_v36 }
 0x64d   : > { %v3319_v34 = vadd.f32 %v3318_v59, %v3317_v48 }
 0x64f   : > { %v2956_v20 = vadd.f32 %v3319_v34, %v2886_v7 }
 0x651   : > { %v2959_v9 = vmax.f32 %v2956_v20, 0.0 }
 0x653   : > { %v2961_v2 = vadd.f32 %v2960_v5, %v2959_v9 }
 0x655   : > { %3341 = vmatmul.mubr.msk.f32.vlgmr.msra.gmra.mrb[4].mxu0 %vm2973_vm5, %v2961_v2 }
 0x728   : > { %v3043_v3 = vpop.f32.mrb[4].mxu0 }
 0x729   : > { %v3044_v28 = vadd.f32 %v3171_v12, %v3043_v3  ;;  %v3342_v21 = vpop.f32.mrb[5].mxu0 }
 0x72b   : > { %3048 = vst.msk [vmem:[%s5201_s8] sm:$0xff] %vm3047_vm6, %v3044_v28 }
 0x72c PF: > { %p21_p9 = scmp.ge.s32.totalorder %s4080_s24, 4   ;;  %s5253_s27 = smov %s3833_s28 }
 0x72d   : > { %s5254_s28 = smov %s3837_s29  ;;  %s5255_s29 = smov %s4090_s22 }
 0x72e   : > { %s5256_s30 = smov %s4080_s24  ;;  %23 = sbr.rel (!%p21_p9) target bundleno = 6 (0x6), region = 117 }
 0x735   :  { %3060 = vsyncpa [#allocation7], 1 }
 0x736   :  { %3062 = vsyncpa [#allocation7 + $0x1], 1 }
 0x737   :  { %3063 = vsyncpa [#allocation9], 1 }
 0x738   :  { %3064 = vsyncpa [#allocation12], 1 }
 0x739   :  { %3066 = vsyncpa [#allocation12 + $0x1], 1 }
 0x73a   :  { %3067 = vsyncpa [#allocation15], 1 }

</bundles_post_ra>
